<compile_context>
chip_gen: v6e
topology: v6e:2x2x1
jax: 0.10.0
libtpu: 0.0.40
codegen_flags: <defaults>
</compile_context>

<pallas_src>
import functools

import jax
import jax.numpy as jnp
from jax.experimental import pallas as pl
from jax.experimental.pallas import tpu as pltpu

EPS = 1e-5  # nn.InstanceNorm2d default eps, affine=False


# ---------------------------------------------------------------------------
# In-kernel helpers
# ---------------------------------------------------------------------------
def _fill_reflect_pad(pad_ref, x, p, H, W):
    """Write PyTorch ReflectionPad2d(p) of x (H, W, C) into pad_ref, a
    (H+2p, W+2p, C) f32 VMEM scratch: one interior store + 2p row strips +
    2p column strips (columns copied from the already row-padded scratch,
    so corners are handled). No concatenates -> fewer relayout copies."""
    pad_ref[p:p + H, p:p + W, :] = x
    for i in range(p):  # top / bottom rows (reflect, no edge repeat)
        pad_ref[i:i + 1, p:p + W, :] = x[p - i:p - i + 1, :, :]
        pad_ref[p + H + i:p + H + i + 1, p:p + W, :] = x[H - 2 - i:H - 1 - i, :, :]
    for i in range(p):  # left / right columns, incl. corners
        pad_ref[:, i:i + 1, :] = pad_ref[:, 2 * p - i:2 * p - i + 1, :]
        pad_ref[:, p + W + i:p + W + i + 1, :] = \
            pad_ref[:, p + W - 2 - i:p + W - 1 - i, :]


def _instance_norm(y):
    """One-pass InstanceNorm (affine=False) over the spatial axis of a
    (H*W, C) f32 tile; statistics in f32."""
    mean = jnp.mean(y, axis=0, keepdims=True)
    var = jnp.maximum(jnp.mean(y * y, axis=0, keepdims=True) - mean * mean, 0.0)
    return (y - mean) * jax.lax.rsqrt(var + EPS)


def _conv3x3(pad_ref, w_ref, d, H, W, C):
    """Dilated 3x3 conv as 9 accumulating (H*W, C) x (C, C) MXU matmuls
    against shifted views of the reflection-padded VMEM tile.

    Operands are cast to bf16 (native MXU throughput on v5e/v6e/v7x);
    accumulation stays f32 via preferred_element_type."""
    xp = pad_ref[...].astype(jnp.bfloat16)  # (H+2d, W+2d, C)
    acc = None
    for kh in range(3):
        for kw in range(3):
            tap = xp[kh * d:kh * d + H, kw * d:kw * d + W, :].reshape(H * W, C)
            part = jnp.dot(tap, w_ref[kh * 3 + kw],
                           preferred_element_type=jnp.float32)
            acc = part if acc is None else acc + part
    # TODO(synk): K-pack taps into an in-VMEM (H*W, 9C) strip (or use
    # pltpu.roll for the kw shifts) for C >= 128 on v6e/v7x.
    return acc  # (H*W, C) f32


# ---------------------------------------------------------------------------
# Fused ResnetBlock kernel: one batch sample per grid step
# ---------------------------------------------------------------------------
def _resnet_block_kernel(x_ref, w1_ref, w2_ref, o_ref, pad1_ref, pad2_ref, *,
                         dilation):
    # x_ref/o_ref: (1, H, W, C) f32   w1_ref/w2_ref: (9, C, C) bf16
    # pad1_ref: (H+2d, W+2d, C) f32   pad2_ref: (H+2, W+2, C) f32
    _, H, W, C = x_ref.shape
    d = dilation
    x = x_ref[0]  # (H, W, C) f32, VMEM resident (also the residual)

    # stage 1: ReflectionPad(d) -> Conv3x3(dilation=d) -> InstanceNorm -> ReLU
    # (conv bias omitted: it cancels exactly under InstanceNorm(affine=False))
    _fill_reflect_pad(pad1_ref, x, d, H, W)
    h = _instance_norm(_conv3x3(pad1_ref, w1_ref, d, H, W, C))
    h = jnp.maximum(h, 0.0)  # activate == 'relu' (module default)
    # TODO(synk): activate == 'leaky_relu' variant -> jnp.where(h > 0, h, 0.2*h)

    # stage 2: ReflectionPad(1) -> Conv3x3 -> InstanceNorm, then residual add
    _fill_reflect_pad(pad2_ref, h.reshape(H, W, C), 1, H, W)
    y = _instance_norm(_conv3x3(pad2_ref, w2_ref, 1, H, W, C))

    o_ref[0] = x + y.reshape(H, W, C)


# ---------------------------------------------------------------------------
# Host-side wrapper
# ---------------------------------------------------------------------------
def _pack_weight(w_oihw):
    # (C_out, C_in, 3, 3) -> (9, C_in, C_out), tap order (kh, kw), bf16.
    w = jnp.transpose(w_oihw.astype(jnp.float32), (2, 3, 1, 0))  # (3,3,Ci,Co)
    return w.reshape(9, w.shape[2], w.shape[3]).astype(jnp.bfloat16)


def _vmem_limit_bytes():
    """Generation-aware VMEM cap: ~3/4 of physical (v5e/v6e 128 MiB -> 96 MiB,
    v7x 64 MiB -> 48 MiB), with a safe fallback."""
    cap = 128 * 1024 * 1024
    try:
        info = pltpu.get_tpu_info()
        cap = int(getattr(info, "vmem_capacity_bytes", cap))
    except Exception:
        pass
    return int(min((cap * 3) // 4, 100 * 1024 * 1024))


def resnet_block_forward(x_nchw, w1, b1, w2, b2, dilation=1):
    """ResnetBlock forward. x_nchw: (N, C, H, W) f32 -> (N, C, H, W) f32.

    b1/b2 accepted for API parity with nn.Conv2d but unused: a per-channel
    bias is exactly removed by InstanceNorm2d(affine=False)."""
    del b1, b2
    N, C, H, W = x_nchw.shape
    d = int(dilation)

    # NHWC so channels sit on the lane axis; no HBM channel padding (a
    # full-extent last dim is exempt from the (8,128) block rule and only the
    # real C channels are DMA'd).
    # TODO(synk): keep activations NHWC across the surrounding graph to drop
    # these two full-tensor transpose passes.
    x_nhwc = jnp.transpose(x_nchw, (0, 2, 3, 1)).astype(jnp.float32)
    w1p = _pack_weight(w1)
    w2p = _pack_weight(w2)

    kernel = functools.partial(_resnet_block_kernel, dilation=d)
    out = pl.pallas_call(
        kernel,
        out_shape=jax.ShapeDtypeStruct((N, H, W, C), jnp.float32),
        grid_spec=pltpu.PrefetchScalarGridSpec(
            num_scalar_prefetch=0,
            grid=(N,),
            in_specs=[
                pl.BlockSpec((1, H, W, C), lambda n: (n, 0, 0, 0)),
                pl.BlockSpec((9, C, C), lambda n: (0, 0, 0)),
                pl.BlockSpec((9, C, C), lambda n: (0, 0, 0)),
            ],
            out_specs=pl.BlockSpec((1, H, W, C), lambda n: (n, 0, 0, 0)),
            scratch_shapes=[
                pltpu.VMEM((H + 2 * d, W + 2 * d, C), jnp.float32),
                pltpu.VMEM((H + 2, W + 2, C), jnp.float32),
            ],
        ),
        compiler_params=pltpu.CompilerParams(
            dimension_semantics=("parallel",),
            vmem_limit_bytes=_vmem_limit_bytes(),
        ),
    )(x_nhwc, w1p, w2p)
    return jnp.transpose(out, (0, 3, 1, 2))


# ---------------------------------------------------------------------------
# Pure-JAX reference (matches the PyTorch module, including conv bias, f32)
# ---------------------------------------------------------------------------
def _reference(x, w1, b1, w2, b2, dilation):
    def conv(x, w, b, d):
        xp = jnp.pad(x, ((0, 0), (0, 0), (d, d), (d, d)), mode="reflect")
        y = jax.lax.conv_general_dilated(
            xp, w, window_strides=(1, 1), padding="VALID",
            rhs_dilation=(d, d),
            dimension_numbers=("NCHW", "OIHW", "NCHW"))
        return y + b.reshape(1, -1, 1, 1)

    def inorm(y):
        mean = y.mean(axis=(2, 3), keepdims=True)
        var = ((y - mean) ** 2).mean(axis=(2, 3), keepdims=True)
        return (y - mean) * jax.lax.rsqrt(var + EPS)

    h = jnp.maximum(inorm(conv(x, w1, b1, dilation)), 0.0)
    h = inorm(conv(h, w2, b2, 1))
    return x + h


if __name__ == "__main__":
    N, dim, H, W = 2, 4, 16, 16

    key = jax.random.PRNGKey(0)
    k1, k2, k3, k4, k5 = jax.random.split(key, 5)
    x = jax.random.normal(k1, (N, dim, H, W), dtype=jnp.float32)
    w1 = jax.random.normal(k2, (dim, dim, 3, 3), dtype=jnp.float32) * 0.1
    b1 = jax.random.normal(k3, (dim,), dtype=jnp.float32) * 0.1
    w2 = jax.random.normal(k4, (dim, dim, 3, 3), dtype=jnp.float32) * 0.1
    b2 = jax.random.normal(k5, (dim,), dtype=jnp.float32) * 0.1

    for dilation in (1, 2):
        out = jax.block_until_ready(
            resnet_block_forward(x, w1, b1, w2, b2, dilation))
        ref = jax.block_until_ready(_reference(x, w1, b1, w2, b2, dilation))
        assert out.shape == (N, dim, H, W)
        # bf16 matmul operands (f32 accumulation / statistics): tolerance
        # loosened vs the f32 reference; outputs are InstanceNorm'd ~O(1).
        max_err = float(jnp.max(jnp.abs(out - ref)))
        assert jnp.allclose(out, ref, rtol=5e-2, atol=5e-2), \
            f"mismatch vs reference (dilation={dilation}, max_abs_err={max_err})"

    print("KERNEL_OK")
</pallas_src>

<mosaic_0001>
module attributes {stable_mosaic.version = 11 : i64} {
  func.func @_resnet_block_kernel(%arg0: i32, %arg1: memref<1x16x16x4xf32, #tpu.memory_space<vmem>>, %arg2: memref<9x4x4xbf16, #tpu.memory_space<vmem>>, %arg3: memref<9x4x4xbf16, #tpu.memory_space<vmem>>, %arg4: memref<1x16x16x4xf32, #tpu.memory_space<vmem>>, %arg5: memref<18x18x4xf32, #tpu.memory_space<vmem>>, %arg6: memref<18x18x4xf32, #tpu.memory_space<vmem>>) attributes {dimension_semantics = [#tpu.dimension_semantics<parallel>], iteration_bounds = array<i64: 2>, scalar_prefetch = 0 : i64, scratch_operands = 2 : i64, tpu.core_type = #tpu.core_type<tc>, window_params = [{transform_indices = @transform_0, window_bounds = array<i64: 1, 16, 16, 4>}, {pipeline_mode = #tpu.pipeline_mode<synchronous>, transform_indices = @transform_1, window_bounds = array<i64: 9, 4, 4>}, {pipeline_mode = #tpu.pipeline_mode<synchronous>, transform_indices = @transform_2, window_bounds = array<i64: 9, 4, 4>}, {transform_indices = @transform_3, window_bounds = array<i64: 1, 16, 16, 4>}]} {
    %c0 = arith.constant 0 : index
    %c0_0 = arith.constant 0 : index
    %c0_1 = arith.constant 0 : index
    %c0_2 = arith.constant 0 : index
    %0 = vector.load %arg1[%c0, %c0_0, %c0_1, %c0_2] : memref<1x16x16x4xf32, #tpu.memory_space<vmem>>, vector<1x16x16x4xf32>
    %1 = vector.shape_cast %0 : vector<1x16x16x4xf32> to vector<16x16x4xf32>
    %c1 = arith.constant 1 : index
    %c1_3 = arith.constant 1 : index
    %c0_4 = arith.constant 0 : index
    %2 = vector.load %arg5[%c1, %c1_3, %c0_4] : memref<18x18x4xf32, #tpu.memory_space<vmem>>, vector<16x16x4xf32>
    tpu.vector_store %arg5[%c1, %c1_3, %c0_4], %1 {strides = array<i32>} : memref<18x18x4xf32, #tpu.memory_space<vmem>>, vector<16x16x4xf32>,
    %3 = vector.extract_strided_slice %1 {offsets = [1, 0, 0], sizes = [1, 16, 4], strides = [1, 1, 1]} : vector<16x16x4xf32> to vector<1x16x4xf32>
    %c0_5 = arith.constant 0 : index
    %c1_6 = arith.constant 1 : index
    %c0_7 = arith.constant 0 : index
    %4 = vector.load %arg5[%c0_5, %c1_6, %c0_7] : memref<18x18x4xf32, #tpu.memory_space<vmem>>, vector<1x16x4xf32>
    tpu.vector_store %arg5[%c0_5, %c1_6, %c0_7], %3 {strides = array<i32>} : memref<18x18x4xf32, #tpu.memory_space<vmem>>, vector<1x16x4xf32>,
    %5 = vector.extract_strided_slice %1 {offsets = [14, 0, 0], sizes = [1, 16, 4], strides = [1, 1, 1]} : vector<16x16x4xf32> to vector<1x16x4xf32>
    %c17 = arith.constant 17 : index
    %c1_8 = arith.constant 1 : index
    %c0_9 = arith.constant 0 : index
    %6 = vector.load %arg5[%c17, %c1_8, %c0_9] : memref<18x18x4xf32, #tpu.memory_space<vmem>>, vector<1x16x4xf32>
    tpu.vector_store %arg5[%c17, %c1_8, %c0_9], %5 {strides = array<i32>} : memref<18x18x4xf32, #tpu.memory_space<vmem>>, vector<1x16x4xf32>,
    %c0_10 = arith.constant 0 : index
    %c2 = arith.constant 2 : index
    %c0_11 = arith.constant 0 : index
    %7 = vector.load %arg5[%c0_10, %c2, %c0_11] : memref<18x18x4xf32, #tpu.memory_space<vmem>>, vector<18x1x4xf32>
    %c0_12 = arith.constant 0 : index
    %c0_13 = arith.constant 0 : index
    %c0_14 = arith.constant 0 : index
    %8 = vector.load %arg5[%c0_12, %c0_13, %c0_14] : memref<18x18x4xf32, #tpu.memory_space<vmem>>, vector<18x1x4xf32>
    tpu.vector_store %arg5[%c0_12, %c0_13, %c0_14], %7 {strides = array<i32>} : memref<18x18x4xf32, #tpu.memory_space<vmem>>, vector<18x1x4xf32>,
    %c0_15 = arith.constant 0 : index
    %c15 = arith.constant 15 : index
    %c0_16 = arith.constant 0 : index
    %9 = vector.load %arg5[%c0_15, %c15, %c0_16] : memref<18x18x4xf32, #tpu.memory_space<vmem>>, vector<18x1x4xf32>
    %c0_17 = arith.constant 0 : index
    %c17_18 = arith.constant 17 : index
    %c0_19 = arith.constant 0 : index
    %10 = vector.load %arg5[%c0_17, %c17_18, %c0_19] : memref<18x18x4xf32, #tpu.memory_space<vmem>>, vector<18x1x4xf32>
    tpu.vector_store %arg5[%c0_17, %c17_18, %c0_19], %9 {strides = array<i32>} : memref<18x18x4xf32, #tpu.memory_space<vmem>>, vector<18x1x4xf32>,
    %c0_20 = arith.constant 0 : index
    %c0_21 = arith.constant 0 : index
    %c0_22 = arith.constant 0 : index
    %11 = vector.load %arg5[%c0_20, %c0_21, %c0_22] : memref<18x18x4xf32, #tpu.memory_space<vmem>>, vector<18x18x4xf32>
    %12 = arith.truncf %11 : vector<18x18x4xf32> to vector<18x18x4xbf16>
    %13 = vector.extract_strided_slice %12 {offsets = [0, 0, 0], sizes = [16, 16, 4], strides = [1, 1, 1]} : vector<18x18x4xbf16> to vector<16x16x4xbf16>
    %14 = vector.shape_cast %13 : vector<16x16x4xbf16> to vector<256x4xbf16>
    %c0_23 = arith.constant 0 : index
    %c0_24 = arith.constant 0 : index
    %c0_25 = arith.constant 0 : index
    %15 = vector.load %arg2[%c0_23, %c0_24, %c0_25] : memref<9x4x4xbf16, #tpu.memory_space<vmem>>, vector<1x4x4xbf16>
    %16 = vector.shape_cast %15 : vector<1x4x4xbf16> to vector<4x4xbf16>
    %cst = arith.constant dense<0.000000e+00> : vector<256x4xf32>
    %17 = tpu.matmul %14, %16, %cst {dimension_numbers = #tpu.dot_dimension_numbers<[1], [0], [0], [1], [0, 0, 1, 1], [], []>} : vector<256x4xbf16>, vector<4x4xbf16>, vector<256x4xf32> -> vector<256x4xf32>
    %18 = vector.extract_strided_slice %12 {offsets = [0, 1, 0], sizes = [16, 16, 4], strides = [1, 1, 1]} : vector<18x18x4xbf16> to vector<16x16x4xbf16>
    %19 = vector.shape_cast %18 : vector<16x16x4xbf16> to vector<256x4xbf16>
    %c1_26 = arith.constant 1 : index
    %c0_27 = arith.constant 0 : index
    %c0_28 = arith.constant 0 : index
    %20 = vector.load %arg2[%c1_26, %c0_27, %c0_28] : memref<9x4x4xbf16, #tpu.memory_space<vmem>>, vector<1x4x4xbf16>
    %21 = vector.shape_cast %20 : vector<1x4x4xbf16> to vector<4x4xbf16>
    %cst_29 = arith.constant dense<0.000000e+00> : vector<256x4xf32>
    %22 = tpu.matmul %19, %21, %cst_29 {dimension_numbers = #tpu.dot_dimension_numbers<[1], [0], [0], [1], [0, 0, 1, 1], [], []>} : vector<256x4xbf16>, vector<4x4xbf16>, vector<256x4xf32> -> vector<256x4xf32>
    %23 = arith.addf %17, %22 : vector<256x4xf32>
    %24 = vector.extract_strided_slice %12 {offsets = [0, 2, 0], sizes = [16, 16, 4], strides = [1, 1, 1]} : vector<18x18x4xbf16> to vector<16x16x4xbf16>
    %25 = vector.shape_cast %24 : vector<16x16x4xbf16> to vector<256x4xbf16>
    %c2_30 = arith.constant 2 : index
    %c0_31 = arith.constant 0 : index
    %c0_32 = arith.constant 0 : index
    %26 = vector.load %arg2[%c2_30, %c0_31, %c0_32] : memref<9x4x4xbf16, #tpu.memory_space<vmem>>, vector<1x4x4xbf16>
    %27 = vector.shape_cast %26 : vector<1x4x4xbf16> to vector<4x4xbf16>
    %cst_33 = arith.constant dense<0.000000e+00> : vector<256x4xf32>
    %28 = tpu.matmul %25, %27, %cst_33 {dimension_numbers = #tpu.dot_dimension_numbers<[1], [0], [0], [1], [0, 0, 1, 1], [], []>} : vector<256x4xbf16>, vector<4x4xbf16>, vector<256x4xf32> -> vector<256x4xf32>
    %29 = arith.addf %23, %28 : vector<256x4xf32>
    %30 = vector.extract_strided_slice %12 {offsets = [1, 0, 0], sizes = [16, 16, 4], strides = [1, 1, 1]} : vector<18x18x4xbf16> to vector<16x16x4xbf16>
    %31 = vector.shape_cast %30 : vector<16x16x4xbf16> to vector<256x4xbf16>
    %c3 = arith.constant 3 : index
    %c0_34 = arith.constant 0 : index
    %c0_35 = arith.constant 0 : index
    %32 = vector.load %arg2[%c3, %c0_34, %c0_35] : memref<9x4x4xbf16, #tpu.memory_space<vmem>>, vector<1x4x4xbf16>
    %33 = vector.shape_cast %32 : vector<1x4x4xbf16> to vector<4x4xbf16>
    %cst_36 = arith.constant dense<0.000000e+00> : vector<256x4xf32>
    %34 = tpu.matmul %31, %33, %cst_36 {dimension_numbers = #tpu.dot_dimension_numbers<[1], [0], [0], [1], [0, 0, 1, 1], [], []>} : vector<256x4xbf16>, vector<4x4xbf16>, vector<256x4xf32> -> vector<256x4xf32>
    %35 = arith.addf %29, %34 : vector<256x4xf32>
    %36 = vector.extract_strided_slice %12 {offsets = [1, 1, 0], sizes = [16, 16, 4], strides = [1, 1, 1]} : vector<18x18x4xbf16> to vector<16x16x4xbf16>
    %37 = vector.shape_cast %36 : vector<16x16x4xbf16> to vector<256x4xbf16>
    %c4 = arith.constant 4 : index
    %c0_37 = arith.constant 0 : index
    %c0_38 = arith.constant 0 : index
    %38 = vector.load %arg2[%c4, %c0_37, %c0_38] : memref<9x4x4xbf16, #tpu.memory_space<vmem>>, vector<1x4x4xbf16>
    %39 = vector.shape_cast %38 : vector<1x4x4xbf16> to vector<4x4xbf16>
    %cst_39 = arith.constant dense<0.000000e+00> : vector<256x4xf32>
    %40 = tpu.matmul %37, %39, %cst_39 {dimension_numbers = #tpu.dot_dimension_numbers<[1], [0], [0], [1], [0, 0, 1, 1], [], []>} : vector<256x4xbf16>, vector<4x4xbf16>, vector<256x4xf32> -> vector<256x4xf32>
    %41 = arith.addf %35, %40 : vector<256x4xf32>
    %42 = vector.extract_strided_slice %12 {offsets = [1, 2, 0], sizes = [16, 16, 4], strides = [1, 1, 1]} : vector<18x18x4xbf16> to vector<16x16x4xbf16>
    %43 = vector.shape_cast %42 : vector<16x16x4xbf16> to vector<256x4xbf16>
    %c5 = arith.constant 5 : index
    %c0_40 = arith.constant 0 : index
    %c0_41 = arith.constant 0 : index
    %44 = vector.load %arg2[%c5, %c0_40, %c0_41] : memref<9x4x4xbf16, #tpu.memory_space<vmem>>, vector<1x4x4xbf16>
    %45 = vector.shape_cast %44 : vector<1x4x4xbf16> to vector<4x4xbf16>
    %cst_42 = arith.constant dense<0.000000e+00> : vector<256x4xf32>
    %46 = tpu.matmul %43, %45, %cst_42 {dimension_numbers = #tpu.dot_dimension_numbers<[1], [0], [0], [1], [0, 0, 1, 1], [], []>} : vector<256x4xbf16>, vector<4x4xbf16>, vector<256x4xf32> -> vector<256x4xf32>
    %47 = arith.addf %41, %46 : vector<256x4xf32>
    %48 = vector.extract_strided_slice %12 {offsets = [2, 0, 0], sizes = [16, 16, 4], strides = [1, 1, 1]} : vector<18x18x4xbf16> to vector<16x16x4xbf16>
    %49 = vector.shape_cast %48 : vector<16x16x4xbf16> to vector<256x4xbf16>
    %c6 = arith.constant 6 : index
    %c0_43 = arith.constant 0 : index
    %c0_44 = arith.constant 0 : index
    %50 = vector.load %arg2[%c6, %c0_43, %c0_44] : memref<9x4x4xbf16, #tpu.memory_space<vmem>>, vector<1x4x4xbf16>
    %51 = vector.shape_cast %50 : vector<1x4x4xbf16> to vector<4x4xbf16>
    %cst_45 = arith.constant dense<0.000000e+00> : vector<256x4xf32>
    %52 = tpu.matmul %49, %51, %cst_45 {dimension_numbers = #tpu.dot_dimension_numbers<[1], [0], [0], [1], [0, 0, 1, 1], [], []>} : vector<256x4xbf16>, vector<4x4xbf16>, vector<256x4xf32> -> vector<256x4xf32>
    %53 = arith.addf %47, %52 : vector<256x4xf32>
    %54 = vector.extract_strided_slice %12 {offsets = [2, 1, 0], sizes = [16, 16, 4], strides = [1, 1, 1]} : vector<18x18x4xbf16> to vector<16x16x4xbf16>
    %55 = vector.shape_cast %54 : vector<16x16x4xbf16> to vector<256x4xbf16>
    %c7 = arith.constant 7 : index
    %c0_46 = arith.constant 0 : index
    %c0_47 = arith.constant 0 : index
    %56 = vector.load %arg2[%c7, %c0_46, %c0_47] : memref<9x4x4xbf16, #tpu.memory_space<vmem>>, vector<1x4x4xbf16>
    %57 = vector.shape_cast %56 : vector<1x4x4xbf16> to vector<4x4xbf16>
    %cst_48 = arith.constant dense<0.000000e+00> : vector<256x4xf32>
    %58 = tpu.matmul %55, %57, %cst_48 {dimension_numbers = #tpu.dot_dimension_numbers<[1], [0], [0], [1], [0, 0, 1, 1], [], []>} : vector<256x4xbf16>, vector<4x4xbf16>, vector<256x4xf32> -> vector<256x4xf32>
    %59 = arith.addf %53, %58 : vector<256x4xf32>
    %60 = vector.extract_strided_slice %12 {offsets = [2, 2, 0], sizes = [16, 16, 4], strides = [1, 1, 1]} : vector<18x18x4xbf16> to vector<16x16x4xbf16>
    %61 = vector.shape_cast %60 : vector<16x16x4xbf16> to vector<256x4xbf16>
    %c8 = arith.constant 8 : index
    %c0_49 = arith.constant 0 : index
    %c0_50 = arith.constant 0 : index
    %62 = vector.load %arg2[%c8, %c0_49, %c0_50] : memref<9x4x4xbf16, #tpu.memory_space<vmem>>, vector<1x4x4xbf16>
    %63 = vector.shape_cast %62 : vector<1x4x4xbf16> to vector<4x4xbf16>
    %cst_51 = arith.constant dense<0.000000e+00> : vector<256x4xf32>
    %64 = tpu.matmul %61, %63, %cst_51 {dimension_numbers = #tpu.dot_dimension_numbers<[1], [0], [0], [1], [0, 0, 1, 1], [], []>} : vector<256x4xbf16>, vector<4x4xbf16>, vector<256x4xf32> -> vector<256x4xf32>
    %65 = arith.addf %59, %64 : vector<256x4xf32>
    %cst_52 = arith.constant dense<0.000000e+00> : vector<4xf32>
    %66 = vector.multi_reduction <add>, %65, %cst_52 [0] : vector<256x4xf32> to vector<4xf32>
    %67 = vector.shape_cast %66 : vector<4xf32> to vector<1x4xf32>
    %cst_53 = arith.constant 2.560000e+02 : f32
    %68 = vector.broadcast %cst_53 : f32 to vector<1x4xf32>
    %69 = arith.divf %67, %68 : vector<1x4xf32>
    %70 = arith.mulf %65, %65 : vector<256x4xf32>
    %cst_54 = arith.constant dense<0.000000e+00> : vector<4xf32>
    %71 = vector.multi_reduction <add>, %70, %cst_54 [0] : vector<256x4xf32> to vector<4xf32>
    %72 = vector.shape_cast %71 : vector<4xf32> to vector<1x4xf32>
    %cst_55 = arith.constant 2.560000e+02 : f32
    %73 = vector.broadcast %cst_55 : f32 to vector<1x4xf32>
    %74 = arith.divf %72, %73 : vector<1x4xf32>
    %75 = arith.mulf %69, %69 : vector<1x4xf32>
    %76 = arith.subf %74, %75 : vector<1x4xf32>
    %cst_56 = arith.constant 0.000000e+00 : f32
    %77 = vector.broadcast %cst_56 : f32 to vector<1x4xf32>
    %78 = arith.maximumf %76, %77 : vector<1x4xf32>
    %79 = vector.broadcast %69 : vector<1x4xf32> to vector<256x4xf32>
    %80 = arith.subf %65, %79 : vector<256x4xf32>
    %cst_57 = arith.constant 9.99999974E-6 : f32
    %81 = vector.broadcast %cst_57 : f32 to vector<1x4xf32>
    %82 = arith.addf %78, %81 : vector<1x4xf32>
    %83 = math.rsqrt %82 : vector<1x4xf32>
    %84 = vector.broadcast %83 : vector<1x4xf32> to vector<256x4xf32>
    %85 = arith.mulf %80, %84 : vector<256x4xf32>
    %cst_58 = arith.constant 0.000000e+00 : f32
    %86 = vector.broadcast %cst_58 : f32 to vector<256x4xf32>
    %87 = arith.maximumf %85, %86 : vector<256x4xf32>
    %88 = vector.shape_cast %87 : vector<256x4xf32> to vector<16x16x4xf32>
    %c1_59 = arith.constant 1 : index
    %c1_60 = arith.constant 1 : index
    %c0_61 = arith.constant 0 : index
    %89 = vector.load %arg6[%c1_59, %c1_60, %c0_61] : memref<18x18x4xf32, #tpu.memory_space<vmem>>, vector<16x16x4xf32>
    tpu.vector_store %arg6[%c1_59, %c1_60, %c0_61], %88 {strides = array<i32>} : memref<18x18x4xf32, #tpu.memory_space<vmem>>, vector<16x16x4xf32>,
    %90 = vector.extract_strided_slice %88 {offsets = [1, 0, 0], sizes = [1, 16, 4], strides = [1, 1, 1]} : vector<16x16x4xf32> to vector<1x16x4xf32>
    %c0_62 = arith.constant 0 : index
    %c1_63 = arith.constant 1 : index
    %c0_64 = arith.constant 0 : index
    %91 = vector.load %arg6[%c0_62, %c1_63, %c0_64] : memref<18x18x4xf32, #tpu.memory_space<vmem>>, vector<1x16x4xf32>
    tpu.vector_store %arg6[%c0_62, %c1_63, %c0_64], %90 {strides = array<i32>} : memref<18x18x4xf32, #tpu.memory_space<vmem>>, vector<1x16x4xf32>,
    %92 = vector.extract_strided_slice %88 {offsets = [14, 0, 0], sizes = [1, 16, 4], strides = [1, 1, 1]} : vector<16x16x4xf32> to vector<1x16x4xf32>
    %c17_65 = arith.constant 17 : index
    %c1_66 = arith.constant 1 : index
    %c0_67 = arith.constant 0 : index
    %93 = vector.load %arg6[%c17_65, %c1_66, %c0_67] : memref<18x18x4xf32, #tpu.memory_space<vmem>>, vector<1x16x4xf32>
    tpu.vector_store %arg6[%c17_65, %c1_66, %c0_67], %92 {strides = array<i32>} : memref<18x18x4xf32, #tpu.memory_space<vmem>>, vector<1x16x4xf32>,
    %c0_68 = arith.constant 0 : index
    %c2_69 = arith.constant 2 : index
    %c0_70 = arith.constant 0 : index
    %94 = vector.load %arg6[%c0_68, %c2_69, %c0_70] : memref<18x18x4xf32, #tpu.memory_space<vmem>>, vector<18x1x4xf32>
    %c0_71 = arith.constant 0 : index
    %c0_72 = arith.constant 0 : index
    %c0_73 = arith.constant 0 : index
    %95 = vector.load %arg6[%c0_71, %c0_72, %c0_73] : memref<18x18x4xf32, #tpu.memory_space<vmem>>, vector<18x1x4xf32>
    tpu.vector_store %arg6[%c0_71, %c0_72, %c0_73], %94 {strides = array<i32>} : memref<18x18x4xf32, #tpu.memory_space<vmem>>, vector<18x1x4xf32>,
    %c0_74 = arith.constant 0 : index
    %c15_75 = arith.constant 15 : index
    %c0_76 = arith.constant 0 : index
    %96 = vector.load %arg6[%c0_74, %c15_75, %c0_76] : memref<18x18x4xf32, #tpu.memory_space<vmem>>, vector<18x1x4xf32>
    %c0_77 = arith.constant 0 : index
    %c17_78 = arith.constant 17 : index
    %c0_79 = arith.constant 0 : index
    %97 = vector.load %arg6[%c0_77, %c17_78, %c0_79] : memref<18x18x4xf32, #tpu.memory_space<vmem>>, vector<18x1x4xf32>
    tpu.vector_store %arg6[%c0_77, %c17_78, %c0_79], %96 {strides = array<i32>} : memref<18x18x4xf32, #tpu.memory_space<vmem>>, vector<18x1x4xf32>,
    %c0_80 = arith.constant 0 : index
    %c0_81 = arith.constant 0 : index
    %c0_82 = arith.constant 0 : index
    %98 = vector.load %arg6[%c0_80, %c0_81, %c0_82] : memref<18x18x4xf32, #tpu.memory_space<vmem>>, vector<18x18x4xf32>
    %99 = arith.truncf %98 : vector<18x18x4xf32> to vector<18x18x4xbf16>
    %100 = vector.extract_strided_slice %99 {offsets = [0, 0, 0], sizes = [16, 16, 4], strides = [1, 1, 1]} : vector<18x18x4xbf16> to vector<16x16x4xbf16>
    %101 = vector.shape_cast %100 : vector<16x16x4xbf16> to vector<256x4xbf16>
    %c0_83 = arith.constant 0 : index
    %c0_84 = arith.constant 0 : index
    %c0_85 = arith.constant 0 : index
    %102 = vector.load %arg3[%c0_83, %c0_84, %c0_85] : memref<9x4x4xbf16, #tpu.memory_space<vmem>>, vector<1x4x4xbf16>
    %103 = vector.shape_cast %102 : vector<1x4x4xbf16> to vector<4x4xbf16>
    %cst_86 = arith.constant dense<0.000000e+00> : vector<256x4xf32>
    %104 = tpu.matmul %101, %103, %cst_86 {dimension_numbers = #tpu.dot_dimension_numbers<[1], [0], [0], [1], [0, 0, 1, 1], [], []>} : vector<256x4xbf16>, vector<4x4xbf16>, vector<256x4xf32> -> vector<256x4xf32>
    %105 = vector.extract_strided_slice %99 {offsets = [0, 1, 0], sizes = [16, 16, 4], strides = [1, 1, 1]} : vector<18x18x4xbf16> to vector<16x16x4xbf16>
    %106 = vector.shape_cast %105 : vector<16x16x4xbf16> to vector<256x4xbf16>
    %c1_87 = arith.constant 1 : index
    %c0_88 = arith.constant 0 : index
    %c0_89 = arith.constant 0 : index
    %107 = vector.load %arg3[%c1_87, %c0_88, %c0_89] : memref<9x4x4xbf16, #tpu.memory_space<vmem>>, vector<1x4x4xbf16>
    %108 = vector.shape_cast %107 : vector<1x4x4xbf16> to vector<4x4xbf16>
    %cst_90 = arith.constant dense<0.000000e+00> : vector<256x4xf32>
    %109 = tpu.matmul %106, %108, %cst_90 {dimension_numbers = #tpu.dot_dimension_numbers<[1], [0], [0], [1], [0, 0, 1, 1], [], []>} : vector<256x4xbf16>, vector<4x4xbf16>, vector<256x4xf32> -> vector<256x4xf32>
    %110 = arith.addf %104, %109 : vector<256x4xf32>
    %111 = vector.extract_strided_slice %99 {offsets = [0, 2, 0], sizes = [16, 16, 4], strides = [1, 1, 1]} : vector<18x18x4xbf16> to vector<16x16x4xbf16>
    %112 = vector.shape_cast %111 : vector<16x16x4xbf16> to vector<256x4xbf16>
    %c2_91 = arith.constant 2 : index
    %c0_92 = arith.constant 0 : index
    %c0_93 = arith.constant 0 : index
    %113 = vector.load %arg3[%c2_91, %c0_92, %c0_93] : memref<9x4x4xbf16, #tpu.memory_space<vmem>>, vector<1x4x4xbf16>
    %114 = vector.shape_cast %113 : vector<1x4x4xbf16> to vector<4x4xbf16>
    %cst_94 = arith.constant dense<0.000000e+00> : vector<256x4xf32>
    %115 = tpu.matmul %112, %114, %cst_94 {dimension_numbers = #tpu.dot_dimension_numbers<[1], [0], [0], [1], [0, 0, 1, 1], [], []>} : vector<256x4xbf16>, vector<4x4xbf16>, vector<256x4xf32> -> vector<256x4xf32>
    %116 = arith.addf %110, %115 : vector<256x4xf32>
    %117 = vector.extract_strided_slice %99 {offsets = [1, 0, 0], sizes = [16, 16, 4], strides = [1, 1, 1]} : vector<18x18x4xbf16> to vector<16x16x4xbf16>
    %118 = vector.shape_cast %117 : vector<16x16x4xbf16> to vector<256x4xbf16>
    %c3_95 = arith.constant 3 : index
    %c0_96 = arith.constant 0 : index
    %c0_97 = arith.constant 0 : index
    %119 = vector.load %arg3[%c3_95, %c0_96, %c0_97] : memref<9x4x4xbf16, #tpu.memory_space<vmem>>, vector<1x4x4xbf16>
    %120 = vector.shape_cast %119 : vector<1x4x4xbf16> to vector<4x4xbf16>
    %cst_98 = arith.constant dense<0.000000e+00> : vector<256x4xf32>
    %121 = tpu.matmul %118, %120, %cst_98 {dimension_numbers = #tpu.dot_dimension_numbers<[1], [0], [0], [1], [0, 0, 1, 1], [], []>} : vector<256x4xbf16>, vector<4x4xbf16>, vector<256x4xf32> -> vector<256x4xf32>
    %122 = arith.addf %116, %121 : vector<256x4xf32>
    %123 = vector.extract_strided_slice %99 {offsets = [1, 1, 0], sizes = [16, 16, 4], strides = [1, 1, 1]} : vector<18x18x4xbf16> to vector<16x16x4xbf16>
    %124 = vector.shape_cast %123 : vector<16x16x4xbf16> to vector<256x4xbf16>
    %c4_99 = arith.constant 4 : index
    %c0_100 = arith.constant 0 : index
    %c0_101 = arith.constant 0 : index
    %125 = vector.load %arg3[%c4_99, %c0_100, %c0_101] : memref<9x4x4xbf16, #tpu.memory_space<vmem>>, vector<1x4x4xbf16>
    %126 = vector.shape_cast %125 : vector<1x4x4xbf16> to vector<4x4xbf16>
    %cst_102 = arith.constant dense<0.000000e+00> : vector<256x4xf32>
    %127 = tpu.matmul %124, %126, %cst_102 {dimension_numbers = #tpu.dot_dimension_numbers<[1], [0], [0], [1], [0, 0, 1, 1], [], []>} : vector<256x4xbf16>, vector<4x4xbf16>, vector<256x4xf32> -> vector<256x4xf32>
    %128 = arith.addf %122, %127 : vector<256x4xf32>
    %129 = vector.extract_strided_slice %99 {offsets = [1, 2, 0], sizes = [16, 16, 4], strides = [1, 1, 1]} : vector<18x18x4xbf16> to vector<16x16x4xbf16>
    %130 = vector.shape_cast %129 : vector<16x16x4xbf16> to vector<256x4xbf16>
    %c5_103 = arith.constant 5 : index
    %c0_104 = arith.constant 0 : index
    %c0_105 = arith.constant 0 : index
    %131 = vector.load %arg3[%c5_103, %c0_104, %c0_105] : memref<9x4x4xbf16, #tpu.memory_space<vmem>>, vector<1x4x4xbf16>
    %132 = vector.shape_cast %131 : vector<1x4x4xbf16> to vector<4x4xbf16>
    %cst_106 = arith.constant dense<0.000000e+00> : vector<256x4xf32>
    %133 = tpu.matmul %130, %132, %cst_106 {dimension_numbers = #tpu.dot_dimension_numbers<[1], [0], [0], [1], [0, 0, 1, 1], [], []>} : vector<256x4xbf16>, vector<4x4xbf16>, vector<256x4xf32> -> vector<256x4xf32>
    %134 = arith.addf %128, %133 : vector<256x4xf32>
    %135 = vector.extract_strided_slice %99 {offsets = [2, 0, 0], sizes = [16, 16, 4], strides = [1, 1, 1]} : vector<18x18x4xbf16> to vector<16x16x4xbf16>
    %136 = vector.shape_cast %135 : vector<16x16x4xbf16> to vector<256x4xbf16>
    %c6_107 = arith.constant 6 : index
    %c0_108 = arith.constant 0 : index
    %c0_109 = arith.constant 0 : index
    %137 = vector.load %arg3[%c6_107, %c0_108, %c0_109] : memref<9x4x4xbf16, #tpu.memory_space<vmem>>, vector<1x4x4xbf16>
    %138 = vector.shape_cast %137 : vector<1x4x4xbf16> to vector<4x4xbf16>
    %cst_110 = arith.constant dense<0.000000e+00> : vector<256x4xf32>
    %139 = tpu.matmul %136, %138, %cst_110 {dimension_numbers = #tpu.dot_dimension_numbers<[1], [0], [0], [1], [0, 0, 1, 1], [], []>} : vector<256x4xbf16>, vector<4x4xbf16>, vector<256x4xf32> -> vector<256x4xf32>
    %140 = arith.addf %134, %139 : vector<256x4xf32>
    %141 = vector.extract_strided_slice %99 {offsets = [2, 1, 0], sizes = [16, 16, 4], strides = [1, 1, 1]} : vector<18x18x4xbf16> to vector<16x16x4xbf16>
    %142 = vector.shape_cast %141 : vector<16x16x4xbf16> to vector<256x4xbf16>
    %c7_111 = arith.constant 7 : index
    %c0_112 = arith.constant 0 : index
    %c0_113 = arith.constant 0 : index
    %143 = vector.load %arg3[%c7_111, %c0_112, %c0_113] : memref<9x4x4xbf16, #tpu.memory_space<vmem>>, vector<1x4x4xbf16>
    %144 = vector.shape_cast %143 : vector<1x4x4xbf16> to vector<4x4xbf16>
    %cst_114 = arith.constant dense<0.000000e+00> : vector<256x4xf32>
    %145 = tpu.matmul %142, %144, %cst_114 {dimension_numbers = #tpu.dot_dimension_numbers<[1], [0], [0], [1], [0, 0, 1, 1], [], []>} : vector<256x4xbf16>, vector<4x4xbf16>, vector<256x4xf32> -> vector<256x4xf32>
    %146 = arith.addf %140, %145 : vector<256x4xf32>
    %147 = vector.extract_strided_slice %99 {offsets = [2, 2, 0], sizes = [16, 16, 4], strides = [1, 1, 1]} : vector<18x18x4xbf16> to vector<16x16x4xbf16>
    %148 = vector.shape_cast %147 : vector<16x16x4xbf16> to vector<256x4xbf16>
    %c8_115 = arith.constant 8 : index
    %c0_116 = arith.constant 0 : index
    %c0_117 = arith.constant 0 : index
    %149 = vector.load %arg3[%c8_115, %c0_116, %c0_117] : memref<9x4x4xbf16, #tpu.memory_space<vmem>>, vector<1x4x4xbf16>
    %150 = vector.shape_cast %149 : vector<1x4x4xbf16> to vector<4x4xbf16>
    %cst_118 = arith.constant dense<0.000000e+00> : vector<256x4xf32>
    %151 = tpu.matmul %148, %150, %cst_118 {dimension_numbers = #tpu.dot_dimension_numbers<[1], [0], [0], [1], [0, 0, 1, 1], [], []>} : vector<256x4xbf16>, vector<4x4xbf16>, vector<256x4xf32> -> vector<256x4xf32>
    %152 = arith.addf %146, %151 : vector<256x4xf32>
    %cst_119 = arith.constant dense<0.000000e+00> : vector<4xf32>
    %153 = vector.multi_reduction <add>, %152, %cst_119 [0] : vector<256x4xf32> to vector<4xf32>
    %154 = vector.shape_cast %153 : vector<4xf32> to vector<1x4xf32>
    %cst_120 = arith.constant 2.560000e+02 : f32
    %155 = vector.broadcast %cst_120 : f32 to vector<1x4xf32>
    %156 = arith.divf %154, %155 : vector<1x4xf32>
    %157 = arith.mulf %152, %152 : vector<256x4xf32>
    %cst_121 = arith.constant dense<0.000000e+00> : vector<4xf32>
    %158 = vector.multi_reduction <add>, %157, %cst_121 [0] : vector<256x4xf32> to vector<4xf32>
    %159 = vector.shape_cast %158 : vector<4xf32> to vector<1x4xf32>
    %cst_122 = arith.constant 2.560000e+02 : f32
    %160 = vector.broadcast %cst_122 : f32 to vector<1x4xf32>
    %161 = arith.divf %159, %160 : vector<1x4xf32>
    %162 = arith.mulf %156, %156 : vector<1x4xf32>
    %163 = arith.subf %161, %162 : vector<1x4xf32>
    %cst_123 = arith.constant 0.000000e+00 : f32
    %164 = vector.broadcast %cst_123 : f32 to vector<1x4xf32>
    %165 = arith.maximumf %163, %164 : vector<1x4xf32>
    %166 = vector.broadcast %156 : vector<1x4xf32> to vector<256x4xf32>
    %167 = arith.subf %152, %166 : vector<256x4xf32>
    %cst_124 = arith.constant 9.99999974E-6 : f32
    %168 = vector.broadcast %cst_124 : f32 to vector<1x4xf32>
    %169 = arith.addf %165, %168 : vector<1x4xf32>
    %170 = math.rsqrt %169 : vector<1x4xf32>
    %171 = vector.broadcast %170 : vector<1x4xf32> to vector<256x4xf32>
    %172 = arith.mulf %167, %171 : vector<256x4xf32>
    %173 = vector.shape_cast %172 : vector<256x4xf32> to vector<16x16x4xf32>
    %174 = arith.addf %1, %173 : vector<16x16x4xf32>
    %c0_125 = arith.constant 0 : index
    %c0_126 = arith.constant 0 : index
    %c0_127 = arith.constant 0 : index
    %c0_128 = arith.constant 0 : index
    %175 = vector.load %arg4[%c0_125, %c0_126, %c0_127, %c0_128] : memref<1x16x16x4xf32, #tpu.memory_space<vmem>>, vector<1x16x16x4xf32>
    %176 = vector.shape_cast %175 : vector<1x16x16x4xf32> to vector<16x16x4xf32>
    %177 = vector.shape_cast %174 : vector<16x16x4xf32> to vector<1x16x16x4xf32>
    tpu.vector_store %arg4[%c0_125, %c0_126, %c0_127, %c0_128], %177 {strides = array<i32>} : memref<1x16x16x4xf32, #tpu.memory_space<vmem>>, vector<1x16x16x4xf32>,
    return
  }
  func.func @transform_0(%arg0: i32) -> (i32, i32, i32, i32) {
    %c0_i32 = arith.constant 0 : i32
    %c0_i32_0 = arith.constant 0 : i32
    %c0_i32_1 = arith.constant 0 : i32
    %c0_i32_2 = arith.constant 0 : i32
    return %arg0, %c0_i32, %c0_i32_0, %c0_i32_1 : i32, i32, i32, i32
  }
  func.func @transform_1(%arg0: i32) -> (i32, i32, i32) {
    %c0_i32 = arith.constant 0 : i32
    %c0_i32_0 = arith.constant 0 : i32
    %c0_i32_1 = arith.constant 0 : i32
    %c0_i32_2 = arith.constant 0 : i32
    return %c0_i32, %c0_i32_0, %c0_i32_1 : i32, i32, i32
  }
  func.func @transform_2(%arg0: i32) -> (i32, i32, i32) {
    %c0_i32 = arith.constant 0 : i32
    %c0_i32_0 = arith.constant 0 : i32
    %c0_i32_1 = arith.constant 0 : i32
    %c0_i32_2 = arith.constant 0 : i32
    return %c0_i32, %c0_i32_0, %c0_i32_1 : i32, i32, i32
  }
  func.func @transform_3(%arg0: i32) -> (i32, i32, i32, i32) {
    %c0_i32 = arith.constant 0 : i32
    %c0_i32_0 = arith.constant 0 : i32
    %c0_i32_1 = arith.constant 0 : i32
    %c0_i32_2 = arith.constant 0 : i32
    return %arg0, %c0_i32, %c0_i32_0, %c0_i32_1 : i32, i32, i32, i32
  }
}

</mosaic_0001>

<bundles_post_ra>
// kernel: tpu_custom_call.1
= control target key start
LH: loop header
LB: loop body
LE: loop exit
PB: predicated region body
PF: predicated region fallthrough
CT: control target
= control target key end

     0   :  { %s6870_s12 = smov 0   ;;  %s10207_s0 = inlined_call_operand.vmem [shape: f32[2,16,16,4], index: 0, kind: input, shape index: {}]   ;;  %s10208_s1 = inlined_call_operand.vmem [shape: bf16[9,4,4], index: 1, kind: input, shape index: {}]   ;;  %s10209_s2 = inlined_call_operand.vmem [shape: bf16[9,4,4], index: 2, kind: input, shape index: {}]   ;;  %s10210_s3 = inlined_call_operand.vmem [shape: f32[2,16,16,4], index: 3, kind: output, shape index: {}]  }
   0x1 LB: > { %s5577_s13 = sadd.s32 4294967295, %s6848_s12   ;;  %p5581_p0 = scmp.ge.s32.totalorder %s6848_s12, 1  ;;  %s6848_s12 = sphi %s6870_s12, %s13_s12  }
   0x2   : > { %p137_p1 = scmp.lt.s32.totalorder %s6848_s12, 3 }
   0x4   : > { %p138_p2 = pnand %p5581_p0, %p137_p1 }
   0x6   : > { %141 = sbr.rel (%p138_p2) target bundleno = 1261 (0x4ed), region = 32 }
   0xb   : > { %v5586_v0 = vld [vmem:[%s10208_s1 + $0x2] sm:$0x3]  ;;  %vm650_vm0 = vcmask 1041408   ;;  %v406_v1 = vld [vmem:[%s10208_s1] sm:$0x3]  ;;  %p161_p3 = scmp.lt.s32.totalorder %s5577_s13, 1 }
   0xc   : > { %6812 = vmatprep.subr.msk.bf16.mxu0 %vm650_vm0, %v5586_v0  ;;  %v652_v2 = vsel %vm650_vm0, %v5586_v0, 0  ;;  %6813 = vmatprep.subr.msk.bf16.mxu1 %vm650_vm0, %v406_v1  ;;  %v848_v3 = vsel %vm650_vm0, %v406_v1, 0  ;;  %v6891_v4 = vld [vmem:[%s10208_s1 + $0x4] sm:$0x3]  ;;  %v6898_v5 = vld [vmem:[%s10208_s1 + $0x6] sm:$0x3] }
   0xd   : > { %6201 = vmatpush3.bf16.msra.mxu0 %v652_v2  ;;  %6235 = vmatpush3.bf16.msra.mxu1 %v848_v3  ;;  %s10456_s13 = smov (!%p161_p3, %s5577_s13), 1  ;;  %vm205_vm1 = vcmask 31744   ;;  %vm261_vm2 = vcmask 24576   ;;  %vm407_vm3 = vsmask.f32 7424  ;;  %v7063_v59 = vsel %vm650_vm0, %v6891_v4, 0 }
   0xe   : > { %6814 = vmatprep.subr.msk.bf16.mxu0 %vm650_vm0, %v6891_v4  ;;  %6815 = vmatprep.subr.msk.bf16.mxu1 %vm650_vm0, %v6898_v5  ;;  %s5892_s22 = sshll.u32 %s10456_s13, 8  ;;  %v1344_v62 = vsel %vm650_vm0, %v6898_v5, 0  ;;  %vm1043_vm4 = vcmask 1046528  }
   0xf   : > { %s6910_s25 = scalar_lea.vmem %s10207_s0, %s5892_s22  ;;  %s10106_s5 = scalar_lea.vmem %s10210_s3, %s5892_s22 }
  0x10   : > { %v6913_v6 = vld [vmem:[%s6910_s25 + $0x10] sm:$0xff]  ;;  %v6916_v7 = vld [vmem:[%s6910_s25 + $0x18] sm:$0xff]  ;;  %v6919_v8 = vld [vmem:[%s6910_s25] sm:$0xff] }
  0x11   : > { %10243 = vst [vmem:[#allocation4_spill] sm:$0xff] %v6913_v6  ;;  %10244 = vst [vmem:[#allocation5_spill] sm:$0xff] %v6916_v7  ;;  %v6930_v9 = vld [vmem:[%s6910_s25 + $0x8] sm:$0xff]  ;;  %v6935_v10 = vld [vmem:[%s6910_s25 + $0x20] sm:$0xff] }
  0x12   : > { %10245 = vst [vmem:[#allocation6_spill] sm:$0xff] %v6919_v8  ;;  %208 = vst.msk [vmem:[#allocation2 + $0x31] sm:$0xff] %vm205_vm1, %v6913_v6  ;;  %v6938_v11 = vld [vmem:[%s6910_s25 + $0x28] sm:$0xff]  ;;  %v6947_v12 = vld [vmem:[%s6910_s25 + $0x30] sm:$0xff] }
  0x13   : > { %238 = vst.msk [vmem:[#allocation2 + $0x1] sm:$0xff] %vm205_vm1, %v6913_v6  ;;  %239 = vst.msk [vmem:[#allocation2 + $0x9] sm:$0xff] %vm205_vm1, %v6916_v7  ;;  %v6950_v13 = vld [vmem:[%s6910_s25 + $0x38] sm:$0xff]  ;;  %v6953_v14 = vld [vmem:[%s6910_s25 + $0x40] sm:$0xff] }
  0x14   : > { %209 = vst.msk [vmem:[#allocation2 + $0x39] sm:$0xff] %vm205_vm1, %v6916_v7  ;;  %10246 = vst [vmem:[#allocation7_spill] sm:$0xff] %v6930_v9  ;;  %v6960_v15 = vld [vmem:[%s6910_s25 + $0x48] sm:$0xff]  ;;  %v6965_v16 = vld [vmem:[%s6910_s25 + $0x50] sm:$0xff] }
  0x15   : > { %206 = vst.msk [vmem:[#allocation2 + $0x19] sm:$0xff] %vm205_vm1, %v6919_v8  ;;  %10247 = vst [vmem:[#allocation8_spill] sm:$0xff] %v6935_v10  ;;  %v6968_v17 = vld [vmem:[%s6910_s25 + $0x58] sm:$0xff]  ;;  %v6977_v18 = vld [vmem:[%s6910_s25 + $0x60] sm:$0xff] }
  0x16   : > { %10248 = vst [vmem:[#allocation9_spill] sm:$0xff] %v6938_v11  ;;  %207 = vst.msk [vmem:[#allocation2 + $0x21] sm:$0xff] %vm205_vm1, %v6930_v9  ;;  %v6980_v19 = vld [vmem:[%s6910_s25 + $0x68] sm:$0xff]  ;;  %v6983_v20 = vld [vmem:[%s6910_s25 + $0x70] sm:$0xff] }
  0x17   : > { %210 = vst.msk [vmem:[#allocation2 + $0x49] sm:$0xff] %vm205_vm1, %v6935_v10  ;;  %211 = vst.msk [vmem:[#allocation2 + $0x51] sm:$0xff] %vm205_vm1, %v6938_v11  ;;  %v6990_v21 = vld [vmem:[%s6910_s25 + $0x78] sm:$0xff]  ;;  %v6995_v22 = vld [vmem:[%s6910_s25 + $0x80] sm:$0xff] }
  0x18   : > { %10249 = vst [vmem:[#allocation10_spill] sm:$0xff] %v6947_v12  ;;  %10250 = vst [vmem:[#allocation11_spill] sm:$0xff] %v6950_v13  ;;  %v6998_v23 = vld [vmem:[%s6910_s25 + $0x88] sm:$0xff]  ;;  %v7007_v24 = vld [vmem:[%s6910_s25 + $0x90] sm:$0xff] }
  0x19   : > { %10251 = vst [vmem:[#allocation12_spill] sm:$0xff] %v6953_v14  ;;  %212 = vst.msk [vmem:[#allocation2 + $0x61] sm:$0xff] %vm205_vm1, %v6947_v12  ;;  %v7010_v25 = vld [vmem:[%s6910_s25 + $0x98] sm:$0xff]  ;;  %v7013_v26 = vld [vmem:[%s6910_s25 + $0xa0] sm:$0xff] }
  0x1a   : > { %213 = vst.msk [vmem:[#allocation2 + $0x69] sm:$0xff] %vm205_vm1, %v6950_v13  ;;  %10252 = vst [vmem:[#allocation13_spill] sm:$0xff] %v6960_v15  ;;  %v7020_v27 = vld [vmem:[%s6910_s25 + $0xa8] sm:$0xff]  ;;  %v7025_v28 = vld [vmem:[%s6910_s25 + $0xb0] sm:$0xff] }
  0x1b   : > { %214 = vst.msk [vmem:[#allocation2 + $0x79] sm:$0xff] %vm205_vm1, %v6953_v14  ;;  %10253 = vst [vmem:[#allocation14_spill] sm:$0xff] %v6965_v16  ;;  %v7028_v29 = vld [vmem:[%s6910_s25 + $0xb8] sm:$0xff]  ;;  %v243_v30 = vld [vmem:[#allocation2 + $0x2] sm:$0x1] }
  0x1c   : > { %10254 = vst [vmem:[#allocation15_spill] sm:$0xff] %v6968_v17  ;;  %215 = vst.msk [vmem:[#allocation2 + $0x81] sm:$0xff] %vm205_vm1, %v6960_v15  ;;  %v280_v31 = vld [vmem:[#allocation2 + $0xf] sm:$0x1]  ;;  %v244_v32 = vld [vmem:[#allocation2 + $0x1a] sm:$0x1] }
  0x1d   : > { %216 = vst.msk [vmem:[#allocation2 + $0x91] sm:$0xff] %vm205_vm1, %v6965_v16  ;;  %217 = vst.msk [vmem:[#allocation2 + $0x99] sm:$0xff] %vm205_vm1, %v6968_v17  ;;  %v281_v33 = vld [vmem:[#allocation2 + $0x27] sm:$0x1]  ;;  %v245_v34 = vld [vmem:[#allocation2 + $0x32] sm:$0x1] }
  0x1e   : > { %10255 = vst [vmem:[#allocation16_spill] sm:$0xff] %v6977_v18  ;;  %10256 = vst [vmem:[#allocation17_spill] sm:$0xff] %v6980_v19  ;;  %v282_v35 = vld [vmem:[#allocation2 + $0x3f] sm:$0x1]  ;;  %v246_v36 = vld [vmem:[#allocation2 + $0x4a] sm:$0x1] }
  0x1f   : > { %10257 = vst [vmem:[#allocation18_spill] sm:$0xff] %v6983_v20  ;;  %218 = vst.msk [vmem:[#allocation2 + $0xa9] sm:$0xff] %vm205_vm1, %v6977_v18  ;;  %v283_v37 = vld [vmem:[#allocation2 + $0x57] sm:$0x1]  ;;  %v317_v40 = vld [vmem:[#allocation2 + $0x8] sm:$0xff] }
  0x20   : > { %219 = vst.msk [vmem:[#allocation2 + $0xb1] sm:$0xff] %vm205_vm1, %v6980_v19  ;;  %10258 = vst [vmem:[#allocation19_spill] sm:$0xff] %v6990_v21  ;;  %v247_v38 = vld [vmem:[#allocation2 + $0x62] sm:$0x1]  ;;  %v323_v46 = vld [vmem:[#allocation2 + $0x38] sm:$0xff] }
  0x21   : > { %220 = vst.msk [vmem:[#allocation2 + $0xc1] sm:$0xff] %vm205_vm1, %v6983_v20  ;;  %10259 = vst [vmem:[#allocation20_spill] sm:$0xff] %v6995_v22  ;;  %v284_v39 = vld [vmem:[#allocation2 + $0x6f] sm:$0x1]  ;;  %v320_v43 = vld [vmem:[#allocation2 + $0x20] sm:$0xff] }
  0x22   : > { %10260 = vst [vmem:[#allocation21_spill] sm:$0xff] %v6998_v23  ;;  %221 = vst.msk [vmem:[#allocation2 + $0xc9] sm:$0xff] %vm205_vm1, %v6990_v21  ;;  %v248_v41 = vld [vmem:[#allocation2 + $0x7a] sm:$0x1]  ;;  %v326_v4 = vld [vmem:[#allocation2 + $0x50] sm:$0xff] }
  0x23   : > { %222 = vst.msk [vmem:[#allocation2 + $0xd9] sm:$0xff] %vm205_vm1, %v6995_v22  ;;  %223 = vst.msk [vmem:[#allocation2 + $0xe1] sm:$0xff] %vm205_vm1, %v6998_v23  ;;  %v285_v42 = vld [vmem:[#allocation2 + $0x87] sm:$0x1] }
  0x24   : > { %10261 = vst [vmem:[#allocation22_spill] sm:$0xff] %v7007_v24  ;;  %10262 = vst [vmem:[#allocation23_spill] sm:$0xff] %v7010_v25  ;;  %v249_v44 = vld [vmem:[#allocation2 + $0x92] sm:$0x1]  ;;  %v286_v45 = vld [vmem:[#allocation2 + $0x9f] sm:$0x1] }
  0x25   : > { %10263 = vst [vmem:[#allocation24_spill] sm:$0xff] %v7013_v26  ;;  %224 = vst.msk [vmem:[#allocation2 + $0xf1] sm:$0xff] %vm205_vm1, %v7007_v24 }
  0x26   : > { %225 = vst.msk [vmem:[#allocation2 + $0xf9] sm:$0xff] %vm205_vm1, %v7010_v25  ;;  %10264 = vst [vmem:[#allocation25_spill] sm:$0xff] %v7020_v27  ;;  %v250_v47 = vld [vmem:[#allocation2 + $0xaa] sm:$0x1] }
  0x27   : > { %226 = vst.msk [vmem:[#allocation2 + $0x109] sm:$0xff] %vm205_vm1, %v7013_v26  ;;  %10265 = vst [vmem:[#allocation26_spill] sm:$0xff] %v7025_v28  ;;  %v287_v48 = vld [vmem:[#allocation2 + $0xb7] sm:$0x1] }
  0x28   : > { %10266 = vst [vmem:[#allocation27_spill] sm:$0xff] %v7028_v29  ;;  %227 = vst.msk [vmem:[#allocation2 + $0x111] sm:$0xff] %vm205_vm1, %v7020_v27  ;;  %v251_v51 = vld [vmem:[#allocation2 + $0xc2] sm:$0x1] }
  0x29   : > { %228 = vst.msk [vmem:[#allocation2 + $0x121] sm:$0xff] %vm205_vm1, %v7025_v28  ;;  %229 = vst.msk [vmem:[#allocation2 + $0x129] sm:$0xff] %vm205_vm1, %v7028_v29  ;;  %v288_v56 = vld [vmem:[#allocation2 + $0xcf] sm:$0x1] }
  0x2a   : > { %262 = vst.msk [vmem:[#allocation2] sm:$0x1] %vm261_vm2, %v243_v30  ;;  %298 = vst.msk [vmem:[#allocation2 + $0x11] sm:$0x1] %vm261_vm2, %v280_v31  ;;  %v329_v30 = vld [vmem:[#allocation2 + $0x68] sm:$0xff] }
  0x2b   : > { %263 = vst.msk [vmem:[#allocation2 + $0x18] sm:$0x1] %vm261_vm2, %v244_v32  ;;  %299 = vst.msk [vmem:[#allocation2 + $0x29] sm:$0x1] %vm261_vm2, %v281_v33 }
  0x2c   : > { %264 = vst.msk [vmem:[#allocation2 + $0x30] sm:$0x1] %vm261_vm2, %v245_v34  ;;  %300 = vst.msk [vmem:[#allocation2 + $0x41] sm:$0x1] %vm261_vm2, %v282_v35 }
  0x2d   : > { %265 = vst.msk [vmem:[#allocation2 + $0x48] sm:$0x1] %vm261_vm2, %v246_v36  ;;  %301 = vst.msk [vmem:[#allocation2 + $0x59] sm:$0x1] %vm261_vm2, %v283_v37 }
  0x2e   : > { %266 = vst.msk [vmem:[#allocation2 + $0x60] sm:$0x1] %vm261_vm2, %v247_v38  ;;  %302 = vst.msk [vmem:[#allocation2 + $0x71] sm:$0x1] %vm261_vm2, %v284_v39 }
  0x2f   : > { %267 = vst.msk [vmem:[#allocation2 + $0x78] sm:$0x1] %vm261_vm2, %v248_v41  ;;  %303 = vst.msk [vmem:[#allocation2 + $0x89] sm:$0x1] %vm261_vm2, %v285_v42 }
  0x30   : > { %268 = vst.msk [vmem:[#allocation2 + $0x90] sm:$0x1] %vm261_vm2, %v249_v44  ;;  %304 = vst.msk [vmem:[#allocation2 + $0xa1] sm:$0x1] %vm261_vm2, %v286_v45 }
  0x31   : > { %v316_v49 = vld [vmem:[#allocation2] sm:$0xff]  ;;  %v318_v50 = vld [vmem:[#allocation2 + $0x10] sm:$0x3]  ;;  %269 = vst.msk [vmem:[#allocation2 + $0xa8] sm:$0x1] %vm261_vm2, %v250_v47 }
  0x32   : > { %305 = vst.msk [vmem:[#allocation2 + $0xb9] sm:$0x1] %vm261_vm2, %v287_v48  ;;  %v7052_v52 = vpack.c.bf16 %v317_v40, %v316_v49  ;;  %v7054_v53 = vpack.c.bf16 %v318_v50, %v318_v50  ;;  %v319_v54 = vld [vmem:[#allocation2 + $0x18] sm:$0xff]  ;;  %v321_v55 = vld [vmem:[#allocation2 + $0x28] sm:$0x3]  ;;  %v332_v48 = vld [vmem:[#allocation2 + $0x80] sm:$0xff] }
  0x33   : > { %270 = vst.msk [vmem:[#allocation2 + $0xc0] sm:$0x1] %vm261_vm2, %v251_v51  ;;  %v7057_v57 = vpack.c.bf16 %v320_v43, %v319_v54  ;;  %v7059_v58 = vpack.c.bf16 %v321_v55, %v321_v55  ;;  %v322_v60 = vld [vmem:[#allocation2 + $0x30] sm:$0xff]  ;;  %v324_v61 = vld [vmem:[#allocation2 + $0x40] sm:$0x3] }
  0x34   : > { %306 = vst.msk [vmem:[#allocation2 + $0xd1] sm:$0x1] %vm261_vm2, %v288_v56  ;;  %v409_v63 = vshrl.u32 %v7052_v52, 16  ;;  %v411_v0 = vshll.u32 %v7052_v52, 16  ;;  %v416_v1 = vshll.u32 %v7054_v53, 16  ;;  %6236 = vmatprep.mubr.msk.bf16.mxu1 %vm205_vm1, %v7052_v52  ;;  %v7073_v2 = vpack.c.bf16 %v323_v46, %v322_v60  ;;  %v325_v3 = vld [vmem:[#allocation2 + $0x48] sm:$0xff] }
  0x35   : > { %v421_v31 = vshrl.u32 %v7057_v57, 16  ;;  %v423_v32 = vshll.u32 %v7057_v57, 16  ;;  %v428_v5 = vshll.u32 %v7059_v58, 16  ;;  %6237 = vmatmul.mubr.msk.bf16.vlgmr.msra.gmra.mxu1 %vm205_vm1, %v7057_v57  ;;  %v327_v33 = vld [vmem:[#allocation2 + $0x58] sm:$0x3]  ;;  %v328_v34 = vld [vmem:[#allocation2 + $0x60] sm:$0xff]  ;;  %v7080_v37 = vpack.c.bf16 %v324_v61, %v324_v61 }
  0x36   : > { %v413_v35 = vrot.slane %v411_v0, 1  ;;  %v418_v36 = vrot.slane %v416_v1, 1  ;;  %v433_v38 = vshrl.u32 %v7073_v2, 16  ;;  %6240 = vmatprep.mubr.msk.bf16.mxu1 %vm205_vm1, %v7073_v2  ;;  %6303 = vmatpush3.bf16.msra.mxu1 %v1344_v62  ;;  %v435_v41 = vshll.u32 %v7073_v2, 16  ;;  %v330_v43 = vld [vmem:[#allocation2 + $0x70] sm:$0x3] }
  0x37   : > { %v425_v39 = vrot.slane %v423_v32, 1  ;;  %v430_v40 = vrot.slane %v428_v5, 1  ;;  %v7086_v42 = vpack.c.bf16 %v326_v4, %v325_v3  ;;  %v440_v45 = vshll.u32 %v7080_v37, 16  ;;  %v333_v49 = vld [vmem:[#allocation2 + $0x88] sm:$0x3]  ;;  %v331_v56 = vld [vmem:[#allocation2 + $0x78] sm:$0xff] }
  0x38   : > { %v414_v44 = vor.u32 %v413_v35, %v409_v63  ;;  %v7089_v46 = vpack.c.bf16 %v327_v33, %v327_v33  ;;  %v7091_v47 = vpack.c.bf16 %v329_v30, %v328_v34  ;;  %v437_v51 = vrot.slane %v435_v41, 1  ;;  %v252_v60 = vld [vmem:[#allocation2 + $0xda] sm:$0x1]  ;;  %v336_v3 = vld [vmem:[#allocation2 + $0xa0] sm:$0x3]  ;;  %v338_v33 = vld [vmem:[#allocation2 + $0xb0] sm:$0xff] }
  0x39   : > { %v426_v50 = vor.u32 %v425_v39, %v421_v31  ;;  %v445_v54 = vshrl.u32 %v7086_v42, 16  ;;  %v447_v55 = vshll.u32 %v7086_v42, 16  ;;  %v442_v62 = vrot.slane %v440_v45, 1  ;;  %v335_v1 = vld [vmem:[#allocation2 + $0x98] sm:$0xff]  ;;  %271 = vst.msk [vmem:[#allocation2 + $0xd8] sm:$0x1] %vm261_vm2, %v252_v60 }
  0x3a   : > { %v419_v61 = vsel %vm407_vm3, %v414_v44, %v418_v36  ;;  %v452_v63 = vshll.u32 %v7089_v46, 16  ;;  %v7097_v0 = vpack.c.bf16 %v330_v43, %v330_v43  ;;  %v289_v4 = vld [vmem:[#allocation2 + $0xe7] sm:$0x1]  ;;  %v7103_v30 = vld [vmem:[%s10208_s1 + $0x8] sm:$0x3]  ;;  %v438_v32 = vor.u32 %v437_v51, %v433_v38 }
  0x3b   : > { %6202 = vmatprep.mubr.msk.bf16.mxu0 %vm205_vm1, %v419_v61  ;;  %v7107_v31 = vsel %vm407_vm3, %v426_v50, %v430_v40  ;;  %v449_v5 = vrot.slane %v447_v55, 1  ;;  %307 = vst.msk [vmem:[#allocation2 + $0xe9] sm:$0x1] %vm261_vm2, %v289_v4  ;;  %v253_v34 = vld [vmem:[#allocation2 + $0xf2] sm:$0x1]  ;;  %v457_v36 = vshrl.u32 %v7091_v47, 16  ;;  %v7115_v43 = vpack.c.bf16 %v332_v48, %v331_v56 }
  0x3c   : > { %v290_v35 = vld [vmem:[#allocation2 + $0xff] sm:$0x1]  ;;  %6203 = vmatmul.mubr.msk.bf16.vlgmr.msra.gmra.mxu0 %vm205_vm1, %v7107_v31  ;;  %v459_v39 = vshll.u32 %v7091_v47, 16  ;;  %v464_v41 = vshll.u32 %v7097_v0, 16  ;;  %v334_v40 = vld [vmem:[#allocation2 + $0x90] sm:$0xff]  ;;  %v7121_v44 = vsel %vm407_vm3, %v438_v32, %v442_v62  ;;  %v454_v50 = vrot.slane %v452_v63, 1 }
  0x3d   : > { %272 = vst.msk [vmem:[#allocation2 + $0xf0] sm:$0x1] %vm261_vm2, %v253_v34  ;;  %308 = vst.msk [vmem:[#allocation2 + $0x101] sm:$0x1] %vm261_vm2, %v290_v35  ;;  %v254_v38 = vld [vmem:[#allocation2 + $0x10a] sm:$0x1]  ;;  %6269 = vmatpush3.bf16.msra.mxu0 %v7063_v59  ;;  %v450_v45 = vor.u32 %v449_v5, %v445_v54  ;;  %6241 = vmatmul.mubr.msk.bf16.gmra.mxu1 %vm205_vm1, %v7086_v42  ;;  %v7125_v51 = vpack.c.bf16 %v333_v49, %v333_v49 }
  0x3e   : > { %v337_v48 = vld [vmem:[#allocation2 + $0xa8] sm:$0xff]  ;;  %273 = vst.msk [vmem:[#allocation2 + $0x108] sm:$0x1] %vm261_vm2, %v254_v38  ;;  %v291_v55 = vld [vmem:[#allocation2 + $0x117] sm:$0x1]  ;;  %6206 = vmatprep.mubr.msk.bf16.mxu0 %vm205_vm1, %v7121_v44  ;;  %v461_v59 = vrot.slane %v459_v39, 1  ;;  %6244 = vmatprep.mubr.msk.bf16.mxu1 %vm205_vm1, %v7091_v47  ;;  %v7135_v62 = vpack.c.bf16 %v335_v1, %v334_v40  ;;  %v7137_v63 = vpack.c.bf16 %v336_v3, %v336_v3 }
  0x3f   : > { %v255_v56 = vld [vmem:[#allocation2 + $0x122] sm:$0x1]  ;;  %v466_v60 = vrot.slane %v464_v41, 1  ;;  %v471_v54 = vshll.u32 %v7115_v43, 16  ;;  %v341_v61 = vld [vmem:[#allocation2 + $0xc8] sm:$0xff]  ;;  %6816 = vmatprep.subr.msk.bf16.mxu0 %vm650_vm0, %v7103_v30  ;;  %v469_v35 = vshrl.u32 %v7115_v43, 16  ;;  %v7149_v39 = vpack.c.bf16 %v338_v33, %v337_v48 }
  0x40   : > { %309 = vst.msk [vmem:[#allocation2 + $0x119] sm:$0x1] %vm261_vm2, %v291_v55  ;;  %274 = vst.msk [vmem:[#allocation2 + $0x120] sm:$0x1] %vm261_vm2, %v255_v56  ;;  %v292_v49 = vld [vmem:[#allocation2 + $0x12f] sm:$0x1]  ;;  %v462_v34 = vor.u32 %v461_v59, %v457_v36  ;;  %v7165_v40 = vsel %vm407_vm3, %v450_v45, %v454_v50 }
  0x41   : > { %v340_v4 = vld [vmem:[#allocation2 + $0xc0] sm:$0xff]  ;;  %310 = vst.msk [vmem:[#allocation2 + $0x131] sm:$0x1] %vm261_vm2, %v292_v49  ;;  %v7144_v5 = vld [vmem:[%s6910_s25 + $0xc8] sm:$0xff]  ;;  %v7156_v1 = vld [vmem:[%s6910_s25 + $0xd0] sm:$0xff]  ;;  %v473_v36 = vrot.slane %v471_v54, 1 }
  0x42   : > { %v7141_v32 = vld [vmem:[%s6910_s25 + $0xc0] sm:$0xff]  ;;  %10268 = vst [vmem:[#allocation29_spill] sm:$0xff] %v7144_v5  ;;  %231 = vst.msk [vmem:[#allocation2 + $0x141] sm:$0xff] %vm205_vm1, %v7144_v5  ;;  %v7159_v3 = vld [vmem:[%s6910_s25 + $0xd8] sm:$0xff]  ;;  %v476_v33 = vshll.u32 %v7125_v51, 16  ;;  %v483_v38 = vshll.u32 %v7135_v62, 16  ;;  %v7181_v45 = vsel %vm407_vm3, %v462_v34, %v466_v60 }
  0x43   : > { %10267 = vst [vmem:[#allocation28_spill] sm:$0xff] %v7141_v32  ;;  %230 = vst.msk [vmem:[#allocation2 + $0x139] sm:$0xff] %vm205_vm1, %v7141_v32  ;;  %v7162_v41 = vld [vmem:[%s6910_s25 + $0xe0] sm:$0xff]  ;;  %v339_v48 = vld [vmem:[#allocation2 + $0xb8] sm:$0x3]  ;;  %v481_v50 = vshrl.u32 %v7135_v62, 16 }
  0x44   : > { %10269 = vst [vmem:[#allocation30_spill] sm:$0xff] %v7156_v1  ;;  %10270 = vst [vmem:[#allocation31_spill] sm:$0xff] %v7159_v3  ;;  %v7174_v55 = vld [vmem:[%s6910_s25 + $0xe8] sm:$0xff]  ;;  %v488_v56 = vshll.u32 %v7137_v63, 16  ;;  %v7190_v59 = vld [vmem:[%s6910_s25 + $0xf0] sm:$0xff]  ;;  %v485_v49 = vrot.slane %v483_v38, 1  ;;  %6207 = vmatmul.mubr.msk.bf16.gmra.mxu0 %vm205_vm1, %v7165_v40  ;;  %v7203_v60 = vpack.c.bf16 %v339_v48, %v339_v48 }
  0x45   : > { %10271 = vst [vmem:[#allocation32_spill] sm:$0xff] %v7162_v41  ;;  %232 = vst.msk [vmem:[#allocation2 + $0x151] sm:$0xff] %vm205_vm1, %v7156_v1  ;;  %v7193_v54 = vld [vmem:[%s6910_s25 + $0xf8] sm:$0xff]  ;;  %v495_v34 = vshll.u32 %v7149_v39, 16  ;;  %v7209_v38 = vld [vmem:[%s10208_s1 + $0xa] sm:$0x3]  ;;  %6210 = vmatprep.mubr.msk.bf16.mxu0 %vm205_vm1, %v7181_v45  ;;  %6245 = vmatmul.mubr.msk.bf16.gmra.mxu1 %vm205_vm1, %v7115_v43 }
  0x46   : > { %233 = vst.msk [vmem:[#allocation2 + $0x159] sm:$0xff] %vm205_vm1, %v7159_v3  ;;  %10272 = vst [vmem:[#allocation33_spill] sm:$0xff] %v7174_v55  ;;  %v342_v3 = vld [vmem:[#allocation2 + $0xd0] sm:$0x3]  ;;  %6248 = vmatprep.mubr.msk.bf16.mxu1 %vm205_vm1, %v7135_v62  ;;  %v343_v1 = vld [vmem:[#allocation2 + $0xd8] sm:$0xff]  ;;  %6817 = vmatprep.subr.msk.bf16.mxu1 %vm650_vm0, %v7209_v38  ;;  %v493_v29 = vshrl.u32 %v7149_v39, 16 }
  0x47   : > { %234 = vst.msk [vmem:[#allocation2 + $0x169] sm:$0xff] %vm205_vm1, %v7162_v41  ;;  %241 = vst.msk [vmem:[#allocation2 + $0x199] sm:$0xff] %vm205_vm1, %v7162_v41  ;;  %v7195_v41 = vpack.c.bf16 %v341_v61, %v340_v4  ;;  %v474_v61 = vor.u32 %v473_v36, %v469_v35  ;;  %v478_v4 = vrot.slane %v476_v33, 1  ;;  %v7217_v48 = vpack.c.bf16 %v342_v3, %v342_v3  ;;  %v344_v5 = vld [vmem:[#allocation2 + $0xe0] sm:$0xff]  ;;  %v347_v32 = vld [vmem:[#allocation2 + $0xf8] sm:$0xff] }
  0x48   : > { %235 = vst.msk [vmem:[#allocation2 + $0x171] sm:$0xff] %vm205_vm1, %v7174_v55  ;;  %242 = vst.msk [vmem:[#allocation2 + $0x1a1] sm:$0xff] %vm205_vm1, %v7174_v55  ;;  %v346_v35 = vld [vmem:[#allocation2 + $0xf0] sm:$0xff]  ;;  %v345_v27 = vld [vmem:[#allocation2 + $0xe8] sm:$0x3]  ;;  %v7230_v26 = vpack.c.bf16 %v344_v5, %v343_v1 }
  0x49   : > { %10273 = vst [vmem:[#allocation34_spill] sm:$0xff] %v7190_v59  ;;  %10274 = vst [vmem:[#allocation35_spill] sm:$0xff] %v7193_v54  ;;  %v507_v55 = vshll.u32 %v7195_v41, 16  ;;  %v293_v33 = vld [vmem:[#allocation2 + $0x147] sm:$0x1]  ;;  %v505_v28 = vshrl.u32 %v7195_v41, 16  ;;  %v7237_v23 = vpack.c.bf16 %v347_v32, %v346_v35 }
  0x4a   : > { %236 = vst.msk [vmem:[#allocation2 + $0x181] sm:$0xff] %vm205_vm1, %v7190_v59  ;;  %237 = vst.msk [vmem:[#allocation2 + $0x189] sm:$0xff] %vm205_vm1, %v7193_v54  ;;  %v486_v54 = vor.u32 %v485_v49, %v481_v50  ;;  %v490_v59 = vrot.slane %v488_v56, 1  ;;  %v256_v36 = vld [vmem:[#allocation2 + $0x13a] sm:$0x1]  ;;  %v497_v50 = vrot.slane %v495_v34, 1  ;;  %v7227_v49 = vsel %vm407_vm3, %v474_v61, %v478_v4 }
  0x4b   : > { %v500_v56 = vshll.u32 %v7203_v60, 16  ;;  %275 = vst.msk [vmem:[#allocation2 + $0x138] sm:$0x1] %vm261_vm2, %v256_v36  ;;  %311 = vst.msk [vmem:[#allocation2 + $0x149] sm:$0x1] %vm261_vm2, %v293_v33  ;;  %v509_v24 = vrot.slane %v507_v55, 1 }
  0x4c   : > { %v257_v3 = vld [vmem:[#allocation2 + $0x152] sm:$0x1]  ;;  %v7234_v34 = vsel %vm407_vm3, %v486_v54, %v490_v59  ;;  %v512_v36 = vshll.u32 %v7217_v48, 16  ;;  %v348_v33 = vld [vmem:[#allocation2 + $0x100] sm:$0x3]  ;;  %6211 = vmatmul.mubr.msk.bf16.gmra.mxu0 %vm205_vm1, %v7227_v49  ;;  %v498_v1 = vor.u32 %v497_v50, %v493_v29  ;;  %v1048_v32 = vrot.slane %v7059_v58, 1 }
  0x4d   : > { %276 = vst.msk [vmem:[#allocation2 + $0x150] sm:$0x1] %vm261_vm2, %v257_v3  ;;  %v294_v25 = vld [vmem:[#allocation2 + $0x15f] sm:$0x1]  ;;  %v502_v59 = vrot.slane %v500_v56, 1  ;;  %6214 = vmatprep.mubr.msk.bf16.mxu0 %vm205_vm1, %v7234_v34  ;;  %6249 = vmatmul.mubr.msk.bf16.gmra.mxu1 %vm205_vm1, %v7149_v39  ;;  %v519_v55 = vshll.u32 %v7230_v26, 16  ;;  %v510_v3 = vor.u32 %v509_v24, %v505_v28  ;;  %v7255_v50 = vpack.c.bf16 %v348_v33, %v348_v33 }
  0x4e   : > { %312 = vst.msk [vmem:[#allocation2 + $0x161] sm:$0x1] %vm261_vm2, %v294_v25  ;;  %v258_v61 = vld [vmem:[#allocation2 + $0x16a] sm:$0x1]  ;;  %v7250_v25 = vpack.c.bf16 %v345_v27, %v345_v27  ;;  %v350_v35 = vld [vmem:[#allocation2 + $0x110] sm:$0xff]  ;;  %v514_v29 = vrot.slane %v512_v36, 1  ;;  %6252 = vmatprep.mubr.msk.bf16.mxu1 %vm205_vm1, %v7195_v41 }
  0x4f   : > { %v295_v4 = vld [vmem:[#allocation2 + $0x177] sm:$0x1]  ;;  %277 = vst.msk [vmem:[#allocation2 + $0x168] sm:$0x1] %vm261_vm2, %v258_v61  ;;  %v349_v54 = vld [vmem:[#allocation2 + $0x108] sm:$0xff]  ;;  %v531_v58 = vshll.u32 %v7237_v23, 16  ;;  %v7260_v27 = vsel %vm407_vm3, %v498_v1, %v502_v59 }
  0x50   : > { %313 = vst.msk [vmem:[#allocation2 + $0x179] sm:$0x1] %vm261_vm2, %v295_v4  ;;  %v352_v56 = vld [vmem:[#allocation2 + $0x120] sm:$0xff]  ;;  %v353_v61 = vld [vmem:[#allocation2 + $0x128] sm:$0xff]  ;;  %v1047_v4 = vrot.slane %v7057_v57, 1  ;;  %v7263_v22 = vpack.c.bf16 %v350_v35, %v349_v54  ;;  %v521_v24 = vrot.slane %v519_v55, 1  ;;  %v7271_v20 = vsel %vm407_vm3, %v510_v3, %v514_v29 }
  0x51   : > { %v259_v5 = vld [vmem:[#allocation2 + $0x182] sm:$0x1]  ;;  %v524_v28 = vshll.u32 %v7250_v25, 16  ;;  %v529_v36 = vshrl.u32 %v7237_v23, 16  ;;  %v351_v33 = vld [vmem:[#allocation2 + $0x118] sm:$0x3]  ;;  %v7274_v59 = vpack.c.bf16 %v353_v61, %v352_v56 }
  0x52   : > { %278 = vst.msk [vmem:[#allocation2 + $0x180] sm:$0x1] %vm261_vm2, %v259_v5  ;;  %v517_v5 = vshrl.u32 %v7230_v26, 16  ;;  %v7268_v21 = vsel %vm1043_vm4, %v1047_v4, %v1048_v32  ;;  %v533_v19 = vrot.slane %v531_v58, 1  ;;  %v536_v1 = vshll.u32 %v7255_v50, 16  ;;  %v355_v61 = vld [vmem:[#allocation2 + $0x138] sm:$0xff] }
  0x53   : > { %v354_v18 = vld [vmem:[#allocation2 + $0x130] sm:$0x3]  ;;  %v7278_v55 = vpack.c.bf16 %v351_v33, %v351_v33  ;;  %v543_v54 = vshll.u32 %v7263_v22, 16  ;;  %v526_v35 = vrot.slane %v524_v28, 1  ;;  %v555_v56 = vshll.u32 %v7274_v59, 16  ;;  %v356_v4 = vld [vmem:[#allocation2 + $0x140] sm:$0xff] }
  0x54   : > { %6215 = vmatmul.mubr.msk.bf16.gmra.mxu0 %vm205_vm1, %v7260_v27  ;;  %v522_v32 = vor.u32 %v521_v24, %v517_v5  ;;  %v534_v3 = vor.u32 %v533_v19, %v529_v36  ;;  %v538_v29 = vrot.slane %v536_v1, 1  ;;  %v7287_v58 = vpack.c.bf16 %v354_v18, %v354_v18  ;;  %v358_v33 = vld [vmem:[#allocation2 + $0x150] sm:$0xff]  ;;  %v359_v17 = vld [vmem:[#allocation2 + $0x158] sm:$0xff]  ;;  %v357_v14 = vld [vmem:[#allocation2 + $0x148] sm:$0x3] }
  0x55   : > { %6218 = vmatprep.mubr.msk.bf16.mxu0 %vm205_vm1, %v7271_v20  ;;  %6253 = vmatmul.mubr.msk.bf16.gmra.mxu1 %vm205_vm1, %v7230_v26  ;;  %v541_v16 = vshrl.u32 %v7263_v22, 16  ;;  %v545_v5 = vrot.slane %v543_v54, 1  ;;  %v548_v24 = vshll.u32 %v7278_v55, 16  ;;  %v553_v19 = vshrl.u32 %v7274_v59, 16  ;;  %v360_v12 = vld [vmem:[#allocation2 + $0x160] sm:$0x3] }
  0x56   : > { %6256 = vmatprep.mubr.msk.bf16.mxu1 %vm205_vm1, %v7237_v23  ;;  %v7293_v28 = vsel %vm407_vm3, %v522_v32, %v526_v35  ;;  %v7296_v36 = vpack.c.bf16 %v356_v4, %v355_v61  ;;  %v7299_v18 = vsel %vm407_vm3, %v534_v3, %v538_v29  ;;  %v557_v1 = vrot.slane %v555_v56, 1  ;;  %v361_v61 = vld [vmem:[#allocation2 + $0x168] sm:$0xff]  ;;  %v362_v4 = vld [vmem:[#allocation2 + $0x170] sm:$0xff] }
  0x57   : > { %v560_v15 = vshll.u32 %v7287_v58, 16  ;;  %v7302_v13 = vpack.c.bf16 %v359_v17, %v358_v33  ;;  %v546_v54 = vor.u32 %v545_v5, %v541_v16  ;;  %v550_v32 = vrot.slane %v548_v24, 1  ;;  %v363_v10 = vld [vmem:[#allocation2 + $0x178] sm:$0x3] }
  0x58   : > { %v7310_v35 = vpack.c.bf16 %v357_v14, %v357_v14  ;;  %v567_v3 = vshll.u32 %v7296_v36, 16  ;;  %v558_v29 = vor.u32 %v557_v1, %v553_v19  ;;  %v7315_v17 = vpack.c.bf16 %v360_v12, %v360_v12 }
  0x59   : > { %v562_v56 = vrot.slane %v560_v15, 1  ;;  %v579_v16 = vshll.u32 %v7302_v13, 16  ;;  %v7319_v33 = vsel %vm407_vm3, %v546_v54, %v550_v32  ;;  %v565_v5 = vshrl.u32 %v7296_v36, 16  ;;  %v296_v54 = vld [vmem:[#allocation2 + $0x18f] sm:$0x1] }
  0x5a   : > { %v569_v14 = vrot.slane %v567_v3, 1  ;;  %v572_v24 = vshll.u32 %v7310_v35, 16  ;;  %v7323_v11 = vpack.c.bf16 %v362_v4, %v361_v61  ;;  %v577_v12 = vshrl.u32 %v7302_v13, 16  ;;  %314 = vst.msk [vmem:[#allocation2 + $0x191] sm:$0x1] %vm261_vm2, %v296_v54 }
  0x5b   : > { %v7326_v15 = vsel %vm407_vm3, %v558_v29, %v562_v56  ;;  %v581_v19 = vrot.slane %v579_v16, 1  ;;  %v584_v1 = vshll.u32 %v7315_v17, 16  ;;  %v7336_v29 = vpack.c.bf16 %v363_v10, %v363_v10 }
  0x5c   : > { %6219 = vmatmul.mubr.msk.bf16.gmra.mxu0 %vm205_vm1, %v7293_v28  ;;  %v570_v32 = vor.u32 %v569_v14, %v565_v5  ;;  %v574_v3 = vrot.slane %v572_v24, 1  ;;  %v591_v56 = vshll.u32 %v7323_v11, 16  ;;  %v589_v5 = vshrl.u32 %v7323_v11, 16 }
  0x5d   : > { %6222 = vmatprep.mubr.msk.bf16.mxu0 %vm205_vm1, %v7299_v18  ;;  %6257 = vmatmul.mubr.msk.bf16.gmra.mxu1 %vm205_vm1, %v7263_v22  ;;  %v582_v16 = vor.u32 %v581_v19, %v577_v12  ;;  %v586_v61 = vrot.slane %v584_v1, 1  ;;  %v596_v24 = vshll.u32 %v7336_v29, 16  ;;  %v1044_v1 = vrot.slane %v7052_v52, 1  ;;  %v7371_v52 = vld [vmem:[%s10208_s1 + $0xe] sm:$0x3] }
  0x5e   : > { %6260 = vmatprep.mubr.msk.bf16.mxu1 %vm205_vm1, %v7274_v59  ;;  %v7343_v4 = vsel %vm407_vm3, %v570_v32, %v574_v3  ;;  %v593_v14 = vrot.slane %v591_v56, 1  ;;  %v1045_v54 = vrot.slane %v7054_v53, 1  ;;  %v1762_v56 = vsel %vm650_vm0, %v7209_v38, 0 }
  0x5f   : > { %v7348_v10 = vsel %vm407_vm3, %v582_v16, %v586_v61  ;;  %v598_v19 = vrot.slane %v596_v24, 1  ;;  %v1050_v53 = vrot.slane %v7073_v2, 1  ;;  %v1556_v38 = vsel %vm650_vm0, %v7103_v30, 0  ;;  %v7390_v61 = vld [vmem:[%s10208_s1 + $0xc] sm:$0x3] }
  0x60   : > { %v594_v12 = vor.u32 %v593_v14, %v589_v5  ;;  %v1046_v3 = vsel %vm1043_vm4, %v1044_v1, %v1045_v54  ;;  %v1054_v5 = vrot.slane %v7089_v46, 1  ;;  %v1056_v30 = vrot.slane %v7091_v47, 1 }
  0x61   : > { %v1057_v14 = vrot.slane %v7097_v0, 1  ;;  %v1059_v46 = vrot.slane %v7115_v43, 1  ;;  %v1060_v0 = vrot.slane %v7125_v51, 1  ;;  %v1063_v1 = vrot.slane %v7137_v63, 1 }
  0x62   : > { %v7361_v32 = vsel %vm407_vm3, %v594_v12, %v598_v19  ;;  %v1062_v19 = vrot.slane %v7135_v62, 1  ;;  %v1065_v51 = vrot.slane %v7149_v39, 1  ;;  %v1068_v63 = vrot.slane %v7195_v41, 1 }
  0x63   : > { %v7410_v12 = vsel %vm1043_vm4, %v1056_v30, %v1057_v14  ;;  %v7425_v54 = vsel %vm1043_vm4, %v1059_v46, %v1060_v0  ;;  %v1078_v46 = vrot.slane %v7278_v55, 1  ;;  %v1081_v0 = vrot.slane %v7287_v58, 1  ;;  %v260_v55 = vld [vmem:[#allocation2 + $0x19a] sm:$0x1] }
  0x64   : > { %6223 = vmatmul.mubr.msk.bf16.gmra.mxu0 %vm205_vm1, %v7319_v33  ;;  %v1084_v58 = vrot.slane %v7310_v35, 1  ;;  %279 = vst.msk [vmem:[#allocation2 + $0x198] sm:$0x1] %vm261_vm2, %v260_v55 }
  0x65   : > { %6226 = vmatprep.mubr.msk.bf16.mxu0 %vm205_vm1, %v7326_v15  ;;  %6261 = vmatmul.mubr.msk.bf16.gmra.mxu1 %vm205_vm1, %v7296_v36 }
  0x66   : > { %6264 = vmatprep.mubr.msk.bf16.mxu1 %vm205_vm1, %v7302_v13 }
  0x6c   : > { %6227 = vmatmul.mubr.msk.bf16.gmra.mxu0 %vm205_vm1, %v7343_v4 }
  0x6d   : > { %6230 = vmatprep.mubr.msk.bf16.mxu0 %vm205_vm1, %v7348_v10  ;;  %6265 = vmatmul.mubr.msk.bf16.gmra.mxu1 %vm205_vm1, %v7323_v11 }
  0x6e   : > { %6304 = vmatprep.mubr.msk.bf16.mxu1 %vm205_vm1, %v7057_v57  ;;  %v1051_v57 = vrot.slane %v7080_v37, 1  ;;  %v1053_v37 = vrot.slane %v7086_v42, 1 }
  0x70   : > { %v7385_v16 = vsel %vm1043_vm4, %v1050_v53, %v1051_v57  ;;  %v7407_v24 = vsel %vm1043_vm4, %v1053_v37, %v1054_v5  ;;  %v1069_v53 = vrot.slane %v7217_v48, 1  ;;  %v1072_v37 = vrot.slane %v7250_v25, 1 }
  0x71   : > { %v1074_v48 = vrot.slane %v7237_v23, 1  ;;  %v1075_v5 = vrot.slane %v7255_v50, 1  ;;  %v1077_v25 = vrot.slane %v7263_v22, 1  ;;  %v1080_v50 = vrot.slane %v7274_v59, 1 }
  0x73   : > { %v7464_v14 = vsel %vm1043_vm4, %v1074_v48, %v1075_v5 }
  0x74   : > { %6231 = vmatmul.mubr.msk.bf16.gmra.mxu0 %vm205_vm1, %v7361_v32 }
  0x75   : > { %6270 = vmatprep.mubr.msk.bf16.mxu0 %vm205_vm1, %v1046_v3  ;;  %6305 = vmatmul.mubr.msk.bf16.vlgmr.msra.gmra.mxu1 %vm205_vm1, %v7073_v2  ;;  %v7428_v3 = vsel %vm1043_vm4, %v1062_v19, %v1063_v1  ;;  %v7479_v19 = vsel %vm1043_vm4, %v1077_v25, %v1078_v46  ;;  %v7482_v1 = vsel %vm1043_vm4, %v1080_v50, %v1081_v0  ;;  %v1090_v25 = vrot.slane %v7336_v29, 1  ;;  %v5721_v29 = vld [vmem:[%s10208_s1 + $0x10] sm:$0x3] }
  0x76   : > { %6308 = vmatprep.mubr.msk.bf16.mxu1 %vm205_vm1, %v7086_v42  ;;  %6371 = vmatpush3.bf16.msra.mxu1 %v1762_v56  ;;  %v1066_v56 = vrot.slane %v7203_v60, 1  ;;  %v1071_v60 = vrot.slane %v7230_v26, 1  ;;  %v2175_v50 = vsel %vm650_vm0, %v7371_v52, 0 }
  0x77   : > { %6819 = vmatprep.subr.msk.bf16.mxu1 %vm650_vm0, %v7371_v52 }
  0x78   : > { %v7443_v57 = vsel %vm1043_vm4, %v1065_v51, %v1066_v56  ;;  %v7461_v30 = vsel %vm1043_vm4, %v1071_v60, %v1072_v37  ;;  %v1083_v51 = vrot.slane %v7296_v36, 1  ;;  %v1086_v56 = vrot.slane %v7302_v13, 1  ;;  %v364_v60 = vld [vmem:[#allocation2 + $0x180] sm:$0xff]  ;;  %v365_v37 = vld [vmem:[#allocation2 + $0x188] sm:$0xff] }
  0x79   : > { %v7504_v5 = vpack.c.bf16 %v365_v37, %v364_v60 }
  0x7a   : > { %v7499_v48 = vsel %vm1043_vm4, %v1083_v51, %v1084_v58 }
  0x7b   : > { %v1753_v0 = vrot.slane %v7504_v5, 1  ;;  %v1539_v51 = vshrl.u32 %v7504_v5, 16 }
  0x7c   : > { %6271 = vmatmul.mubr.msk.bf16.vlgmr.msra.gmra.mxu0 %vm205_vm1, %v7268_v21 }
  0x7d   : > { %6337 = vmatpush3.bf16.msra.mxu0 %v1556_v38  ;;  %6274 = vmatprep.mubr.msk.bf16.mxu0 %vm205_vm1, %v7385_v16  ;;  %v7446_v38 = vsel %vm1043_vm4, %v1068_v63, %v1069_v53  ;;  %v1087_v63 = vrot.slane %v7315_v17, 1  ;;  %v297_v53 = vld [vmem:[#allocation2 + $0x1a7] sm:$0x1]  ;;  %v1089_v17 = vrot.slane %v7323_v11, 1 }
  0x7e   : > { %6309 = vmatmul.mubr.msk.bf16.gmra.mxu1 %vm205_vm1, %v7091_v47  ;;  %6818 = vmatprep.subr.msk.bf16.mxu0 %vm650_vm0, %v7390_v61  ;;  %315 = vst.msk [vmem:[#allocation2 + $0x1a9] sm:$0x1] %vm261_vm2, %v297_v53 }
  0x7f   : > { %6312 = vmatprep.mubr.msk.bf16.mxu1 %vm205_vm1, %v7115_v43  ;;  %v7502_v35 = vsel %vm1043_vm4, %v1086_v56, %v1087_v63  ;;  %v7517_v46 = vsel %vm1043_vm4, %v1089_v17, %v1090_v25 }
  0x84   : > { %6275 = vmatmul.mubr.msk.bf16.gmra.mxu0 %vm205_vm1, %v7407_v24 }
  0x85   : > { %6278 = vmatprep.mubr.msk.bf16.mxu0 %vm205_vm1, %v7410_v12 }
  0x86   : > { %6313 = vmatmul.mubr.msk.bf16.gmra.mxu1 %vm205_vm1, %v7135_v62 }
  0x87   : > { %6316 = vmatprep.mubr.msk.bf16.mxu1 %vm205_vm1, %v7149_v39 }
  0x8c   : > { %6279 = vmatmul.mubr.msk.bf16.gmra.mxu0 %vm205_vm1, %v7425_v54 }
  0x8d   : > { %6282 = vmatprep.mubr.msk.bf16.mxu0 %vm205_vm1, %v7428_v3 }
  0x8e   : > { %6317 = vmatmul.mubr.msk.bf16.gmra.mxu1 %vm205_vm1, %v7195_v41 }
  0x8f   : > { %6320 = vmatprep.mubr.msk.bf16.mxu1 %vm205_vm1, %v7230_v26 }
  0x94   : > { %6283 = vmatmul.mubr.msk.bf16.gmra.mxu0 %vm205_vm1, %v7443_v57 }
  0x95   : > { %6286 = vmatprep.mubr.msk.bf16.mxu0 %vm205_vm1, %v7446_v38 }
  0x96   : > { %6321 = vmatmul.mubr.msk.bf16.gmra.mxu1 %vm205_vm1, %v7237_v23 }
  0x97   : > { %6324 = vmatprep.mubr.msk.bf16.mxu1 %vm205_vm1, %v7263_v22 }
  0x9c   : > { %6287 = vmatmul.mubr.msk.bf16.gmra.mxu0 %vm205_vm1, %v7461_v30 }
  0x9d   : > { %6290 = vmatprep.mubr.msk.bf16.mxu0 %vm205_vm1, %v7464_v14 }
  0x9e   : > { %6325 = vmatmul.mubr.msk.bf16.gmra.mxu1 %vm205_vm1, %v7274_v59 }
  0x9f   : > { %6328 = vmatprep.mubr.msk.bf16.mxu1 %vm205_vm1, %v7296_v36 }
  0xa4   : > { %6291 = vmatmul.mubr.msk.bf16.gmra.mxu0 %vm205_vm1, %v7479_v19 }
  0xa5   : > { %6294 = vmatprep.mubr.msk.bf16.mxu0 %vm205_vm1, %v7482_v1 }
  0xa6   : > { %6329 = vmatmul.mubr.msk.bf16.gmra.mxu1 %vm205_vm1, %v7302_v13 }
  0xa7   : > { %6332 = vmatprep.mubr.msk.bf16.mxu1 %vm205_vm1, %v7323_v11 }
  0xac   : > { %6295 = vmatmul.mubr.msk.bf16.gmra.mxu0 %vm205_vm1, %v7499_v48 }
  0xad   : > { %6298 = vmatprep.mubr.msk.bf16.mxu0 %vm205_vm1, %v7502_v35 }
  0xae   : > { %6333 = vmatmul.mubr.msk.bf16.gmra.mxu1 %vm205_vm1, %v7504_v5 }
  0xaf   : > { %6372 = vmatprep.mubr.msk.bf16.mxu1 %vm205_vm1, %v7268_v21  ;;  %v1963_v21 = vsel %vm650_vm0, %v7390_v61, 0  ;;  %v1541_v61 = vshll.u32 %v7504_v5, 16 }
  0xb1   : > { %v1543_v58 = vrot.slane %v1541_v61, 1 }
  0xb3   : > { %v1544_v53 = vor.u32 %v1543_v58, %v1539_v51 }
  0xb4   : > { %6299 = vmatmul.mubr.msk.bf16.gmra.mxu0 %vm205_vm1, %v7517_v46 }
  0xb5   : > { %6338 = vmatprep.mubr.msk.bf16.mxu0 %vm205_vm1, %v7107_v31  ;;  %v366_v31 = vld [vmem:[#allocation2 + $0x190] sm:$0x3] }
  0xb6   : > { %6373 = vmatmul.mubr.msk.bf16.vlgmr.msra.gmra.mxu1 %vm205_vm1, %v7385_v16  ;;  %v403_v52 = vpack.c.bf16 %v366_v31, %v366_v31 }
  0xb7   : > { %6376 = vmatprep.mubr.msk.bf16.mxu1 %vm205_vm1, %v7407_v24  ;;  %6439 = vmatpush3.bf16.msra.mxu1 %v2175_v50 }
  0xb8   : > { %v1754_v55 = vrot.slane %v403_v52, 1  ;;  %v1546_v56 = vshll.u32 %v403_v52, 16 }
  0xba   : > { %v7587_v63 = vsel %vm1043_vm4, %v1753_v0, %v1754_v55  ;;  %v1548_v60 = vrot.slane %v1546_v56, 1 }
  0xbc   : > { %6339 = vmatmul.mubr.msk.bf16.vlgmr.msra.gmra.mxu0 %vm205_vm1, %v7121_v44  ;;  %v7598_v37 = vsel %vm407_vm3, %v1544_v53, %v1548_v60 }
  0xbd   : > { %6405 = vmatpush3.bf16.msra.mxu0 %v1963_v21  ;;  %6342 = vmatprep.mubr.msk.bf16.mxu0 %vm205_vm1, %v7165_v40 }
  0xbe   : > { %6377 = vmatmul.mubr.msk.bf16.gmra.mxu1 %vm205_vm1, %v7410_v12  ;;  %6820 = vmatprep.subr.msk.bf16.mxu0 %vm650_vm0, %v5721_v29 }
  0xbf   : > { %6380 = vmatprep.mubr.msk.bf16.mxu1 %vm205_vm1, %v7425_v54 }
  0xc4   : > { %6343 = vmatmul.mubr.msk.bf16.gmra.mxu0 %vm205_vm1, %v7181_v45 }
  0xc5   : > { %6346 = vmatprep.mubr.msk.bf16.mxu0 %vm205_vm1, %v7227_v49 }
  0xc6   : > { %6381 = vmatmul.mubr.msk.bf16.gmra.mxu1 %vm205_vm1, %v7428_v3 }
  0xc7   : > { %6384 = vmatprep.mubr.msk.bf16.mxu1 %vm205_vm1, %v7443_v57 }
  0xcc   : > { %6347 = vmatmul.mubr.msk.bf16.gmra.mxu0 %vm205_vm1, %v7234_v34 }
  0xcd   : > { %6350 = vmatprep.mubr.msk.bf16.mxu0 %vm205_vm1, %v7260_v27 }
  0xce   : > { %6385 = vmatmul.mubr.msk.bf16.gmra.mxu1 %vm205_vm1, %v7446_v38 }
  0xcf   : > { %6388 = vmatprep.mubr.msk.bf16.mxu1 %vm205_vm1, %v7461_v30 }
  0xd4   : > { %6351 = vmatmul.mubr.msk.bf16.gmra.mxu0 %vm205_vm1, %v7271_v20 }
  0xd5   : > { %6354 = vmatprep.mubr.msk.bf16.mxu0 %vm205_vm1, %v7293_v28 }
  0xd6   : > { %6389 = vmatmul.mubr.msk.bf16.gmra.mxu1 %vm205_vm1, %v7464_v14 }
  0xd7   : > { %6392 = vmatprep.mubr.msk.bf16.mxu1 %vm205_vm1, %v7479_v19 }
  0xdc   : > { %6355 = vmatmul.mubr.msk.bf16.gmra.mxu0 %vm205_vm1, %v7299_v18 }
  0xdd   : > { %6358 = vmatprep.mubr.msk.bf16.mxu0 %vm205_vm1, %v7319_v33 }
  0xde   : > { %6393 = vmatmul.mubr.msk.bf16.gmra.mxu1 %vm205_vm1, %v7482_v1 }
  0xdf   : > { %6396 = vmatprep.mubr.msk.bf16.mxu1 %vm205_vm1, %v7499_v48 }
  0xe4   : > { %6359 = vmatmul.mubr.msk.bf16.gmra.mxu0 %vm205_vm1, %v7326_v15 }
  0xe5   : > { %6362 = vmatprep.mubr.msk.bf16.mxu0 %vm205_vm1, %v7343_v4 }
  0xe6   : > { %6397 = vmatmul.mubr.msk.bf16.gmra.mxu1 %vm205_vm1, %v7502_v35 }
  0xe7   : > { %6400 = vmatprep.mubr.msk.bf16.mxu1 %vm205_vm1, %v7517_v46 }
  0xec   : > { %6363 = vmatmul.mubr.msk.bf16.gmra.mxu0 %vm205_vm1, %v7348_v10 }
  0xed   : > { %6366 = vmatprep.mubr.msk.bf16.mxu0 %vm205_vm1, %v7361_v32 }
  0xee   : > { %6401 = vmatmul.mubr.msk.bf16.gmra.mxu1 %vm205_vm1, %v7587_v63 }
  0xef   : > { %6440 = vmatprep.mubr.msk.bf16.mxu1 %vm205_vm1, %v7121_v44  ;;  %v2381_v44 = vsel %vm650_vm0, %v5721_v29, 0 }
  0xf4   : > { %6367 = vmatmul.mubr.msk.bf16.gmra.mxu0 %vm205_vm1, %v7598_v37 }
  0xf5   : > { %6406 = vmatprep.mubr.msk.bf16.mxu0 %vm205_vm1, %v7073_v2  ;;  %v6238_v17 = vpop.f32.mrf.mxu1 }
  0xf6   : > { %6441 = vmatmul.mubr.msk.bf16.vlgmr.msra.gmra.mxu1 %vm205_vm1, %v7165_v40 }
  0xf7   : > { %v884_v25 = vpop.f32.mrf.mxu1  ;;  %6444 = vmatprep.mubr.msk.bf16.mxu1 %vm205_vm1, %v7181_v45 }
  0xf9   : > { %v6239_v50 = vpop.f32.mrf.mxu1 }
  0xfb   : > { %v887_v21 = vpop.f32.mrf.mxu1 }
  0xfc   : > { %v6204_v31 = vpop.f32.mrf.mxu0  ;;  %6407 = vmatmul.mubr.msk.bf16.vlgmr.msra.gmra.mxu0 %vm205_vm1, %v7086_v42 }
  0xfd   : > { %v7611_v52 = vadd.f32 %v6238_v17, %v6204_v31  ;;  %6473 = vmatpush3.bf16.msra.mxu0 %v2381_v44  ;;  %6410 = vmatprep.mubr.msk.bf16.mxu0 %vm205_vm1, %v7091_v47  ;;  %v6242_v2 = vpop.f32.mrf.mxu1 }
  0xfe   : > { %v688_v40 = vpop.f32.mrf.mxu0  ;;  %6445 = vmatmul.mubr.msk.bf16.gmra.mxu1 %vm205_vm1, %v7227_v49 }
  0xff   : > { %v7617_v45 = vadd.f32 %v884_v25, %v688_v40  ;;  %v900_v61 = vpop.f32.mrf.mxu1  ;;  %6448 = vmatprep.mubr.msk.bf16.mxu1 %vm205_vm1, %v7234_v34 }
 0x100   : > { %v6205_v29 = vpop.f32.mrf.mxu0 }
 0x101   : > { %v7621_v0 = vadd.f32 %v6239_v50, %v6205_v29  ;;  %v6243_v42 = vpop.f32.mrf.mxu1 }
 0x102   : > { %v691_v55 = vpop.f32.mrf.mxu0 }
 0x103   : > { %v7623_v51 = vadd.f32 %v887_v21, %v691_v55  ;;  %v903_v58 = vpop.f32.mrf.mxu1 }
 0x104   : > { %v6208_v47 = vpop.f32.mrf.mxu0  ;;  %6411 = vmatmul.mubr.msk.bf16.gmra.mxu0 %vm205_vm1, %v7115_v43 }
 0x105   : > { %v7627_v56 = vadd.f32 %v6242_v2, %v6208_v47  ;;  %6414 = vmatprep.mubr.msk.bf16.mxu0 %vm205_vm1, %v7135_v62  ;;  %v6246_v49 = vpop.f32.mrf.mxu1 }
 0x106   : > { %v704_v53 = vpop.f32.mrf.mxu0  ;;  %6449 = vmatmul.mubr.msk.bf16.gmra.mxu1 %vm205_vm1, %v7260_v27 }
 0x107   : > { %v7633_v34 = vadd.f32 %v900_v61, %v704_v53  ;;  %v916_v60 = vpop.f32.mrf.mxu1  ;;  %6452 = vmatprep.mubr.msk.bf16.mxu1 %vm205_vm1, %v7271_v20 }
 0x108   : > { %v6209_v17 = vpop.f32.mrf.mxu0 }
 0x109   : > { %v7637_v25 = vadd.f32 %v6243_v42, %v6209_v17  ;;  %v6247_v43 = vpop.f32.mrf.mxu1  ;;  %v367_v17 = vld [vmem:[#allocation2 + $0x198] sm:$0xff] }
 0x10a   : > { %v707_v50 = vpop.f32.mrf.mxu0 }
 0x10b   : > { %v7639_v44 = vadd.f32 %v903_v58, %v707_v50  ;;  %v919_v21 = vpop.f32.mrf.mxu1 }
 0x10c   : > { %v6212_v62 = vpop.f32.mrf.mxu0  ;;  %6415 = vmatmul.mubr.msk.bf16.gmra.mxu0 %vm205_vm1, %v7149_v39 }
 0x10d   : > { %v7643_v31 = vadd.f32 %v6246_v49, %v6212_v62  ;;  %6418 = vmatprep.mubr.msk.bf16.mxu0 %vm205_vm1, %v7195_v41  ;;  %v6250_v27 = vpop.f32.mrf.mxu1 }
 0x10e   : > { %v720_v2 = vpop.f32.mrf.mxu0  ;;  %6453 = vmatmul.mubr.msk.bf16.gmra.mxu1 %vm205_vm1, %v7293_v28 }
 0x10f   : > { %v7649_v20 = vadd.f32 %v916_v60, %v720_v2  ;;  %v932_v40 = vpop.f32.mrf.mxu1  ;;  %6456 = vmatprep.mubr.msk.bf16.mxu1 %vm205_vm1, %v7299_v18  ;;  %v369_v2 = vld [vmem:[#allocation2 + $0x1a8] sm:$0x3] }
 0x110   : > { %v6213_v61 = vpop.f32.mrf.mxu0 }
 0x111   : > { %v7653_v29 = vadd.f32 %v6247_v43, %v6213_v61  ;;  %v6251_v39 = vpop.f32.mrf.mxu1  ;;  %v368_v43 = vld [vmem:[#allocation2 + $0x1a0] sm:$0xff] }
 0x112   : > { %v723_v42 = vpop.f32.mrf.mxu0 }
 0x113   : > { %v7655_v55 = vadd.f32 %v919_v21, %v723_v42  ;;  %v935_v58 = vpop.f32.mrf.mxu1 }
 0x114   : > { %v6216_v41 = vpop.f32.mrf.mxu0  ;;  %6419 = vmatmul.mubr.msk.bf16.gmra.mxu0 %vm205_vm1, %v7230_v26 }
 0x115   : > { %v7659_v47 = vadd.f32 %v6250_v27, %v6216_v41  ;;  %6422 = vmatprep.mubr.msk.bf16.mxu0 %vm205_vm1, %v7237_v23  ;;  %v6254_v28 = vpop.f32.mrf.mxu1  ;;  %v7675_v27 = vpack.c.bf16 %v368_v43, %v367_v17 }
 0x116   : > { %v736_v49 = vpop.f32.mrf.mxu0  ;;  %6457 = vmatmul.mubr.msk.bf16.gmra.mxu1 %vm205_vm1, %v7319_v33 }
 0x117   : > { %v7665_v18 = vadd.f32 %v932_v40, %v736_v49  ;;  %v948_v53 = vpop.f32.mrf.mxu1  ;;  %6460 = vmatprep.mubr.msk.bf16.mxu1 %vm205_vm1, %v7326_v15 }
 0x118   : > { %v6217_v60 = vpop.f32.mrf.mxu0 }
 0x119   : > { %v7669_v26 = vadd.f32 %v6251_v39, %v6217_v60  ;;  %v6255_v50 = vpop.f32.mrf.mxu1 }
 0x11a   : > { %v739_v21 = vpop.f32.mrf.mxu0 }
 0x11b   : > { %v7671_v62 = vadd.f32 %v935_v58, %v739_v21  ;;  %v7673_v23 = vpop.f32.mrf.mxu1  ;;  %v7689_v58 = vpack.c.bf16 %v369_v2, %v369_v2 }
 0x11c   : > { %v6220_v33 = vpop.f32.mrf.mxu0  ;;  %6423 = vmatmul.mubr.msk.bf16.gmra.mxu0 %vm205_vm1, %v7263_v22  ;;  %v2160_v22 = vshll.u32 %v7675_v27, 16 }
 0x11d   : > { %v7679_v40 = vadd.f32 %v6254_v28, %v6220_v33  ;;  %6426 = vmatprep.mubr.msk.bf16.mxu0 %vm205_vm1, %v7274_v59  ;;  %v6258_v15 = vpop.f32.mrf.mxu1  ;;  %v2165_v17 = vshll.u32 %v7689_v58, 16 }
 0x11e   : > { %v752_v61 = vpop.f32.mrf.mxu0  ;;  %6461 = vmatmul.mubr.msk.bf16.gmra.mxu1 %vm205_vm1, %v7343_v4  ;;  %v2158_v4 = vshrl.u32 %v7675_v27, 16 }
 0x11f   : > { %v7685_v39 = vadd.f32 %v948_v53, %v752_v61  ;;  %v964_v42 = vpop.f32.mrf.mxu1  ;;  %6464 = vmatprep.mubr.msk.bf16.mxu1 %vm205_vm1, %v7348_v10  ;;  %v2162_v53 = vrot.slane %v2160_v22, 1  ;;  %v2167_v22 = vrot.slane %v2165_v17, 1 }
 0x120   : > { %v6221_v41 = vpop.f32.mrf.mxu0 }
 0x121   : > { %v7692_v28 = vadd.f32 %v6255_v50, %v6221_v41  ;;  %v6259_v49 = vpop.f32.mrf.mxu1  ;;  %v2163_v61 = vor.u32 %v2162_v53, %v2158_v4 }
 0x122   : > { %v7694_v59 = vpop.f32.mrf.mxu0 }
 0x123   : > { %v7696_v60 = vpop.f32.mrf.mxu1  ;;  %v2168_v7 = vsel %vm407_vm3, %v2163_v61, %v2167_v22 }
 0x124   : > { %v6224_v43 = vpop.f32.mrf.mxu0  ;;  %6427 = vmatmul.mubr.msk.bf16.gmra.mxu0 %vm205_vm1, %v7296_v36 }
 0x125   : > { %v7702_v10 = vadd.f32 %v6258_v15, %v6224_v43  ;;  %6430 = vmatprep.mubr.msk.bf16.mxu0 %vm205_vm1, %v7302_v13  ;;  %v6262_v50 = vpop.f32.mrf.mxu1 }
 0x126   : > { %v768_v21 = vpop.f32.mrf.mxu0  ;;  %6465 = vmatmul.mubr.msk.bf16.gmra.mxu1 %vm205_vm1, %v7361_v32 }
 0x127   : > { %v7708_v33 = vadd.f32 %v964_v42, %v768_v21  ;;  %v980_v2 = vpop.f32.mrf.mxu1  ;;  %6468 = vmatprep.mubr.msk.bf16.mxu1 %vm205_vm1, %v7598_v37 }
 0x128   : > { %v6225_v41 = vpop.f32.mrf.mxu0 }
 0x129   : > { %v7712_v36 = vadd.f32 %v6259_v49, %v6225_v41  ;;  %v6263_v15 = vpop.f32.mrf.mxu1 }
 0x12a   : > { %v7714_v43 = vpop.f32.mrf.mxu0 }
 0x12b   : > { %v7716_v13 = vpop.f32.mrf.mxu1 }
 0x12c   : > { %10275 = vst [vmem:[#allocation36_spill] sm:$0xff] %v7716_v13  ;;  %v6228_v6 = vpop.f32.mrf.mxu0  ;;  %6431 = vmatmul.mubr.msk.bf16.gmra.mxu0 %vm205_vm1, %v7323_v11 }
 0x12d   : > { %v7721_v32 = vadd.f32 %v6262_v50, %v6228_v6  ;;  %6434 = vmatprep.mubr.msk.bf16.mxu0 %vm205_vm1, %v7504_v5  ;;  %v6266_v37 = vpop.f32.mrf.mxu1 }
 0x12e   : > { %v784_v42 = vpop.f32.mrf.mxu0  ;;  %6469 = vmatmul.mubr.msk.bf16.gmra.mxu1 %vm205_vm1, %v2168_v7 }
 0x12f   : > { %v7726_v49 = vadd.f32 %v980_v2, %v784_v42  ;;  %v996_v4 = vpop.f32.mrf.mxu1 }
 0x130   : > { %v6229_v53 = vpop.f32.mrf.mxu0 }
 0x131   : > { %v7728_v17 = vadd.f32 %v6263_v15, %v6229_v53  ;;  %v6267_v21 = vpop.f32.mrf.mxu1 }
 0x132   : > { %v7730_v61 = vpop.f32.mrf.mxu0 }
 0x133   : > { %10276 = vst [vmem:[#allocation37_spill] sm:$0xff] %v7730_v61  ;;  %v7732_v22 = vpop.f32.mrf.mxu1 }
 0x134   : > { %10277 = vst [vmem:[#allocation38_spill] sm:$0xff] %v7732_v22  ;;  %v6232_v6 = vpop.f32.mrf.mxu0  ;;  %6435 = vmatmul.mubr.msk.bf16.gmra.mxu0 %vm205_vm1, %v7675_v27 }
 0x135   : > { %v7736_v11 = vadd.f32 %v6266_v37, %v6232_v6  ;;  %6474 = vmatprep.mubr.msk.bf16.mxu0 %vm205_vm1, %v7385_v16  ;;  %v6306_v7 = vpop.f32.mrf.mxu1 }
 0x136   : > { %v800_v5 = vpop.f32.mrf.mxu0 }
 0x137   : > { %v7740_v50 = vadd.f32 %v996_v4, %v800_v5  ;;  %v1380_v2 = vpop.f32.mrf.mxu1 }
 0x138   : > { %v6233_v41 = vpop.f32.mrf.mxu0 }
 0x139   : > { %v7742_v15 = vadd.f32 %v6267_v21, %v6233_v41  ;;  %v6307_v42 = vpop.f32.mrf.mxu1 }
 0x13a   : > { %v7744_v53 = vpop.f32.mrf.mxu0 }
 0x13b   : > { %10278 = vst [vmem:[#allocation39_spill] sm:$0xff] %v7744_v53  ;;  %v7746_v9 = vpop.f32.mrf.mxu1 }
 0x13c   : > { %v6272_v8 = vpop.f32.mrf.mxu0  ;;  %6475 = vmatmul.mubr.msk.bf16.vlgmr.msra.gmra.mxu0 %vm205_vm1, %v7407_v24 }
 0x13d   : > { %v1308_v37 = vadd.f32 %v6272_v8, %v7611_v52  ;;  %6478 = vmatprep.mubr.msk.bf16.mxu0 %vm205_vm1, %v7410_v12 }
 0x13e   : > { %v1179_v16 = vpop.f32.mrf.mxu0  ;;  %v6310_v4 = vpop.f32.mrf.mxu1 }
 0x13f   : > { %v1306_v6 = vadd.f32 %v1179_v16, %v7617_v45  ;;  %v7754_v21 = vadd.f32 %v6306_v7, %v1308_v37 }
 0x140   : > { %v6273_v5 = vpop.f32.mrf.mxu0  ;;  %v1396_v41 = vpop.f32.mrf.mxu1 }
 0x141   : > { %v1309_v22 = vadd.f32 %v6273_v5, %v7621_v0  ;;  %v7757_v53 = vadd.f32 %v1380_v2, %v1306_v6 }
 0x142   : > { %v1182_v13 = vpop.f32.mrf.mxu0  ;;  %v6311_v61 = vpop.f32.mrf.mxu1 }
 0x143   : > { %v7760_v24 = vadd.f32 %v1182_v13, %v7623_v51  ;;  %v7762_v8 = vadd.f32 %v6307_v42, %v1309_v22 }
 0x144   : > { %v6276_v12 = vpop.f32.mrf.mxu0  ;;  %6479 = vmatmul.mubr.msk.bf16.gmra.mxu0 %vm205_vm1, %v7425_v54  ;;  %v7766_v52 = vpop.f32.mrf.mxu1 }
 0x145   : > { %v1312_v45 = vadd.f32 %v6276_v12, %v7627_v56  ;;  %6482 = vmatprep.mubr.msk.bf16.mxu0 %vm205_vm1, %v7428_v3 }
 0x146   : > { %v1195_v0 = vpop.f32.mrf.mxu0  ;;  %v6314_v7 = vpop.f32.mrf.mxu1 }
 0x147   : > { %v1310_v2 = vadd.f32 %v1195_v0, %v7633_v34  ;;  %v7772_v37 = vadd.f32 %v6310_v4, %v1312_v45 }
 0x148   : > { %v6277_v51 = vpop.f32.mrf.mxu0  ;;  %v1412_v13 = vpop.f32.mrf.mxu1 }
 0x149   : > { %v1313_v22 = vadd.f32 %v6277_v51, %v7637_v25  ;;  %v7775_v42 = vadd.f32 %v1396_v41, %v1310_v2 }
 0x14a   : > { %v1198_v54 = vpop.f32.mrf.mxu0  ;;  %v6315_v16 = vpop.f32.mrf.mxu1 }
 0x14b   : > { %v7778_v6 = vadd.f32 %v1198_v54, %v7639_v44  ;;  %v7780_v56 = vadd.f32 %v6311_v61, %v1313_v22 }
 0x14c   : > { %v6280_v3 = vpop.f32.mrf.mxu0  ;;  %6483 = vmatmul.mubr.msk.bf16.gmra.mxu0 %vm205_vm1, %v7443_v57  ;;  %v7784_v34 = vpop.f32.mrf.mxu1 }
 0x14d   : > { %v1316_v4 = vadd.f32 %v6280_v3, %v7643_v31  ;;  %6486 = vmatprep.mubr.msk.bf16.mxu0 %vm205_vm1, %v7446_v38 }
 0x14e   : > { %v1211_v25 = vpop.f32.mrf.mxu0  ;;  %v6318_v5 = vpop.f32.mrf.mxu1 }
 0x14f   : > { %v1314_v41 = vadd.f32 %v1211_v25, %v7649_v20  ;;  %v7790_v12 = vadd.f32 %v6314_v7, %v1316_v4 }
 0x150   : > { %v6281_v44 = vpop.f32.mrf.mxu0  ;;  %v1428_v61 = vpop.f32.mrf.mxu1 }
 0x151   : > { %v1317_v45 = vadd.f32 %v6281_v44, %v7653_v29  ;;  %v7793_v0 = vadd.f32 %v1412_v13, %v1314_v41 }
 0x152   : > { %v1214_v57 = vpop.f32.mrf.mxu0  ;;  %v6319_v2 = vpop.f32.mrf.mxu1 }
 0x153   : > { %v7796_v51 = vadd.f32 %v1214_v57, %v7655_v55  ;;  %v7798_v31 = vadd.f32 %v6315_v16, %v1317_v45 }
 0x154   : > { %v6284_v38 = vpop.f32.mrf.mxu0  ;;  %6487 = vmatmul.mubr.msk.bf16.gmra.mxu0 %vm205_vm1, %v7461_v30  ;;  %v7802_v20 = vpop.f32.mrf.mxu1 }
 0x155   : > { %v1320_v7 = vadd.f32 %v6284_v38, %v7659_v47  ;;  %6490 = vmatprep.mubr.msk.bf16.mxu0 %vm205_vm1, %v7464_v14 }
 0x156   : > { %v1227_v29 = vpop.f32.mrf.mxu0  ;;  %v6322_v13 = vpop.f32.mrf.mxu1 }
 0x157   : > { %v1318_v22 = vadd.f32 %v1227_v29, %v7665_v18  ;;  %v7808_v54 = vadd.f32 %v6318_v5, %v1320_v7 }
 0x158   : > { %v6285_v55 = vpop.f32.mrf.mxu0  ;;  %v1444_v16 = vpop.f32.mrf.mxu1 }
 0x159   : > { %v1321_v3 = vadd.f32 %v6285_v55, %v7669_v26  ;;  %v7811_v4 = vadd.f32 %v1428_v61, %v1318_v22 }
 0x15a   : > { %v1230_v30 = vpop.f32.mrf.mxu0  ;;  %v6323_v25 = vpop.f32.mrf.mxu1 }
 0x15b   : > { %v7814_v41 = vadd.f32 %v1230_v30, %v7671_v62  ;;  %v7816_v47 = vadd.f32 %v6319_v2, %v1321_v3 }
 0x15c   : > { %v6288_v14 = vpop.f32.mrf.mxu0  ;;  %6491 = vmatmul.mubr.msk.bf16.gmra.mxu0 %vm205_vm1, %v7479_v19  ;;  %v7820_v18 = vpop.f32.mrf.mxu1 }
 0x15d   : > { %v1324_v5 = vadd.f32 %v6288_v14, %v7679_v40  ;;  %6494 = vmatprep.mubr.msk.bf16.mxu0 %vm205_vm1, %v7482_v1 }
 0x15e   : > { %v1243_v26 = vpop.f32.mrf.mxu0  ;;  %v6326_v44 = vpop.f32.mrf.mxu1 }
 0x15f   : > { %v1322_v61 = vadd.f32 %v1243_v26, %v7685_v39  ;;  %v7826_v45 = vadd.f32 %v6322_v13, %v1324_v5  ;;  %v2373_v26 = vrot.slane %v7689_v58, 1 }
 0x160   : > { %v6289_v62 = vpop.f32.mrf.mxu0  ;;  %v1460_v57 = vpop.f32.mrf.mxu1 }
 0x161   : > { %v1325_v2 = vadd.f32 %v6289_v62, %v7692_v28  ;;  %v7829_v38 = vadd.f32 %v1444_v16, %v1322_v61 }
 0x162   : > { %v7831_v19 = vpop.f32.mrf.mxu0  ;;  %v6327_v7 = vpop.f32.mrf.mxu1 }
 0x163   : > { %v7833_v29 = vadd.f32 %v6323_v25, %v1325_v2 }
 0x164   : > { %v6292_v40 = vpop.f32.mrf.mxu0  ;;  %6495 = vmatmul.mubr.msk.bf16.gmra.mxu0 %vm205_vm1, %v7499_v48  ;;  %v7837_v1 = vpop.f32.mrf.mxu1 }
 0x165   : > { %v1328_v39 = vadd.f32 %v6292_v40, %v7702_v10  ;;  %6498 = vmatprep.mubr.msk.bf16.mxu0 %vm205_vm1, %v7502_v35 }
 0x166   : > { %v1259_v13 = vpop.f32.mrf.mxu0  ;;  %v6330_v28 = vpop.f32.mrf.mxu1 }
 0x167   : > { %v1326_v22 = vadd.f32 %v1259_v13, %v7708_v33  ;;  %v7843_v55 = vadd.f32 %v6326_v44, %v1328_v39 }
 0x168   : > { %v6293_v16 = vpop.f32.mrf.mxu0  ;;  %v1476_v3 = vpop.f32.mrf.mxu1 }
 0x169   : > { %v1329_v30 = vadd.f32 %v6293_v16, %v7712_v36  ;;  %v7846_v25 = vadd.f32 %v1460_v57, %v1326_v22  ;;  %v2372_v36 = vrot.slane %v7675_v27, 1 }
 0x16a   : > { %v7848_v48 = vpop.f32.mrf.mxu0  ;;  %v6331_v14 = vpop.f32.mrf.mxu1 }
 0x16b   : > { %v7850_v5 = vadd.f32 %v6327_v7, %v1329_v30 }
 0x16c   : > { %v6296_v10 = vpop.f32.mrf.mxu0  ;;  %6499 = vmatmul.mubr.msk.bf16.gmra.mxu0 %vm205_vm1, %v7517_v46  ;;  %v7854_v35 = vpop.f32.mrf.mxu1 }
 0x16d   : > { %v1332_v33 = vadd.f32 %v6296_v10, %v7721_v32  ;;  %6502 = vmatprep.mubr.msk.bf16.mxu0 %vm205_vm1, %v7587_v63  ;;  %v2374_v32 = vsel %vm1043_vm4, %v2372_v36, %v2373_v26 }
 0x16e   : > { %v1275_v44 = vpop.f32.mrf.mxu0  ;;  %v6334_v61 = vpop.f32.mrf.mxu1 }
 0x16f   : > { %v1330_v62 = vadd.f32 %v1275_v44, %v7726_v49  ;;  %v7862_v57 = vadd.f32 %v6330_v28, %v1332_v33 }
 0x170   : > { %v6297_v2 = vpop.f32.mrf.mxu0  ;;  %v1492_v7 = vpop.f32.mrf.mxu1 }
 0x171   : > { %v1333_v46 = vadd.f32 %v6297_v2, %v7728_v17  ;;  %v7865_v40 = vadd.f32 %v1476_v3, %v1330_v62 }
 0x172   : > { %v7868_v39 = vpop.f32.mrf.mxu0  ;;  %v6335_v63 = vpop.f32.mrf.mxu1 }
 0x173   : > { %v7870_v27 = vadd.f32 %v6331_v14, %v1333_v46 }
 0x174   : > { %v6300_v58 = vpop.f32.mrf.mxu0  ;;  %6503 = vmatmul.mubr.msk.bf16.gmra.mxu0 %vm205_vm1, %v2374_v32  ;;  %v7873_v13 = vpop.f32.mrf.mxu1 }
 0x175   : > { %v1336_v49 = vadd.f32 %v6300_v58, %v7736_v11 }
 0x176   : > { %v1291_v28 = vpop.f32.mrf.mxu0  ;;  %v6374_v22 = vpop.f32.mrf.mxu1 }
 0x177   : > { %v1334_v17 = vadd.f32 %v1291_v28, %v7740_v50  ;;  %v7877_v16 = vadd.f32 %v6334_v61, %v1336_v49 }
 0x178   : > { %v6301_v3 = vpop.f32.mrf.mxu0  ;;  %v1798_v30 = vpop.f32.mrf.mxu1 }
 0x179   : > { %v1337_v10 = vadd.f32 %v6301_v3, %v7742_v15  ;;  %v7880_v33 = vadd.f32 %v1492_v7, %v1334_v17 }
 0x17a   : > { %v7882_v14 = vpop.f32.mrf.mxu0  ;;  %v6375_v36 = vpop.f32.mrf.mxu1 }
 0x17b   : > { %v7884_v26 = vadd.f32 %v6335_v63, %v1337_v10 }
 0x17c   : > { %v6340_v44 = vpop.f32.mrf.mxu0  ;;  %v7886_v62 = vpop.f32.mrf.mxu1 }
 0x17d   : > { %v1721_v11 = vadd.f32 %v6340_v44, %v7754_v21 }
 0x17e   : > { %v1592_v2 = vpop.f32.mrf.mxu0  ;;  %v6378_v50 = vpop.f32.mrf.mxu1 }
 0x17f   : > { %v1719_v61 = vadd.f32 %v1592_v2, %v7757_v53  ;;  %v7890_v46 = vadd.f32 %v6374_v22, %v1721_v11 }
 0x180   : > { %v6341_v32 = vpop.f32.mrf.mxu0  ;;  %v7892_v15 = vpop.f32.mrf.mxu1 }
 0x181   : > { %v1722_v7 = vadd.f32 %v6341_v32, %v7762_v8  ;;  %v7895_v58 = vadd.f32 %v1798_v30, %v1719_v61 }
 0x182   : > { %v7897_v63 = vpop.f32.mrf.mxu0  ;;  %v6379_v49 = vpop.f32.mrf.mxu1 }
 0x183   : > { %v7899_v28 = vadd.f32 %v6375_v36, %v1722_v7 }
 0x184   : > { %v6344_v17 = vpop.f32.mrf.mxu0  ;;  %v7901_v21 = vpop.f32.mrf.mxu1 }
 0x185   : > { %10279 = vst [vmem:[#allocation40_spill] sm:$0xff] %v7901_v21  ;;  %v1725_v3 = vadd.f32 %v6344_v17, %v7772_v37 }
 0x186   : > { %v1608_v53 = vpop.f32.mrf.mxu0  ;;  %v6382_v22 = vpop.f32.mrf.mxu1 }
 0x187   : > { %v7905_v10 = vadd.f32 %v1608_v53, %v7775_v42  ;;  %v7907_v44 = vadd.f32 %v6378_v50, %v1725_v3 }
 0x188   : > { %v6345_v8 = vpop.f32.mrf.mxu0  ;;  %v7909_v30 = vpop.f32.mrf.mxu1 }
 0x189   : > { %10280 = vst [vmem:[#allocation41_spill] sm:$0xff] %v7909_v30  ;;  %v1726_v11 = vadd.f32 %v6345_v8, %v7780_v56 }
 0x18a   : > { %v7912_v2 = vpop.f32.mrf.mxu0  ;;  %v6383_v36 = vpop.f32.mrf.mxu1 }
 0x18b   : > { %v7914_v61 = vadd.f32 %v6379_v49, %v1726_v11 }
 0x18c   : > { %v6348_v32 = vpop.f32.mrf.mxu0  ;;  %v7916_v7 = vpop.f32.mrf.mxu1 }
 0x18d   : > { %10281 = vst [vmem:[#allocation42_spill] sm:$0xff] %v7916_v7  ;;  %v1729_v37 = vadd.f32 %v6348_v32, %v7790_v12 }
 0x18e   : > { %v1624_v17 = vpop.f32.mrf.mxu0  ;;  %v6386_v42 = vpop.f32.mrf.mxu1 }
 0x18f   : > { %v7920_v50 = vadd.f32 %v1624_v17, %v7793_v0  ;;  %v7922_v3 = vadd.f32 %v6382_v22, %v1729_v37 }
 0x190   : > { %v6349_v53 = vpop.f32.mrf.mxu0  ;;  %v7924_v30 = vpop.f32.mrf.mxu1 }
 0x191   : > { %10282 = vst [vmem:[#allocation43_spill] sm:$0xff] %v7920_v50  ;;  %10283 = vst [vmem:[#allocation44_spill] sm:$0xff] %v7924_v30  ;;  %v1730_v56 = vadd.f32 %v6349_v53, %v7798_v31 }
 0x192   : > { %v7927_v8 = vpop.f32.mrf.mxu0  ;;  %v6387_v49 = vpop.f32.mrf.mxu1 }
 0x193   : > { %v7929_v11 = vadd.f32 %v6383_v36, %v1730_v56 }
 0x194   : > { %v6352_v7 = vpop.f32.mrf.mxu0  ;;  %v7931_v21 = vpop.f32.mrf.mxu1 }
 0x195   : > { %10284 = vst [vmem:[#allocation45_spill] sm:$0xff] %v7931_v21  ;;  %v1733_v12 = vadd.f32 %v6352_v7, %v7808_v54 }
 0x196   : > { %v1640_v32 = vpop.f32.mrf.mxu0  ;;  %v6390_v0 = vpop.f32.mrf.mxu1 }
 0x197   : > { %v7935_v22 = vadd.f32 %v1640_v32, %v7811_v4  ;;  %v7937_v37 = vadd.f32 %v6386_v42, %v1733_v12 }
 0x198   : > { %v6353_v17 = vpop.f32.mrf.mxu0  ;;  %v7939_v30 = vpop.f32.mrf.mxu1 }
 0x199   : > { %10285 = vst [vmem:[#allocation46_spill] sm:$0xff] %v7935_v22  ;;  %10286 = vst [vmem:[#allocation47_spill] sm:$0xff] %v7939_v30  ;;  %v1734_v31 = vadd.f32 %v6353_v17, %v7816_v47 }
 0x19a   : > { %v7942_v53 = vpop.f32.mrf.mxu0  ;;  %v6391_v36 = vpop.f32.mrf.mxu1 }
 0x19b   : > { %v7944_v56 = vadd.f32 %v6387_v49, %v1734_v31 }
 0x19c   : > { %v6356_v21 = vpop.f32.mrf.mxu0  ;;  %v7946_v50 = vpop.f32.mrf.mxu1 }
 0x19d   : > { %10287 = vst [vmem:[#allocation48_spill] sm:$0xff] %v7946_v50  ;;  %v1737_v54 = vadd.f32 %v6356_v21, %v7826_v45 }
 0x19e   : > { %v1656_v7 = vpop.f32.mrf.mxu0  ;;  %v6394_v4 = vpop.f32.mrf.mxu1 }
 0x19f   : > { %v7950_v42 = vadd.f32 %v1656_v7, %v7829_v38  ;;  %v7952_v12 = vadd.f32 %v6390_v0, %v1737_v54 }
 0x1a0   : > { %v6357_v32 = vpop.f32.mrf.mxu0  ;;  %v7954_v30 = vpop.f32.mrf.mxu1 }
 0x1a1   : > { %10288 = vst [vmem:[#allocation49_spill] sm:$0xff] %v7950_v42  ;;  %10289 = vst [vmem:[#allocation50_spill] sm:$0xff] %v7954_v30  ;;  %v1738_v47 = vadd.f32 %v6357_v32, %v7833_v29 }
 0x1a2   : > { %v7957_v17 = vpop.f32.mrf.mxu0  ;;  %v6395_v49 = vpop.f32.mrf.mxu1 }
 0x1a3   : > { %v7959_v31 = vadd.f32 %v6391_v36, %v1738_v47 }
 0x1a4   : > { %v6360_v50 = vpop.f32.mrf.mxu0  ;;  %v7961_v22 = vpop.f32.mrf.mxu1 }
 0x1a5   : > { %10290 = vst [vmem:[#allocation51_spill] sm:$0xff] %v7961_v22  ;;  %v1741_v45 = vadd.f32 %v6360_v50, %v7843_v55 }
 0x1a6   : > { %v1672_v21 = vpop.f32.mrf.mxu0  ;;  %v6398_v38 = vpop.f32.mrf.mxu1 }
 0x1a7   : > { %v7965_v0 = vadd.f32 %v1672_v21, %v7846_v25  ;;  %v7967_v54 = vadd.f32 %v6394_v4, %v1741_v45 }
 0x1a8   : > { %v6361_v7 = vpop.f32.mrf.mxu0  ;;  %v7969_v30 = vpop.f32.mrf.mxu1 }
 0x1a9   : > { %10291 = vst [vmem:[#allocation52_spill] sm:$0xff] %v7965_v0  ;;  %10292 = vst [vmem:[#allocation53_spill] sm:$0xff] %v7969_v30  ;;  %v1742_v29 = vadd.f32 %v6361_v7, %v7850_v5 }
 0x1aa   : > { %v7972_v32 = vpop.f32.mrf.mxu0  ;;  %v6399_v36 = vpop.f32.mrf.mxu1 }
 0x1ab   : > { %10293 = vst [vmem:[#allocation54_spill] sm:$0xff] %v7972_v32  ;;  %v7974_v47 = vadd.f32 %v6395_v49, %v1742_v29 }
 0x1ac   : > { %v6364_v22 = vpop.f32.mrf.mxu0  ;;  %v7976_v42 = vpop.f32.mrf.mxu1 }
 0x1ad   : > { %10294 = vst [vmem:[#allocation55_spill] sm:$0xff] %v7976_v42  ;;  %v1745_v55 = vadd.f32 %v6364_v22, %v7862_v57 }
 0x1ae   : > { %v1688_v50 = vpop.f32.mrf.mxu0  ;;  %v6402_v25 = vpop.f32.mrf.mxu1 }
 0x1af   : > { %v7980_v4 = vadd.f32 %v1688_v50, %v7865_v40  ;;  %v7982_v45 = vadd.f32 %v6398_v38, %v1745_v55 }
 0x1b0   : > { %v6365_v21 = vpop.f32.mrf.mxu0  ;;  %v7984_v30 = vpop.f32.mrf.mxu1 }
 0x1b1   : > { %10295 = vst [vmem:[#allocation56_spill] sm:$0xff] %v7980_v4  ;;  %10296 = vst [vmem:[#allocation57_spill] sm:$0xff] %v7984_v30  ;;  %v1746_v5 = vadd.f32 %v6365_v21, %v7870_v27 }
 0x1b2   : > { %v7987_v7 = vpop.f32.mrf.mxu0  ;;  %v6403_v49 = vpop.f32.mrf.mxu1 }
 0x1b3   : > { %10297 = vst [vmem:[#allocation58_spill] sm:$0xff] %v7987_v7  ;;  %v7989_v29 = vadd.f32 %v6399_v36, %v1746_v5 }
 0x1b4   : > { %v6368_v42 = vpop.f32.mrf.mxu0  ;;  %v7992_v22 = vpop.f32.mrf.mxu1 }
 0x1b5   : > { %v1749_v57 = vadd.f32 %v6368_v42, %v7877_v16  ;;  %10298 = vst [vmem:[#allocation59_spill] sm:$0xff] %v7992_v22 }
 0x1b6   : > { %v1704_v32 = vpop.f32.mrf.mxu0  ;;  %v8000_v27 = vpop.f32.mrf.mxu1 }
 0x1b7   : > { %v7995_v40 = vadd.f32 %v1704_v32, %v7880_v33  ;;  %v7997_v38 = vadd.f32 %v6402_v25, %v1749_v57 }
 0x1b8   : > { %v6369_v55 = vpop.f32.mrf.mxu0  ;;  %v8009_v42 = vpop.f32.mrf.mxu1 }
 0x1b9   : > { %10299 = vst [vmem:[#allocation60_spill] sm:$0xff] %v7995_v40  ;;  %v1750_v50 = vadd.f32 %v6369_v55, %v7884_v26 }
 0x1ba   : > { %v8002_v21 = vpop.f32.mrf.mxu0  ;;  %v8017_v26 = vpop.f32.mrf.mxu1 }
 0x1bb   : > { %10300 = vst [vmem:[#allocation61_spill] sm:$0xff] %v8002_v21  ;;  %v8004_v36 = vadd.f32 %v6403_v49, %v1750_v50 }
 0x1bc   : > { %v6408_v5 = vpop.f32.mrf.mxu0 }
 0x1bd   : > { %v8007_v16 = vadd.f32 %v6408_v5, %v7890_v46  ;;  %v8024_v46 = vpop.f32.mrf.mxu1 }
 0x1be   : > { %v1999_v22 = vpop.f32.mrf.mxu0 }
 0x1bf   : > { %v8012_v33 = vadd.f32 %v1999_v22, %v7895_v58  ;;  %v8028_v21 = vpop.f32.mrf.mxu1 }
 0x1c0   : > { %v6409_v32 = vpop.f32.mrf.mxu0 }
 0x1c1   : > { %v8015_v25 = vadd.f32 %v6409_v32, %v7899_v28  ;;  %v8035_v32 = vpop.f32.mrf.mxu1 }
 0x1c2   : > { %v8019_v57 = vpop.f32.mrf.mxu0 }
 0x1c3   : > { %v8042_v40 = vpop.f32.mrf.mxu1 }
 0x1c4   : > { %v6412_v49 = vpop.f32.mrf.mxu0 }
 0x1c5   : > { %v8022_v55 = vadd.f32 %v6412_v49, %v7907_v44 }
 0x1c6   : > { %v8026_v50 = vpop.f32.mrf.mxu0 }
 0x1c8   : > { %v6413_v5 = vpop.f32.mrf.mxu0 }
 0x1c9   : > { %v8031_v58 = vadd.f32 %v6413_v5, %v7914_v61  ;;  %v8049_v5 = vpop.f32.mrf.mxu1 }
 0x1ca   : > { %v8033_v28 = vpop.f32.mrf.mxu0 }
 0x1cb   : > { %10301 = vst [vmem:[#allocation62_spill] sm:$0xff] %v8031_v58 }
 0x1cc   : > { %v6416_v22 = vpop.f32.mrf.mxu0 }
 0x1cd   : > { %v8038_v30 = vadd.f32 %v6416_v22, %v7922_v3  ;;  %v8056_v22 = vpop.f32.mrf.mxu1 }
 0x1ce   : > { %v8040_v44 = vpop.f32.mrf.mxu0 }
 0x1cf   : > { %10302 = vst [vmem:[#allocation63_spill] sm:$0xff] %v8038_v30  ;;  %10303 = vst [vmem:[#allocation64_spill] sm:$0xff] %v8040_v44 }
 0x1d0   : > { %v6417_v49 = vpop.f32.mrf.mxu0 }
 0x1d1   : > { %v8045_v4 = vadd.f32 %v6417_v49, %v7929_v11  ;;  %v8063_v49 = vpop.f32.mrf.mxu1 }
 0x1d2   : > { %v8047_v7 = vpop.f32.mrf.mxu0 }
 0x1d3   : > { %10304 = vst [vmem:[#allocation65_spill] sm:$0xff] %v8045_v4  ;;  %10305 = vst [vmem:[#allocation66_spill] sm:$0xff] %v8047_v7 }
 0x1d4   : > { %v6420_v61 = vpop.f32.mrf.mxu0 }
 0x1d5   : > { %v8052_v0 = vadd.f32 %v6420_v61, %v7937_v37  ;;  %v8070_v61 = vpop.f32.mrf.mxu1 }
 0x1d6   : > { %v8054_v58 = vpop.f32.mrf.mxu0 }
 0x1d7   : > { %10306 = vst [vmem:[#allocation67_spill] sm:$0xff] %v8052_v0  ;;  %10307 = vst [vmem:[#allocation68_spill] sm:$0xff] %v8054_v58 }
 0x1d8   : > { %v6421_v3 = vpop.f32.mrf.mxu0 }
 0x1d9   : > { %v8059_v30 = vadd.f32 %v6421_v3, %v7944_v56  ;;  %v8077_v3 = vpop.f32.mrf.mxu1 }
 0x1da   : > { %v8061_v44 = vpop.f32.mrf.mxu0 }
 0x1db   : > { %10308 = vst [vmem:[#allocation69_spill] sm:$0xff] %v8059_v30  ;;  %10309 = vst [vmem:[#allocation70_spill] sm:$0xff] %v8061_v44 }
 0x1dc   : > { %v6424_v11 = vpop.f32.mrf.mxu0 }
 0x1dd   : > { %v8066_v4 = vadd.f32 %v6424_v11, %v7952_v12  ;;  %v8084_v11 = vpop.f32.mrf.mxu1 }
 0x1de   : > { %v8068_v7 = vpop.f32.mrf.mxu0 }
 0x1df   : > { %10310 = vst [vmem:[#allocation71_spill] sm:$0xff] %v8066_v4  ;;  %10311 = vst [vmem:[#allocation72_spill] sm:$0xff] %v8068_v7 }
 0x1e0   : > { %v6425_v37 = vpop.f32.mrf.mxu0 }
 0x1e1   : > { %v8073_v0 = vadd.f32 %v6425_v37, %v7959_v31  ;;  %v8091_v37 = vpop.f32.mrf.mxu1 }
 0x1e2   : > { %v8075_v58 = vpop.f32.mrf.mxu0 }
 0x1e3   : > { %10312 = vst [vmem:[#allocation73_spill] sm:$0xff] %v8073_v0  ;;  %10313 = vst [vmem:[#allocation74_spill] sm:$0xff] %v8075_v58 }
 0x1e4   : > { %v6428_v56 = vpop.f32.mrf.mxu0 }
 0x1e5   : > { %v8080_v30 = vadd.f32 %v6428_v56, %v7967_v54  ;;  %v8098_v56 = vpop.f32.mrf.mxu1 }
 0x1e6   : > { %v8082_v44 = vpop.f32.mrf.mxu0 }
 0x1e7   : > { %10314 = vst [vmem:[#allocation75_spill] sm:$0xff] %v8080_v30  ;;  %10315 = vst [vmem:[#allocation76_spill] sm:$0xff] %v8082_v44 }
 0x1e8   : > { %v6429_v12 = vpop.f32.mrf.mxu0 }
 0x1e9   : > { %v8087_v4 = vadd.f32 %v6429_v12, %v7974_v47  ;;  %v1508_v12 = vadd.f32 %v7746_v9, %v7760_v24  ;;  %v968_v9 = vadd.f32 %v7696_v60, %v7714_v43  ;;  %v10324_v24 = vld [vmem:[#allocation37_spill] sm:$0xff]  ;;  %v1520_v60 = vadd.f32 %v7802_v20, %v7814_v41 }
 0x1ea   : > { %v8089_v7 = vpop.f32.mrf.mxu0 }
 0x1eb   : > { %10316 = vst [vmem:[#allocation77_spill] sm:$0xff] %v8087_v4  ;;  %10317 = vst [vmem:[#allocation78_spill] sm:$0xff] %v8089_v7  ;;  %v8107_v4 = vpop.f32.mrf.mxu1  ;;  %v1327_v43 = vadd.f32 %v7848_v48, %v968_v9  ;;  %v1732_v41 = vadd.f32 %v7942_v53, %v1520_v60  ;;  %v10328_v53 = vld [vmem:[#allocation40_spill] sm:$0xff]  ;;  %v10334_v9 = vld [vmem:[#allocation45_spill] sm:$0xff] }
 0x1ec   : > { %v6432_v31 = vpop.f32.mrf.mxu0 }
 0x1ed   : > { %v8094_v0 = vadd.f32 %v6432_v31, %v7982_v45  ;;  %v1720_v31 = vadd.f32 %v7897_v63, %v1508_v12  ;;  %v1512_v63 = vadd.f32 %v7766_v52, %v7778_v6  ;;  %v2338_v52 = vadd.f32 %v8009_v42, %v8012_v33  ;;  %v10329_v33 = vld [vmem:[#allocation43_spill] sm:$0xff] }
 0x1ee   : > { %v8096_v58 = vpop.f32.mrf.mxu0 }
 0x1ef   : > { %10318 = vst [vmem:[#allocation79_spill] sm:$0xff] %v8094_v0  ;;  %10319 = vst [vmem:[#allocation80_spill] sm:$0xff] %v8096_v58  ;;  %v1724_v12 = vadd.f32 %v7912_v2, %v1512_v63  ;;  %v2344_v63 = vadd.f32 %v8028_v21, %v8022_v55 }
 0x1f0   : > { %v6433_v54 = vpop.f32.mrf.mxu0 }
 0x1f1   : > { %v8101_v30 = vadd.f32 %v6433_v54, %v7989_v29  ;;  %v952_v29 = vadd.f32 %v7673_v23, %v7694_v59  ;;  %v8117_v54 = vpop.f32.mrf.mxu1  ;;  %v1516_v23 = vadd.f32 %v7784_v34, %v7796_v51  ;;  %v1929_v51 = vadd.f32 %v7892_v15, %v7905_v10 }
 0x1f2   : > { %v8103_v44 = vpop.f32.mrf.mxu0  ;;  %v1930_v42 = vadd.f32 %v10328_v53, %v1724_v12 }
 0x1f3   : > { %10320 = vst [vmem:[#allocation81_spill] sm:$0xff] %v8101_v30  ;;  %10321 = vst [vmem:[#allocation82_spill] sm:$0xff] %v8103_v44  ;;  %v10325_v44 = vld [vmem:[#allocation36_spill] sm:$0xff]  ;;  %v1323_v59 = vadd.f32 %v7831_v19, %v952_v29  ;;  %v8145_v34 = vpop.f32.mrf.mxu1  ;;  %v1728_v20 = vadd.f32 %v7927_v8, %v1516_v23  ;;  %v2130_v10 = vadd.f32 %v8026_v50, %v1929_v51 }
 0x1f4   : > { %v6436_v47 = vpop.f32.mrf.mxu0  ;;  %v10333_v29 = vld [vmem:[#allocation44_spill] sm:$0xff] }
 0x1f5   : > { %v8110_v7 = vadd.f32 %v6436_v47, %v7997_v38  ;;  %v984_v38 = vadd.f32 %v10325_v44, %v10324_v24  ;;  %v10326_v47 = vld [vmem:[#allocation39_spill] sm:$0xff]  ;;  %v1524_v48 = vadd.f32 %v7820_v18, %v1323_v59  ;;  %v2341_v18 = vadd.f32 %v8017_v26, %v8015_v25 }
 0x1f6   : > { %v8112_v45 = vpop.f32.mrf.mxu0  ;;  %v8182_v24 = vadd.f32 %v10334_v9, %v1732_v41  ;;  %v2342_v23 = vadd.f32 %v8035_v32, %v2130_v10  ;;  %v2131_v59 = vadd.f32 %v8033_v28, %v1930_v42 }
 0x1f7   : > { %10322 = vst [vmem:[#allocation83_spill] sm:$0xff] %v8110_v7  ;;  %10323 = vst [vmem:[#allocation84_spill] sm:$0xff] %v8112_v45  ;;  %v10327_v7 = vld [vmem:[#allocation38_spill] sm:$0xff]  ;;  %v1736_v25 = vadd.f32 %v7957_v17, %v1524_v48  ;;  %v5738_v17 = vld [vmem:[%s10209_s2 + $0x2] sm:$0x3] }
 0x1f8   : > { %v6437_v0 = vpop.f32.mrf.mxu0  ;;  %v1000_v45 = vadd.f32 %v10327_v7, %v10326_v47  ;;  %6821 = vmatprep.subr.msk.bf16.mxu1 %vm650_vm0, %v5738_v17  ;;  %v2343_v48 = vadd.f32 %v8049_v5, %v2131_v59 }
 0x1f9   : > { %v8120_v30 = vadd.f32 %v6437_v0, %v8004_v36  ;;  %v1926_v0 = vadd.f32 %v7886_v62, %v1720_v31  ;;  %v1331_v36 = vadd.f32 %v7868_v39, %v984_v38  ;;  %v2340_v39 = vadd.f32 %v8000_v27, %v8007_v16  ;;  %v8170_v16 = vpop.f32.mrf.mxu1  ;;  %v10332_v31 = vld [vmem:[#allocation46_spill] sm:$0xff] }
 0x1fa   : > { %v8128_v58 = vpop.f32.mrf.mxu0  ;;  %v1335_v7 = vadd.f32 %v7882_v14, %v1000_v45  ;;  %v8157_v62 = vadd.f32 %v7837_v1, %v1327_v43  ;;  %v10331_v45 = vld [vmem:[#allocation42_spill] sm:$0xff]  ;;  %v8179_v50 = vadd.f32 %v10333_v29, %v10332_v31  ;;  %v10337_v31 = vld [vmem:[#allocation49_spill] sm:$0xff]  ;;  %v10338_v29 = vld [vmem:[#allocation47_spill] sm:$0xff] }
 0x1fb   : > { %v2127_v6 = vadd.f32 %v8019_v57, %v1926_v0  ;;  %v8160_v2 = vadd.f32 %v7854_v35, %v1331_v36  ;;  %v10330_v35 = vld [vmem:[#allocation41_spill] sm:$0xff]  ;;  %v10335_v0 = vld [vmem:[#allocation62_spill] sm:$0xff]  ;;  %v3050_v36 = vld [vmem:[%s10209_s2] sm:$0x3]  ;;  %v8238_v5 = vadd.f32 %v10338_v29, %v10337_v31 }
 0x1fc   : > { %v6476_v44 = vpop.f32.mrf.mxu0  ;;  %v8163_v15 = vadd.f32 %v7873_v13, %v1335_v7  ;;  %v1933_v57 = vadd.f32 %v10330_v35, %v10329_v33  ;;  %v1934_v13 = vadd.f32 %v10331_v45, %v1728_v20  ;;  %v2345_v60 = vadd.f32 %v8042_v40, %v10335_v0  ;;  %v8203_v7 = vpop.f32.mrf.mxu1  ;;  %6822 = vmatprep.subr.msk.bf16.mxu0 %vm650_vm0, %v3050_v36 }
 0x1fd   : > { %v2339_v27 = vadd.f32 %v8024_v46, %v2127_v6  ;;  %v8172_v1 = vadd.f32 %v6476_v44, %v2340_v39  ;;  %v3490_v6 = vsel %vm650_vm0, %v3050_v36, 0  ;;  %v10336_v39 = vld [vmem:[#allocation64_spill] sm:$0xff]  ;;  %v10340_v36 = vld [vmem:[#allocation66_spill] sm:$0xff] }
 0x1fe   : > { %v2417_v19 = vpop.f32.mrf.mxu0  ;;  %6541 = vmatpush3.bf16.msra.mxu0 %v3490_v6  ;;  %v2134_v10 = vadd.f32 %v10336_v39, %v1933_v57  ;;  %v10339_v57 = vld [vmem:[#allocation48_spill] sm:$0xff] }
 0x1ff   : > { %v8154_v14 = vadd.f32 %v2417_v19, %v2338_v52  ;;  %v2649_v21 = vmul.f32 %v8172_v1, %v8172_v1  ;;  %v2579_v32 = vsel %vm205_vm1, %v8172_v1, 0.0  ;;  %v3294_v52 = vsel %vm650_vm0, %v5738_v17, 0 }
 0x200   : > { %v6477_v8 = vpop.f32.mrf.mxu0  ;;  %6507 = vmatpush3.bf16.msra.mxu1 %v3294_v52  ;;  %v8241_v9 = vadd.f32 %v10339_v57, %v1736_v25  ;;  %v2346_v17 = vadd.f32 %v8063_v49, %v2134_v10  ;;  %v10341_v52 = vld [vmem:[#allocation63_spill] sm:$0xff] }
 0x201   : > { %v2647_v26 = vmul.f32 %v8154_v14, %v8154_v14  ;;  %v8187_v46 = vadd.f32 %v6477_v8, %v2341_v18  ;;  %v2576_v55 = vsel %vm205_vm1, %v8154_v14, 0.0  ;;  %v8227_v18 = vpop.f32.mrf.mxu1  ;;  %v2348_v49 = vadd.f32 %v8056_v22, %v10341_v52  ;;  %v10343_v22 = vld [vmem:[#allocation68_spill] sm:$0xff] }
 0x202   : > { %v2420_v38 = vpop.f32.mrf.mxu0 }
 0x203   : > { %v8189_v47 = vadd.f32 %v2420_v38, %v2339_v27  ;;  %v2679_v51 = vsel %vm205_vm1, %v2647_v26, 0.0  ;;  %v2650_v20 = vmul.f32 %v8187_v46, %v8187_v46  ;;  %v2682_v27 = vsel %vm205_vm1, %v2649_v21, 0.0 }
 0x204   : > { %v6480_v43 = vpop.f32.mrf.mxu0  ;;  %v2581_v33 = vsel %vm205_vm1, %v8187_v46, 0.0  ;;  %v2135_v21 = vadd.f32 %v10340_v36, %v1934_v13  ;;  %v10342_v13 = vld [vmem:[#allocation65_spill] sm:$0xff] }
 0x205   : > { %v2577_v40 = vsel %vm205_vm1, %v8189_v47, 0.0  ;;  %v2648_v28 = vmul.f32 %v8189_v47, %v8189_v47  ;;  %v8232_v35 = vadd.f32 %v6480_v43, %v2344_v63  ;;  %v2684_v59 = vsel %vm205_vm1, %v2650_v20, 0.0 }
 0x206   : > { %v2578_v44 = vadd.f32 %v2577_v40, %v2576_v55  ;;  %v2433_v12 = vpop.f32.mrf.mxu0  ;;  %v2349_v6 = vadd.f32 %v8070_v61, %v10342_v13 }
 0x207   : > { %v2680_v41 = vsel %vm205_vm1, %v2648_v28, 0.0  ;;  %v8223_v19 = vadd.f32 %v2433_v12, %v2342_v23  ;;  %v8252_v28 = vpop.f32.mrf.mxu1 }
 0x208   : > { %v2580_v8 = vadd.f32 %v2579_v32, %v2578_v44  ;;  %v2681_v53 = vadd.f32 %v2680_v41, %v2679_v51  ;;  %v6481_v42 = vpop.f32.mrf.mxu0  ;;  %v2653_v32 = vmul.f32 %v8232_v35, %v8232_v35 }
 0x209   : > { %v2651_v45 = vmul.f32 %v8223_v19, %v8223_v19  ;;  %v2583_v0 = vsel %vm205_vm1, %v8223_v19, 0.0  ;;  %v8246_v63 = vadd.f32 %v6481_v42, %v2345_v60  ;;  %v2138_v42 = vadd.f32 %v10343_v22, %v8179_v50  ;;  %v10346_v50 = vld [vmem:[#allocation54_spill] sm:$0xff]  ;;  %v8316_v22 = vld [vmem:[%s10209_s2 + $0x4] sm:$0x3] }
 0x20a   : > { %v2683_v38 = vadd.f32 %v2682_v27, %v2681_v53  ;;  %v2582_v26 = vadd.f32 %v2581_v33, %v2580_v8  ;;  %v2436_v23 = vpop.f32.mrf.mxu0  ;;  %v2347_v53 = vadd.f32 %v8077_v3, %v2135_v21  ;;  %v2690_v31 = vsel %vm205_vm1, %v2653_v32, 0.0  ;;  %v10345_v3 = vld [vmem:[#allocation50_spill] sm:$0xff]  ;;  %6823 = vmatprep.subr.msk.bf16.mxu1 %vm650_vm0, %v8316_v22 }
 0x20b   : > { %v8248_v43 = vadd.f32 %v2436_v23, %v2343_v48  ;;  %v2686_v44 = vsel %vm205_vm1, %v2651_v45, 0.0  ;;  %v2587_v48 = vsel %vm205_vm1, %v8232_v35, 0.0  ;;  %v2654_v39 = vmul.f32 %v8246_v63, %v8246_v63  ;;  %v8275_v45 = vpop.f32.mrf.mxu1 }
 0x20c   : > { %v2584_v55 = vadd.f32 %v2583_v0, %v2582_v26  ;;  %v2685_v40 = vadd.f32 %v2684_v59, %v2683_v38  ;;  %v6484_v25 = vpop.f32.mrf.mxu0  ;;  %v2589_v29 = vsel %vm205_vm1, %v8246_v63, 0.0  ;;  %v10344_v26 = vld [vmem:[#allocation52_spill] sm:$0xff]  ;;  %v1740_v59 = vadd.f32 %v10346_v50, %v8157_v62 }
 0x20d   : > { %v2585_v60 = vsel %vm205_vm1, %v8248_v43, 0.0  ;;  %v2652_v12 = vmul.f32 %v8248_v43, %v8248_v43  ;;  %v8280_v57 = vadd.f32 %v6484_v25, %v2348_v49  ;;  %v8286_v23 = vadd.f32 %v10345_v3, %v10344_v26  ;;  %v8300_v49 = vpop.f32.mrf.mxu1 }
 0x20e   : > { %v2687_v51 = vadd.f32 %v2686_v44, %v2685_v40  ;;  %v2586_v20 = vadd.f32 %v2585_v60, %v2584_v55  ;;  %v2449_v41 = vpop.f32.mrf.mxu0  ;;  %v2692_v21 = vsel %vm205_vm1, %v2654_v39, 0.0  ;;  %v2350_v32 = vadd.f32 %v8091_v37, %v2138_v42  ;;  %v10347_v44 = vld [vmem:[#allocation70_spill] sm:$0xff]  ;;  %v10348_v37 = vld [vmem:[#allocation67_spill] sm:$0xff] }
 0x20f   : > { %v2688_v10 = vsel %vm205_vm1, %v2652_v12, 0.0  ;;  %v8270_v8 = vadd.f32 %v2449_v41, %v2346_v17  ;;  %v2139_v60 = vadd.f32 %v10347_v44, %v8182_v24  ;;  %v2657_v13 = vmul.f32 %v8280_v57, %v8280_v57  ;;  %v10349_v24 = vld [vmem:[#allocation69_spill] sm:$0xff]  ;;  %v8330_v3 = vpop.f32.mrf.mxu1 }
 0x210   : > { %v2588_v27 = vadd.f32 %v2587_v48, %v2586_v20  ;;  %v2689_v61 = vadd.f32 %v2688_v10, %v2687_v51  ;;  %v6485_v33 = vpop.f32.mrf.mxu0  ;;  %v2352_v41 = vadd.f32 %v8084_v11, %v10348_v37  ;;  %v2353_v48 = vadd.f32 %v8098_v56, %v10349_v24 }
 0x211   : > { %v2655_v38 = vmul.f32 %v8270_v8, %v8270_v8  ;;  %v2591_v55 = vsel %vm205_vm1, %v8270_v8, 0.0  ;;  %v8293_v40 = vadd.f32 %v6485_v33, %v2349_v6  ;;  %v2595_v42 = vsel %vm205_vm1, %v8280_v57, 0.0  ;;  %v10350_v33 = vld [vmem:[#allocation72_spill] sm:$0xff] }
 0x212   : > { %v2691_v0 = vadd.f32 %v2690_v31, %v2689_v61  ;;  %v2590_v17 = vadd.f32 %v2589_v29, %v2588_v27  ;;  %v2452_v36 = vpop.f32.mrf.mxu0  ;;  %v2351_v56 = vadd.f32 %v8107_v4, %v2139_v60  ;;  %v2142_v31 = vadd.f32 %v10350_v33, %v8238_v5 }
 0x213   : > { %v8295_v25 = vadd.f32 %v2452_v36, %v2347_v53  ;;  %v2694_v51 = vsel %vm205_vm1, %v2655_v38, 0.0  ;;  %v2658_v27 = vmul.f32 %v8293_v40, %v8293_v40  ;;  %v2698_v50 = vsel %vm205_vm1, %v2657_v13, 0.0 }
 0x214   : > { %v2592_v12 = vadd.f32 %v2591_v55, %v2590_v17  ;;  %v2693_v52 = vadd.f32 %v2692_v21, %v2691_v0  ;;  %v6488_v62 = vpop.f32.mrf.mxu0  ;;  %v2597_v0 = vsel %vm205_vm1, %v8293_v40, 0.0  ;;  %v10351_v21 = vld [vmem:[#allocation51_spill] sm:$0xff]  ;;  %v10352_v55 = vld [vmem:[#allocation58_spill] sm:$0xff] }
 0x215   : > { %v2593_v6 = vsel %vm205_vm1, %v8295_v25, 0.0  ;;  %v2656_v20 = vmul.f32 %v8295_v25, %v8295_v25  ;;  %v8335_v17 = vadd.f32 %v6488_v62, %v2352_v41  ;;  %v1946_v4 = vadd.f32 %v10351_v21, %v1740_v59  ;;  %v8352_v41 = vpop.f32.mrf.mxu1 }
 0x216   : > { %v2695_v39 = vadd.f32 %v2694_v51, %v2693_v52  ;;  %v2594_v10 = vadd.f32 %v2593_v6, %v2592_v12  ;;  %v2465_v53 = vpop.f32.mrf.mxu0  ;;  %v1744_v5 = vadd.f32 %v10352_v55, %v8160_v2  ;;  %v2700_v12 = vsel %vm205_vm1, %v2658_v27, 0.0  ;;  %v10353_v6 = vld [vmem:[#allocation74_spill] sm:$0xff] }
 0x217   : > { %v2696_v61 = vsel %vm205_vm1, %v2656_v20, 0.0  ;;  %v8323_v11 = vadd.f32 %v2465_v53, %v2350_v32  ;;  %v2354_v51 = vadd.f32 %v8145_v34, %v2142_v31  ;;  %v2143_v59 = vadd.f32 %v10353_v6, %v8241_v9  ;;  %v10354_v34 = vld [vmem:[#allocation71_spill] sm:$0xff]  ;;  %v10355_v9 = vld [vmem:[#allocation73_spill] sm:$0xff]  ;;  %v8375_v21 = vpop.f32.mrf.mxu1 }
 0x218   : > { %v2596_v29 = vadd.f32 %v2595_v42, %v2594_v10  ;;  %v2697_v38 = vadd.f32 %v2696_v61, %v2695_v39  ;;  %v6489_v26 = vpop.f32.mrf.mxu0  ;;  %v2661_v24 = vmul.f32 %v8335_v17, %v8335_v17  ;;  %v2356_v53 = vadd.f32 %v8117_v54, %v10354_v34  ;;  %v10356_v54 = vld [vmem:[#allocation76_spill] sm:$0xff] }
 0x219   : > { %v2659_v36 = vmul.f32 %v8323_v11, %v8323_v11  ;;  %v2599_v52 = vsel %vm205_vm1, %v8323_v11, 0.0  ;;  %v8345_v13 = vadd.f32 %v6489_v26, %v2353_v48  ;;  %v2357_v42 = vadd.f32 %v8170_v16, %v10355_v9 }
 0x21a   : > { %v2699_v32 = vadd.f32 %v2698_v50, %v2697_v38  ;;  %v2598_v44 = vadd.f32 %v2597_v0, %v2596_v29  ;;  %v2468_v60 = vpop.f32.mrf.mxu0  ;;  %v2603_v33 = vsel %vm205_vm1, %v8335_v17, 0.0  ;;  %v2355_v26 = vadd.f32 %v8203_v7, %v2143_v59  ;;  %v10358_v7 = vld [vmem:[#allocation53_spill] sm:$0xff] }
 0x21b   : > { %v8347_v62 = vadd.f32 %v2468_v60, %v2351_v56  ;;  %v2702_v39 = vsel %vm205_vm1, %v2659_v36, 0.0  ;;  %v2662_v31 = vmul.f32 %v8345_v13, %v8345_v13  ;;  %v2146_v50 = vadd.f32 %v10356_v54, %v8286_v23 }
 0x21c   : > { %v2600_v20 = vadd.f32 %v2599_v52, %v2598_v44  ;;  %v2701_v37 = vadd.f32 %v2700_v12, %v2699_v32  ;;  %v6492_v2 = vpop.f32.mrf.mxu0  ;;  %v2706_v55 = vsel %vm205_vm1, %v2661_v24, 0.0  ;;  %v2605_v32 = vsel %vm205_vm1, %v8345_v13, 0.0  ;;  %v10357_v12 = vld [vmem:[#allocation56_spill] sm:$0xff] }
 0x21d   : > { %v2601_v48 = vsel %vm205_vm1, %v8347_v62, 0.0  ;;  %v2660_v10 = vmul.f32 %v8347_v62, %v8347_v62  ;;  %v8380_v44 = vadd.f32 %v6492_v2, %v2356_v53  ;;  %v1949_v52 = vadd.f32 %v10358_v7, %v10357_v12 }
 0x21e   : > { %v2703_v27 = vadd.f32 %v2702_v39, %v2701_v37  ;;  %v2602_v61 = vadd.f32 %v2601_v48, %v2600_v20  ;;  %v2481_v56 = vpop.f32.mrf.mxu0  ;;  %v2708_v37 = vsel %vm205_vm1, %v2662_v31, 0.0  ;;  %v2358_v48 = vadd.f32 %v8252_v28, %v2146_v50  ;;  %v10361_v31 = vld [vmem:[#allocation75_spill] sm:$0xff] }
 0x21f   : > { %v2704_v29 = vsel %vm205_vm1, %v2660_v10, 0.0  ;;  %v8370_v38 = vadd.f32 %v2481_v56, %v2354_v51  ;;  %v10359_v51 = vld [vmem:[#allocation55_spill] sm:$0xff]  ;;  %v10360_v10 = vld [vmem:[#allocation78_spill] sm:$0xff]  ;;  %v2360_v28 = vadd.f32 %v8227_v18, %v10361_v31 }
 0x220   : > { %v2604_v0 = vadd.f32 %v2603_v33, %v2602_v61  ;;  %v2705_v16 = vadd.f32 %v2704_v29, %v2703_v27  ;;  %v6493_v36 = vpop.f32.mrf.mxu0  ;;  %v1950_v23 = vadd.f32 %v10359_v51, %v1744_v5  ;;  %v2147_v34 = vadd.f32 %v10360_v10, %v1946_v4  ;;  %v2310_v5 = vpop.f32.mrf.mxu1  ;;  %v10362_v29 = vld [vmem:[#allocation77_spill] sm:$0xff]  ;;  %v10367_v31 = vld [vmem:[#allocation82_spill] sm:$0xff] }
 0x221   : > { %v2663_v60 = vmul.f32 %v8370_v38, %v8370_v38  ;;  %v2607_v24 = vsel %vm205_vm1, %v8370_v38, 0.0  ;;  %v8390_v39 = vadd.f32 %v6493_v36, %v2357_v42  ;;  %v2665_v61 = vmul.f32 %v8380_v44, %v8380_v44 }
 0x222   : > { %v2707_v6 = vadd.f32 %v2706_v55, %v2705_v16  ;;  %v2606_v59 = vadd.f32 %v2605_v32, %v2604_v0  ;;  %v2484_v20 = vpop.f32.mrf.mxu0  ;;  %v2361_v4 = vadd.f32 %v8275_v45, %v10362_v29  ;;  %v2611_v0 = vsel %vm205_vm1, %v8380_v44, 0.0  ;;  %v6470_v51 = vpop.f32.mrf.mxu1 }
 0x223   : > { %v8392_v2 = vadd.f32 %v2484_v20, %v2355_v26  ;;  %v2710_v56 = vsel %vm205_vm1, %v2663_v60, 0.0  ;;  %v2666_v16 = vmul.f32 %v8390_v39, %v8390_v39  ;;  %v2359_v32 = vadd.f32 %v8300_v49, %v2147_v34  ;;  %v10363_v60 = vld [vmem:[#allocation80_spill] sm:$0xff]  ;;  %v10366_v49 = vld [vmem:[#allocation61_spill] sm:$0xff] }
 0x224   : > { %v2608_v53 = vadd.f32 %v2607_v24, %v2606_v59  ;;  %v2709_v9 = vadd.f32 %v2708_v37, %v2707_v6  ;;  %v6496_v27 = vpop.f32.mrf.mxu0  ;;  %v2150_v18 = vadd.f32 %v10363_v60, %v1949_v52  ;;  %v2714_v6 = vsel %vm205_vm1, %v2665_v61, 0.0  ;;  %v10364_v24 = vld [vmem:[#allocation60_spill] sm:$0xff] }
 0x225   : > { %v2609_v33 = vsel %vm205_vm1, %v8392_v2, 0.0  ;;  %v2664_v42 = vmul.f32 %v8392_v2, %v8392_v2  ;;  %v2613_v59 = vsel %vm205_vm1, %v8390_v39, 0.0  ;;  %v8419_v20 = vadd.f32 %v6496_v27, %v2360_v28 }
 0x226   : > { %v2711_v26 = vadd.f32 %v2710_v56, %v2709_v9  ;;  %v2610_v54 = vadd.f32 %v2609_v33, %v2608_v53  ;;  %v2497_v50 = vpop.f32.mrf.mxu0  ;;  %v1748_v52 = vadd.f32 %v10366_v49, %v8163_v15  ;;  %v2716_v56 = vsel %vm205_vm1, %v2666_v16, 0.0  ;;  %v2323_v15 = vpop.f32.mrf.mxu1 }
 0x227   : > { %v2712_v36 = vsel %vm205_vm1, %v2664_v42, 0.0  ;;  %v8412_v55 = vadd.f32 %v2497_v50, %v2358_v48  ;;  %v10365_v48 = vld [vmem:[#allocation57_spill] sm:$0xff]  ;;  %v2362_v42 = vadd.f32 %v8352_v41, %v2150_v18  ;;  %v2151_v28 = vadd.f32 %v10367_v31, %v1950_v23  ;;  %v10371_v31 = vld [vmem:[#allocation59_spill] sm:$0xff] }
 0x228   : > { %v2612_v12 = vadd.f32 %v2611_v0, %v2610_v54  ;;  %v2713_v7 = vadd.f32 %v2712_v36, %v2711_v26  ;;  %v6497_v45 = vpop.f32.mrf.mxu0  ;;  %v1953_v10 = vadd.f32 %v10365_v48, %v10364_v24  ;;  %v2669_v50 = vmul.f32 %v8419_v20, %v8419_v20  ;;  %v10368_v36 = vld [vmem:[#allocation79_spill] sm:$0xff]  ;;  %v10370_v24 = vld [vmem:[#allocation84_spill] sm:$0xff] }
 0x229   : > { %v2667_v37 = vmul.f32 %v8412_v55, %v8412_v55  ;;  %v2615_v61 = vsel %vm205_vm1, %v8412_v55, 0.0  ;;  %v8430_v33 = vadd.f32 %v6497_v45, %v2361_v4  ;;  %v2364_v41 = vadd.f32 %v8330_v3, %v10368_v36 }
 0x22a   : > { %v2715_v34 = vadd.f32 %v2714_v6, %v2713_v7  ;;  %v2614_v53 = vadd.f32 %v2613_v59, %v2612_v12  ;;  %v2500_v9 = vpop.f32.mrf.mxu0  ;;  %v2619_v7 = vsel %vm205_vm1, %v8419_v20, 0.0  ;;  %v2154_v48 = vadd.f32 %v10370_v24, %v1953_v10 }
 0x22b   : > { %v8432_v27 = vadd.f32 %v2500_v9, %v2359_v32  ;;  %v2718_v0 = vsel %vm205_vm1, %v2667_v37, 0.0  ;;  %v10369_v32 = vld [vmem:[#allocation81_spill] sm:$0xff]  ;;  %v2670_v45 = vmul.f32 %v8430_v33, %v8430_v33  ;;  %v2363_v37 = vadd.f32 %v2310_v5, %v2151_v28 }
 0x22c   : > { %v2616_v29 = vadd.f32 %v2615_v61, %v2614_v53  ;;  %v2717_v26 = vadd.f32 %v2716_v56, %v2715_v34  ;;  %v6500_v54 = vpop.f32.mrf.mxu0  ;;  %v2365_v23 = vadd.f32 %v8375_v21, %v10369_v32  ;;  %v6471_v21 = vpop.f32.mrf.mxu1  ;;  %v2722_v53 = vsel %vm205_vm1, %v2669_v50, 0.0 }
 0x22d   : > { %v2617_v16 = vsel %vm205_vm1, %v8432_v27, 0.0  ;;  %v2668_v4 = vmul.f32 %v8432_v27, %v8432_v27  ;;  %v2621_v9 = vsel %vm205_vm1, %v8430_v33, 0.0  ;;  %v8458_v56 = vadd.f32 %v6500_v54, %v2364_v41 }
 0x22e   : > { %v2719_v60 = vadd.f32 %v2718_v0, %v2717_v26  ;;  %v2618_v18 = vadd.f32 %v2617_v16, %v2616_v29  ;;  %v2513_v12 = vpop.f32.mrf.mxu0  ;;  %v2724_v10 = vsel %vm205_vm1, %v2670_v45, 0.0  ;;  %v2366_v16 = vadd.f32 %v2323_v15, %v2154_v48  ;;  %v2326_v32 = vpop.f32.mrf.mxu1 }
 0x22f   : > { %v2720_v6 = vsel %vm205_vm1, %v2668_v4, 0.0  ;;  %v8452_v59 = vadd.f32 %v2513_v12, %v2362_v42  ;;  %v1954_v42 = vadd.f32 %v10371_v31, %v1748_v52  ;;  %v2673_v52 = vmul.f32 %v8458_v56, %v8458_v56  ;;  %v10372_v12 = vld [vmem:[#allocation83_spill] sm:$0xff] }
 0x230   : > { %v2620_v3 = vadd.f32 %v2619_v7, %v2618_v18  ;;  %v2721_v49 = vadd.f32 %v2720_v6, %v2719_v60  ;;  %v6501_v34 = vpop.f32.mrf.mxu0  ;;  %v2368_v7 = vadd.f32 %v6470_v51, %v10372_v12  ;;  %v2627_v6 = vsel %vm205_vm1, %v8458_v56, 0.0 }
 0x231   : > { %v2671_v61 = vmul.f32 %v8452_v59, %v8452_v59  ;;  %v2623_v26 = vsel %vm205_vm1, %v8452_v59, 0.0  ;;  %v8466_v0 = vadd.f32 %v6501_v34, %v2365_v23  ;;  %v2155_v54 = vadd.f32 %v8128_v58, %v1954_v42 }
 0x232   : > { %v2723_v29 = vadd.f32 %v2722_v53, %v2721_v49  ;;  %v2622_v5 = vadd.f32 %v2621_v9, %v2620_v3  ;;  %v2516_v28 = vpop.f32.mrf.mxu0  ;;  %v2369_v3 = vadd.f32 %v6471_v21, %v8120_v30  ;;  %v2730_v51 = vsel %vm205_vm1, %v2673_v52, 0.0 }
 0x233   : > { %v8468_v50 = vadd.f32 %v2516_v28, %v2363_v37  ;;  %v2726_v60 = vsel %vm205_vm1, %v2671_v61, 0.0  ;;  %v2674_v37 = vmul.f32 %v8466_v0, %v8466_v0  ;;  %v2367_v49 = vadd.f32 %v2326_v32, %v2155_v54 }
 0x234   : > { %v2624_v4 = vadd.f32 %v2623_v26, %v2622_v5  ;;  %v2725_v36 = vadd.f32 %v2724_v10, %v2723_v29  ;;  %v6504_v41 = vpop.f32.mrf.mxu0  ;;  %v2629_v61 = vsel %vm205_vm1, %v8466_v0, 0.0 }
 0x235   : > { %v2625_v18 = vsel %vm205_vm1, %v8468_v50, 0.0  ;;  %v2672_v23 = vmul.f32 %v8468_v50, %v8468_v50  ;;  %v8490_v31 = vadd.f32 %v6504_v41, %v2368_v7  ;;  %v2732_v10 = vsel %vm205_vm1, %v2674_v37, 0.0 }
 0x236   : > { %v2727_v15 = vadd.f32 %v2726_v60, %v2725_v36  ;;  %v2626_v45 = vadd.f32 %v2625_v18, %v2624_v4  ;;  %v2529_v58 = vpop.f32.mrf.mxu0 }
 0x237   : > { %v2728_v24 = vsel %vm205_vm1, %v2672_v23, 0.0  ;;  %v8484_v48 = vadd.f32 %v2529_v58, %v2366_v16  ;;  %v2677_v4 = vmul.f32 %v8490_v31, %v8490_v31  ;;  %v2635_v18 = vsel %vm205_vm1, %v8490_v31, 0.0 }
 0x238   : > { %v2628_v34 = vadd.f32 %v2627_v6, %v2626_v45  ;;  %v2729_v53 = vadd.f32 %v2728_v24, %v2727_v15  ;;  %v6505_v9 = vpop.f32.mrf.mxu0 }
 0x239   : > { %v2675_v42 = vmul.f32 %v8484_v48, %v8484_v48  ;;  %v2631_v30 = vsel %vm205_vm1, %v8484_v48, 0.0  ;;  %v8497_v21 = vadd.f32 %v6505_v9, %v2369_v3  ;;  %v2738_v45 = vsel %vm205_vm1, %v2677_v4, 0.0 }
 0x23a   : > { %v2731_v29 = vadd.f32 %v2730_v51, %v2729_v53  ;;  %v2630_v5 = vadd.f32 %v2629_v61, %v2628_v34  ;;  %v2532_v28 = vpop.f32.mrf.mxu0 }
 0x23b   : > { %v8499_v26 = vadd.f32 %v2532_v28, %v2367_v49  ;;  %v2734_v36 = vsel %vm205_vm1, %v2675_v42, 0.0  ;;  %v2678_v23 = vmul.f32 %v8497_v21, %v8497_v21  ;;  %v2637_v58 = vsel %vm205_vm1, %v8497_v21, 0.0 }
 0x23c   : > { %v2632_v16 = vadd.f32 %v2631_v30, %v2630_v5  ;;  %v2733_v54 = vadd.f32 %v2732_v10, %v2731_v29  ;;  %v8520_v29 = vld [vmem:[%s10209_s2 + $0x6] sm:$0x3] }
 0x23d   : > { %v2633_v41 = vsel %vm205_vm1, %v8499_v26, 0.0  ;;  %v2676_v32 = vmul.f32 %v8499_v26, %v8499_v26  ;;  %v2740_v24 = vsel %vm205_vm1, %v2678_v23, 0.0  ;;  %6824 = vmatprep.subr.msk.bf16.mxu0 %vm650_vm0, %v8520_v29 }
 0x23e   : > { %v2735_v52 = vadd.f32 %v2734_v36, %v2733_v54  ;;  %v2634_v60 = vadd.f32 %v2633_v41, %v2632_v16 }
 0x23f   : > { %v2736_v12 = vsel %vm205_vm1, %v2676_v32, 0.0 }
 0x240   : > { %v2636_v7 = vadd.f32 %v2635_v18, %v2634_v60  ;;  %v2737_v15 = vadd.f32 %v2736_v12, %v2735_v52 }
 0x242   : > { %v2638_v6 = vadd.f32 %v2637_v58, %v2636_v7  ;;  %v2739_v37 = vadd.f32 %v2738_v45, %v2737_v15 }
 0x244   : > { %v2639_v3 = vrot.slane %v2638_v6, 4  ;;  %v2741_v49 = vadd.f32 %v2740_v24, %v2739_v37 }
 0x246   : > { %v2640_v34 = vadd.f32 %v2639_v3, %v2638_v6  ;;  %v2742_v53 = vrot.slane %v2741_v49, 4 }
 0x248   : > { %v2641_v9 = vrot.slane %v2640_v34, 2  ;;  %v2743_v51 = vadd.f32 %v2742_v53, %v2741_v49 }
 0x24a   : > { %v2642_v61 = vadd.f32 %v2641_v9, %v2640_v34  ;;  %v2744_v42 = vrot.slane %v2743_v51, 2 }
 0x24c   : > { %v2643_v5 = vrot.slane %v2642_v61, 1  ;;  %v2745_v28 = vadd.f32 %v2744_v42, %v2743_v51 }
 0x24e   : > { %v2644_v10 = vadd.f32 %v2643_v5, %v2642_v61  ;;  %v2746_v30 = vrot.slane %v2745_v28, 1 }
 0x250   : > { %v8524_v16 = vmul.f32 0.00390625, %v2644_v10  ;;  %v2747_v54 = vadd.f32 %v2746_v30, %v2745_v28 }
 0x252   : > { %v2748_v4 = vmul.f32 0.00390625, %v2747_v54  ;;  %v2749_v36 = vmul.f32 %v8524_v16, %v8524_v16  ;;  %v2781_v41 = vsub.f32 %v8499_v26, %v8524_v16  ;;  %v2761_v52 = vsub.f32 %v8295_v25, %v8524_v16 }
 0x253   : > { %v2764_v18 = vsub.f32 %v8323_v11, %v8524_v16  ;;  %v2765_v23 = vsub.f32 %v8347_v62, %v8524_v16  ;;  %v2766_v12 = vsub.f32 %v8335_v17, %v8524_v16  ;;  %v2767_v7 = vsub.f32 %v8345_v13, %v8524_v16 }
 0x254   : > { %v2750_v32 = vsub.f32 %v2748_v4, %v2749_v36  ;;  %v2768_v26 = vsub.f32 %v8370_v38, %v8524_v16  ;;  %v2769_v15 = vsub.f32 %v8392_v2, %v8524_v16  ;;  %v2770_v25 = vsub.f32 %v8380_v44, %v8524_v16 }
 0x255   : > { %v2771_v11 = vsub.f32 %v8390_v39, %v8524_v16  ;;  %v2772_v62 = vsub.f32 %v8412_v55, %v8524_v16  ;;  %v2773_v17 = vsub.f32 %v8432_v27, %v8524_v16  ;;  %v2774_v13 = vsub.f32 %v8419_v20, %v8524_v16 }
 0x256   : > { %v2751_v60 = vmax.f32 %v2750_v32, 0.0  ;;  %v2775_v38 = vsub.f32 %v8430_v33, %v8524_v16  ;;  %v2776_v2 = vsub.f32 %v8452_v59, %v8524_v16  ;;  %v2777_v44 = vsub.f32 %v8468_v50, %v8524_v16 }
 0x257   : > { %v2778_v39 = vsub.f32 %v8458_v56, %v8524_v16  ;;  %v2779_v55 = vsub.f32 %v8466_v0, %v8524_v16  ;;  %v2780_v27 = vsub.f32 %v8484_v48, %v8524_v16  ;;  %v2782_v20 = vsub.f32 %v8490_v31, %v8524_v16 }
 0x258   : > { %v2784_v45 = vadd.f32 1e-05, %v2751_v60  ;;  %v2783_v33 = vsub.f32 %v8497_v21, %v8524_v16  ;;  %v2752_v59 = vsub.f32 %v8154_v14, %v8524_v16  ;;  %v2753_v50 = vsub.f32 %v8189_v47, %v8524_v16 }
 0x259   : > { %v2754_v56 = vsub.f32 %v8172_v1, %v8524_v16  ;;  %v2755_v0 = vsub.f32 %v8187_v46, %v8524_v16  ;;  %v2756_v48 = vsub.f32 %v8223_v19, %v8524_v16  ;;  %v2757_v31 = vsub.f32 %v8248_v43, %v8524_v16 }
 0x25a   : > { %6838 = vrsqrt.f32 %v2784_v45  ;;  %v2758_v21 = vsub.f32 %v8232_v35, %v8524_v16  ;;  %v2759_v14 = vsub.f32 %v8246_v63, %v8524_v16  ;;  %v2760_v47 = vsub.f32 %v8270_v8, %v8524_v16 }
 0x25b   : > { %v2762_v1 = vsub.f32 %v8280_v57, %v8524_v16  ;;  %v2763_v46 = vsub.f32 %v8293_v40, %v8524_v16 }
 0x267   : > { %v6839_v58 = vpop.eup %6838 }
 0x268   : > { %v2815_v19 = vmul.f32 %v6839_v58, %v2781_v41  ;;  %v2786_v6 = vmul.f32 %v6839_v58, %v2752_v59  ;;  %v2787_v37 = vmul.f32 %v6839_v58, %v2753_v50  ;;  %v2788_v43 = vmul.f32 %v6839_v58, %v2754_v56 }
 0x269   : > { %v2789_v24 = vmul.f32 %v6839_v58, %v2755_v0  ;;  %v2790_v3 = vmul.f32 %v6839_v58, %v2756_v48  ;;  %v2791_v35 = vmul.f32 %v6839_v58, %v2757_v31  ;;  %v2792_v49 = vmul.f32 %v6839_v58, %v2758_v21 }
 0x26a   : > { %v2847_v34 = vmax.f32 %v2815_v19, 0.0  ;;  %v2793_v53 = vmul.f32 %v6839_v58, %v2759_v14  ;;  %v2794_v63 = vmul.f32 %v6839_v58, %v2760_v47  ;;  %v2795_v9 = vmul.f32 %v6839_v58, %v2761_v52 }
 0x26b   : > { %v2796_v51 = vmul.f32 %v6839_v58, %v2762_v1  ;;  %v2797_v8 = vmul.f32 %v6839_v58, %v2763_v46  ;;  %v2798_v61 = vmul.f32 %v6839_v58, %v2764_v18  ;;  %v8592_v42 = vmul.f32 %v6839_v58, %v2765_v23 }
 0x26c   : > { %2880 = vst.msk [vmem:[#allocation3 + $0x171] sm:$0xff] %vm205_vm1, %v2847_v34  ;;  %2887 = vst.msk [vmem:[#allocation3 + $0x1a1] sm:$0xff] %vm205_vm1, %v2847_v34  ;;  %v8596_v57 = vmul.f32 %v6839_v58, %v2766_v12  ;;  %v8598_v40 = vmul.f32 %v6839_v58, %v2767_v7  ;;  %v8600_v5 = vmul.f32 %v6839_v58, %v2768_v26  ;;  %v2818_v7 = vmax.f32 %v2786_v6, 0.0 }
 0x26d   : > { %v8602_v28 = vmul.f32 %v6839_v58, %v2769_v15  ;;  %v8604_v10 = vmul.f32 %v6839_v58, %v2770_v25  ;;  %v8606_v30 = vmul.f32 %v6839_v58, %v2771_v11  ;;  %v8608_v16 = vmul.f32 %v6839_v58, %v2772_v62 }
 0x26e   : > { %v8610_v54 = vmul.f32 %v6839_v58, %v2773_v17  ;;  %v8612_v4 = vmul.f32 %v6839_v58, %v2774_v13  ;;  %v8614_v36 = vmul.f32 %v6839_v58, %v2775_v38  ;;  %v8616_v41 = vmul.f32 %v6839_v58, %v2776_v2  ;;  %2851 = vst.msk [vmem:[#allocation3 + $0x19] sm:$0xff] %vm205_vm1, %v2818_v7 }
 0x26f   : > { %v8618_v32 = vmul.f32 %v6839_v58, %v2777_v44  ;;  %v8620_v52 = vmul.f32 %v6839_v58, %v2778_v39  ;;  %v8622_v60 = vmul.f32 %v6839_v58, %v2779_v55  ;;  %v8624_v18 = vmul.f32 %v6839_v58, %v2780_v27 }
 0x270   : > { %v8626_v23 = vmul.f32 %v6839_v58, %v2782_v20  ;;  %v8628_v12 = vmul.f32 %v6839_v58, %v2783_v33  ;;  %v2819_v26 = vmax.f32 %v2787_v37, 0.0  ;;  %v2820_v15 = vmax.f32 %v2788_v43, 0.0 }
 0x271   : > { %v2821_v25 = vmax.f32 %v2789_v24, 0.0  ;;  %v2822_v45 = vmax.f32 %v2790_v3, 0.0  ;;  %v2823_v11 = vmax.f32 %v2791_v35, 0.0  ;;  %v2824_v62 = vmax.f32 %v2792_v49, 0.0 }
 0x272   : > { %v2825_v17 = vmax.f32 %v2793_v53, 0.0  ;;  %v2826_v13 = vmax.f32 %v2794_v63, 0.0  ;;  %v2827_v38 = vmax.f32 %v2795_v9, 0.0  ;;  %v2828_v2 = vmax.f32 %v2796_v51, 0.0  ;;  %2852 = vst.msk [vmem:[#allocation3 + $0x21] sm:$0xff] %vm205_vm1, %v2819_v26  ;;  %2853 = vst.msk [vmem:[#allocation3 + $0x31] sm:$0xff] %vm205_vm1, %v2820_v15 }
 0x273   : > { %2883 = vst.msk [vmem:[#allocation3 + $0x1] sm:$0xff] %vm205_vm1, %v2820_v15  ;;  %v2939_v44 = vld [vmem:[#allocation3 + $0x177] sm:$0x1]  ;;  %v2941_v39 = vld [vmem:[#allocation3 + $0x1a7] sm:$0x1]  ;;  %v2829_v55 = vmax.f32 %v2797_v8, 0.0 }
 0x274   : > { %v2830_v27 = vmax.f32 %v2798_v61, 0.0  ;;  %2854 = vst.msk [vmem:[#allocation3 + $0x39] sm:$0xff] %vm205_vm1, %v2821_v25  ;;  %2855 = vst.msk [vmem:[#allocation3 + $0x49] sm:$0xff] %vm205_vm1, %v2822_v45  ;;  %v2831_v20 = vmax.f32 %v8592_v42, 0.0  ;;  %v2832_v33 = vmax.f32 %v8596_v57, 0.0  ;;  %v2833_v59 = vmax.f32 %v8598_v40, 0.0 }
 0x275   : > { %2856 = vst.msk [vmem:[#allocation3 + $0x51] sm:$0xff] %vm205_vm1, %v2823_v11  ;;  %2857 = vst.msk [vmem:[#allocation3 + $0x61] sm:$0xff] %vm205_vm1, %v2824_v62  ;;  %v2834_v50 = vmax.f32 %v8600_v5, 0.0  ;;  %v2835_v56 = vmax.f32 %v8602_v28, 0.0  ;;  %v2836_v0 = vmax.f32 %v8604_v10, 0.0  ;;  %v2837_v48 = vmax.f32 %v8606_v30, 0.0 }
 0x276   : > { %2884 = vst.msk [vmem:[#allocation3 + $0x9] sm:$0xff] %vm205_vm1, %v2821_v25  ;;  %2858 = vst.msk [vmem:[#allocation3 + $0x69] sm:$0xff] %vm205_vm1, %v2825_v17  ;;  %v2838_v31 = vmax.f32 %v8608_v16, 0.0  ;;  %v2839_v21 = vmax.f32 %v8610_v54, 0.0  ;;  %v2840_v58 = vmax.f32 %v8612_v4, 0.0  ;;  %v2841_v14 = vmax.f32 %v8614_v36, 0.0 }
 0x277   : > { %2957 = vst.msk [vmem:[#allocation3 + $0x179] sm:$0x1] %vm261_vm2, %v2939_v44  ;;  %2959 = vst.msk [vmem:[#allocation3 + $0x1a9] sm:$0x1] %vm261_vm2, %v2941_v39  ;;  %v2842_v47 = vmax.f32 %v8616_v41, 0.0  ;;  %v2843_v1 = vmax.f32 %v8618_v32, 0.0 }
 0x278   : > { %2859 = vst.msk [vmem:[#allocation3 + $0x79] sm:$0xff] %vm205_vm1, %v2826_v13  ;;  %2860 = vst.msk [vmem:[#allocation3 + $0x81] sm:$0xff] %vm205_vm1, %v2827_v38  ;;  %v2844_v46 = vmax.f32 %v8620_v52, 0.0  ;;  %v2845_v19 = vmax.f32 %v8622_v60, 0.0  ;;  %v2846_v6 = vmax.f32 %v8624_v18, 0.0  ;;  %v2848_v37 = vmax.f32 %v8626_v23, 0.0 }
 0x279   : > { %2861 = vst.msk [vmem:[#allocation3 + $0x91] sm:$0xff] %vm205_vm1, %v2828_v2  ;;  %2862 = vst.msk [vmem:[#allocation3 + $0x99] sm:$0xff] %vm205_vm1, %v2829_v55  ;;  %v2849_v43 = vmax.f32 %v8628_v12, 0.0  ;;  %v2889_v24 = vld [vmem:[#allocation3 + $0x1a] sm:$0x1]  ;;  %v2964_v62 = vld [vmem:[#allocation3 + $0x20] sm:$0xff] }
 0x27a   : > { %2863 = vst.msk [vmem:[#allocation3 + $0xa9] sm:$0xff] %vm205_vm1, %v2830_v27  ;;  %2864 = vst.msk [vmem:[#allocation3 + $0xb1] sm:$0xff] %vm205_vm1, %v2831_v20  ;;  %v2890_v3 = vld [vmem:[#allocation3 + $0x32] sm:$0x1]  ;;  %v2925_v35 = vld [vmem:[#allocation3 + $0x27] sm:$0x1] }
 0x27b   : > { %2865 = vst.msk [vmem:[#allocation3 + $0xc1] sm:$0xff] %vm205_vm1, %v2832_v33  ;;  %2866 = vst.msk [vmem:[#allocation3 + $0xc9] sm:$0xff] %vm205_vm1, %v2833_v59  ;;  %v2891_v49 = vld [vmem:[#allocation3 + $0x4a] sm:$0x1]  ;;  %v2926_v51 = vld [vmem:[#allocation3 + $0x3f] sm:$0x1] }
 0x27c   : > { %2867 = vst.msk [vmem:[#allocation3 + $0xd9] sm:$0xff] %vm205_vm1, %v2834_v50  ;;  %2868 = vst.msk [vmem:[#allocation3 + $0xe1] sm:$0xff] %vm205_vm1, %v2835_v56  ;;  %v2892_v34 = vld [vmem:[#allocation3 + $0x62] sm:$0x1]  ;;  %v2927_v61 = vld [vmem:[#allocation3 + $0x57] sm:$0x1] }
 0x27d   : > { %2869 = vst.msk [vmem:[#allocation3 + $0xf1] sm:$0xff] %vm205_vm1, %v2836_v0  ;;  %2870 = vst.msk [vmem:[#allocation3 + $0xf9] sm:$0xff] %vm205_vm1, %v2837_v48  ;;  %v2924_v53 = vld [vmem:[#allocation3 + $0xf] sm:$0x1]  ;;  %v2888_v45 = vld [vmem:[#allocation3 + $0x2] sm:$0x1] }
 0x27e   : > { %2871 = vst.msk [vmem:[#allocation3 + $0x109] sm:$0xff] %vm205_vm1, %v2838_v31  ;;  %2872 = vst.msk [vmem:[#allocation3 + $0x111] sm:$0xff] %vm205_vm1, %v2839_v21  ;;  %v2928_v42 = vld [vmem:[#allocation3 + $0x6f] sm:$0x1]  ;;  %v2967_v38 = vld [vmem:[#allocation3 + $0x38] sm:$0xff] }
 0x27f   : > { %2873 = vst.msk [vmem:[#allocation3 + $0x121] sm:$0xff] %vm205_vm1, %v2840_v58  ;;  %2874 = vst.msk [vmem:[#allocation3 + $0x129] sm:$0xff] %vm205_vm1, %v2841_v14  ;;  %v2893_v63 = vld [vmem:[#allocation3 + $0x7a] sm:$0x1]  ;;  %v2929_v5 = vld [vmem:[#allocation3 + $0x87] sm:$0x1] }
 0x280   : > { %2875 = vst.msk [vmem:[#allocation3 + $0x139] sm:$0xff] %vm205_vm1, %v2842_v47  ;;  %2876 = vst.msk [vmem:[#allocation3 + $0x141] sm:$0xff] %vm205_vm1, %v2843_v1  ;;  %v2894_v9 = vld [vmem:[#allocation3 + $0x92] sm:$0x1]  ;;  %v2930_v30 = vld [vmem:[#allocation3 + $0x9f] sm:$0x1] }
 0x281   : > { %2877 = vst.msk [vmem:[#allocation3 + $0x151] sm:$0xff] %vm205_vm1, %v2844_v46  ;;  %2878 = vst.msk [vmem:[#allocation3 + $0x159] sm:$0xff] %vm205_vm1, %v2845_v19  ;;  %v2895_v8 = vld [vmem:[#allocation3 + $0xaa] sm:$0x1]  ;;  %v2931_v4 = vld [vmem:[#allocation3 + $0xb7] sm:$0x1] }
 0x282   : > { %2879 = vst.msk [vmem:[#allocation3 + $0x169] sm:$0xff] %vm205_vm1, %v2846_v6  ;;  %2886 = vst.msk [vmem:[#allocation3 + $0x199] sm:$0xff] %vm205_vm1, %v2846_v6  ;;  %v2896_v57 = vld [vmem:[#allocation3 + $0xc2] sm:$0x1]  ;;  %v2932_v60 = vld [vmem:[#allocation3 + $0xcf] sm:$0x1] }
 0x283   : > { %2881 = vst.msk [vmem:[#allocation3 + $0x181] sm:$0xff] %vm205_vm1, %v2848_v37  ;;  %2882 = vst.msk [vmem:[#allocation3 + $0x189] sm:$0xff] %vm205_vm1, %v2849_v43  ;;  %v2897_v40 = vld [vmem:[#allocation3 + $0xda] sm:$0x1]  ;;  %v2933_v18 = vld [vmem:[#allocation3 + $0xe7] sm:$0x1] }
 0x284   : > { %2907 = vst.msk [vmem:[#allocation3 + $0x18] sm:$0x1] %vm261_vm2, %v2889_v24  ;;  %2908 = vst.msk [vmem:[#allocation3 + $0x30] sm:$0x1] %vm261_vm2, %v2890_v3  ;;  %v2898_v28 = vld [vmem:[#allocation3 + $0xf2] sm:$0x1] }
 0x285   : > { %2943 = vst.msk [vmem:[#allocation3 + $0x29] sm:$0x1] %vm261_vm2, %v2925_v35  ;;  %2909 = vst.msk [vmem:[#allocation3 + $0x48] sm:$0x1] %vm261_vm2, %v2891_v49  ;;  %v2899_v10 = vld [vmem:[#allocation3 + $0x10a] sm:$0x1] }
 0x286   : > { %2910 = vst.msk [vmem:[#allocation3 + $0x60] sm:$0x1] %vm261_vm2, %v2892_v34  ;;  %2942 = vst.msk [vmem:[#allocation3 + $0x11] sm:$0x1] %vm261_vm2, %v2924_v53  ;;  %v2900_v16 = vld [vmem:[#allocation3 + $0x122] sm:$0x1] }
 0x287   : > { %2911 = vst.msk [vmem:[#allocation3 + $0x78] sm:$0x1] %vm261_vm2, %v2893_v63  ;;  %2912 = vst.msk [vmem:[#allocation3 + $0x90] sm:$0x1] %vm261_vm2, %v2894_v9  ;;  %v2901_v54 = vld [vmem:[#allocation3 + $0x13a] sm:$0x1] }
 0x288   : > { %2944 = vst.msk [vmem:[#allocation3 + $0x41] sm:$0x1] %vm261_vm2, %v2926_v51  ;;  %2913 = vst.msk [vmem:[#allocation3 + $0xa8] sm:$0x1] %vm261_vm2, %v2895_v8  ;;  %v2902_v36 = vld [vmem:[#allocation3 + $0x152] sm:$0x1] }
 0x289   : > { %2945 = vst.msk [vmem:[#allocation3 + $0x59] sm:$0x1] %vm261_vm2, %v2927_v61  ;;  %2946 = vst.msk [vmem:[#allocation3 + $0x71] sm:$0x1] %vm261_vm2, %v2928_v42  ;;  %v2903_v41 = vld [vmem:[#allocation3 + $0x16a] sm:$0x1] }
 0x28a   : > { %2914 = vst.msk [vmem:[#allocation3 + $0xc0] sm:$0x1] %vm261_vm2, %v2896_v57  ;;  %2915 = vst.msk [vmem:[#allocation3 + $0xd8] sm:$0x1] %vm261_vm2, %v2897_v40  ;;  %v2905_v32 = vld [vmem:[#allocation3 + $0x19a] sm:$0x1] }
 0x28b   : > { %2947 = vst.msk [vmem:[#allocation3 + $0x89] sm:$0x1] %vm261_vm2, %v2929_v5  ;;  %2916 = vst.msk [vmem:[#allocation3 + $0xf0] sm:$0x1] %vm261_vm2, %v2898_v28  ;;  %v2904_v52 = vld [vmem:[#allocation3 + $0x182] sm:$0x1] }
 0x28c   : > { %2917 = vst.msk [vmem:[#allocation3 + $0x108] sm:$0x1] %vm261_vm2, %v2899_v10  ;;  %2948 = vst.msk [vmem:[#allocation3 + $0xa1] sm:$0x1] %vm261_vm2, %v2930_v30  ;;  %v2934_v23 = vld [vmem:[#allocation3 + $0xff] sm:$0x1] }
 0x28d   : > { %2918 = vst.msk [vmem:[#allocation3 + $0x120] sm:$0x1] %vm261_vm2, %v2900_v16  ;;  %2919 = vst.msk [vmem:[#allocation3 + $0x138] sm:$0x1] %vm261_vm2, %v2901_v54  ;;  %v2935_v12 = vld [vmem:[#allocation3 + $0x117] sm:$0x1] }
 0x28e   : > { %2949 = vst.msk [vmem:[#allocation3 + $0xb9] sm:$0x1] %vm261_vm2, %v2931_v4  ;;  %2920 = vst.msk [vmem:[#allocation3 + $0x150] sm:$0x1] %vm261_vm2, %v2902_v36  ;;  %v2936_v7 = vld [vmem:[#allocation3 + $0x12f] sm:$0x1] }
 0x28f   : > { %2921 = vst.msk [vmem:[#allocation3 + $0x168] sm:$0x1] %vm261_vm2, %v2903_v41  ;;  %2923 = vst.msk [vmem:[#allocation3 + $0x198] sm:$0x1] %vm261_vm2, %v2905_v32  ;;  %v2937_v26 = vld [vmem:[#allocation3 + $0x147] sm:$0x1] }
 0x290   : > { %2922 = vst.msk [vmem:[#allocation3 + $0x180] sm:$0x1] %vm261_vm2, %v2904_v52  ;;  %2950 = vst.msk [vmem:[#allocation3 + $0xd1] sm:$0x1] %vm261_vm2, %v2932_v60  ;;  %v2938_v15 = vld [vmem:[#allocation3 + $0x15f] sm:$0x1] }
 0x291   : > { %2951 = vst.msk [vmem:[#allocation3 + $0xe9] sm:$0x1] %vm261_vm2, %v2933_v18  ;;  %v2940_v25 = vld [vmem:[#allocation3 + $0x18f] sm:$0x1]  ;;  %2952 = vst.msk [vmem:[#allocation3 + $0x101] sm:$0x1] %vm261_vm2, %v2934_v23 }
 0x292   : > { %2953 = vst.msk [vmem:[#allocation3 + $0x119] sm:$0x1] %vm261_vm2, %v2935_v12  ;;  %2954 = vst.msk [vmem:[#allocation3 + $0x131] sm:$0x1] %vm261_vm2, %v2936_v7  ;;  %v2963_v11 = vld [vmem:[#allocation3 + $0x18] sm:$0xff]  ;;  %v2966_v17 = vld [vmem:[#allocation3 + $0x30] sm:$0xff] }
 0x293   : > { %2955 = vst.msk [vmem:[#allocation3 + $0x149] sm:$0x1] %vm261_vm2, %v2937_v26  ;;  %2956 = vst.msk [vmem:[#allocation3 + $0x161] sm:$0x1] %vm261_vm2, %v2938_v15  ;;  %v8718_v13 = vpack.c.bf16 %v2964_v62, %v2963_v11  ;;  %v8720_v2 = vpack.c.bf16 %v2967_v38, %v2966_v17  ;;  %v2965_v44 = vld [vmem:[#allocation3 + $0x28] sm:$0x3] }
 0x294   : > { %2958 = vst.msk [vmem:[#allocation3 + $0x191] sm:$0x1] %vm261_vm2, %v2940_v25  ;;  %2906 = vst.msk [vmem:[#allocation3] sm:$0x1] %vm261_vm2, %v2888_v45  ;;  %v2962_v39 = vld [vmem:[#allocation3 + $0x10] sm:$0x3]  ;;  %v8723_v27 = vpack.c.bf16 %v2965_v44, %v2965_v44 }
 0x295   : > { %v3066_v55 = vshll.u32 %v8718_v13, 16  ;;  %v2968_v20 = vld [vmem:[#allocation3 + $0x40] sm:$0x3]  ;;  %v8725_v33 = vpack.c.bf16 %v2962_v39, %v2962_v39  ;;  %v3078_v59 = vshll.u32 %v8720_v2, 16  ;;  %v2969_v50 = vld [vmem:[#allocation3 + $0x48] sm:$0xff]  ;;  %v2970_v14 = vld [vmem:[#allocation3 + $0x50] sm:$0xff] }
 0x296   : > { %v2961_v0 = vld [vmem:[#allocation3 + $0x8] sm:$0xff]  ;;  %v2972_v31 = vld [vmem:[#allocation3 + $0x60] sm:$0xff]  ;;  %v8730_v58 = vpack.c.bf16 %v2968_v20, %v2968_v20  ;;  %v3064_v47 = vshrl.u32 %v8718_v13, 16  ;;  %v3071_v1 = vshll.u32 %v8723_v27, 16  ;;  %v8734_v46 = vpack.c.bf16 %v2970_v14, %v2969_v50  ;;  %v2971_v63 = vld [vmem:[#allocation3 + $0x58] sm:$0x3] }
 0x297   : > { %v3068_v48 = vrot.slane %v3066_v55, 1  ;;  %v2973_v19 = vld [vmem:[#allocation3 + $0x68] sm:$0xff]  ;;  %v3985_v6 = vsel %vm650_vm0, %v8520_v29, 0  ;;  %v3059_v43 = vshll.u32 %v8725_v33, 16  ;;  %v3080_v24 = vrot.slane %v3078_v59, 1  ;;  %v2975_v5 = vld [vmem:[#allocation3 + $0x78] sm:$0xff] }
 0x298   : > { %v8742_v3 = vpack.c.bf16 %v2973_v19, %v2972_v31  ;;  %v3076_v34 = vshrl.u32 %v8720_v2, 16  ;;  %v3083_v53 = vshll.u32 %v8730_v58, 16  ;;  %v3073_v9 = vrot.slane %v3071_v1, 1  ;;  %v2974_v8 = vld [vmem:[#allocation3 + $0x70] sm:$0x3]  ;;  %v2976_v41 = vld [vmem:[#allocation3 + $0x80] sm:$0xff] }
 0x299   : > { %v3069_v35 = vor.u32 %v3068_v48, %v3064_v47  ;;  %v3090_v51 = vshll.u32 %v8734_v46, 16  ;;  %v3061_v42 = vrot.slane %v3059_v43, 1  ;;  %v8756_v10 = vpack.c.bf16 %v2971_v63, %v2971_v63  ;;  %v2978_v30 = vld [vmem:[#allocation3 + $0x90] sm:$0xff]  ;;  %v2979_v60 = vld [vmem:[#allocation3 + $0x98] sm:$0xff]  ;;  %v2977_v11 = vld [vmem:[#allocation3 + $0x88] sm:$0x3] }
 0x29a   : > { %v3081_v57 = vor.u32 %v3080_v24, %v3076_v34  ;;  %v3102_v40 = vshll.u32 %v8742_v3, 16  ;;  %v3784_v54 = vsel %vm650_vm0, %v8316_v22, 0  ;;  %v3085_v4 = vrot.slane %v3083_v53, 1  ;;  %v8769_v18 = vld [vmem:[%s10209_s2 + $0x8] sm:$0x3]  ;;  %v2981_v55 = vld [vmem:[#allocation3 + $0xa8] sm:$0xff] }
 0x29b   : > { %v2960_v56 = vld [vmem:[#allocation3] sm:$0xff]  ;;  %v8754_v28 = vsel %vm407_vm3, %v3069_v35, %v3073_v9  ;;  %v8761_v36 = vpack.c.bf16 %v2974_v8, %v2974_v8  ;;  %v3092_v32 = vrot.slane %v3090_v51, 1  ;;  %v8764_v52 = vpack.c.bf16 %v2976_v41, %v2975_v5  ;;  %v8781_v7 = vld [vmem:[%s10209_s2 + $0xa] sm:$0x3]  ;;  %v2982_v48 = vld [vmem:[#allocation3 + $0xb0] sm:$0xff] }
 0x29c   : > { %v8728_v21 = vpack.c.bf16 %v2961_v0, %v2960_v56  ;;  %v8774_v22 = vsel %vm407_vm3, %v3081_v57, %v3085_v4  ;;  %v3104_v23 = vrot.slane %v3102_v40, 1  ;;  %v8776_v12 = vpack.c.bf16 %v2979_v60, %v2978_v30  ;;  %v2980_v38 = vld [vmem:[#allocation3 + $0xa0] sm:$0x3]  ;;  %v2985_v1 = vld [vmem:[#allocation3 + $0xc8] sm:$0xff]  ;;  %v2986_v63 = vld [vmem:[#allocation3 + $0xd0] sm:$0x3] }
 0x29d   : > { %v3088_v26 = vshrl.u32 %v8734_v46, 16  ;;  %v3095_v15 = vshll.u32 %v8756_v10, 16  ;;  %v3100_v25 = vshrl.u32 %v8742_v3, 16  ;;  %v3107_v45 = vshll.u32 %v8761_v36, 16  ;;  %v2984_v50 = vld [vmem:[#allocation3 + $0xc0] sm:$0xff]  ;;  %v2987_v8 = vld [vmem:[#allocation3 + $0xd8] sm:$0xff] }
 0x29e   : > { %6542 = vmatprep.mubr.msk.bf16.mxu0 %vm205_vm1, %v8728_v21  ;;  %v3054_v37 = vshll.u32 %v8728_v21, 16  ;;  %v3052_v49 = vshrl.u32 %v8728_v21, 16  ;;  %v3114_v17 = vshll.u32 %v8764_v52, 16  ;;  %v3126_v39 = vshll.u32 %v8776_v12, 16  ;;  %v2990_v57 = vld [vmem:[#allocation3 + $0xf0] sm:$0xff]  ;;  %v2988_v30 = vld [vmem:[#allocation3 + $0xe0] sm:$0xff] }
 0x29f   : > { %6543 = vmatmul.mubr.msk.bf16.vlgmr.msra.gmra.mxu0 %vm205_vm1, %v8718_v13  ;;  %v3093_v62 = vor.u32 %v3092_v32, %v3088_v26  ;;  %v3105_v44 = vor.u32 %v3104_v23, %v3100_v25  ;;  %v3097_v20 = vrot.slane %v3095_v15, 1  ;;  %v8799_v59 = vpack.c.bf16 %v2977_v11, %v2977_v11  ;;  %v2991_v41 = vld [vmem:[#allocation3 + $0xf8] sm:$0xff]  ;;  %v2989_v11 = vld [vmem:[#allocation3 + $0xe8] sm:$0x3] }
 0x2a0   : > { %6546 = vmatprep.mubr.msk.bf16.mxu0 %vm205_vm1, %v8720_v2  ;;  %v3056_v29 = vrot.slane %v3054_v37, 1  ;;  %6609 = vmatpush3.bf16.msra.mxu0 %v3985_v6  ;;  %v3109_v56 = vrot.slane %v3107_v45, 1  ;;  %v8801_v0 = vpack.c.bf16 %v2980_v38, %v2980_v38  ;;  %v3116_v14 = vrot.slane %v3114_v17, 1  ;;  %v2992_v38 = vld [vmem:[#allocation3 + $0x100] sm:$0x3] }
 0x2a1   : > { %6826 = vmatprep.subr.msk.bf16.mxu0 %vm650_vm0, %v8781_v7  ;;  %v8804_v31 = vsel %vm407_vm3, %v3093_v62, %v3097_v20  ;;  %v8806_v47 = vpack.c.bf16 %v2982_v48, %v2981_v55  ;;  %v3128_v6 = vrot.slane %v3126_v39, 1  ;;  %v8813_v37 = vpack.c.bf16 %v2985_v1, %v2984_v50  ;;  %v2993_v55 = vld [vmem:[#allocation3 + $0x108] sm:$0xff]  ;;  %v2994_v1 = vld [vmem:[#allocation3 + $0x110] sm:$0xff] }
 0x2a2   : > { %v3057_v61 = vor.u32 %v3056_v29, %v3052_v49  ;;  %v8811_v19 = vsel %vm407_vm3, %v3105_v44, %v3109_v56  ;;  %v3112_v43 = vshrl.u32 %v8764_v52, 16  ;;  %v3119_v24 = vshll.u32 %v8799_v59, 16  ;;  %v2983_v29 = vld [vmem:[#allocation3 + $0xb8] sm:$0x3]  ;;  %v2996_v56 = vld [vmem:[#allocation3 + $0x120] sm:$0xff] }
 0x2a3   : > { %v3124_v35 = vshrl.u32 %v8776_v12, 16  ;;  %v3131_v49 = vshll.u32 %v8801_v0, 16  ;;  %v3138_v53 = vshll.u32 %v8806_v47, 16  ;;  %v3150_v51 = vshll.u32 %v8813_v37, 16 }
 0x2a4   : > { %v3062_v16 = vsel %vm407_vm3, %v3057_v61, %v3061_v42  ;;  %v3117_v34 = vor.u32 %v3116_v14, %v3112_v43  ;;  %v3121_v61 = vrot.slane %v3119_v24, 1  ;;  %v8827_v42 = vpack.c.bf16 %v2983_v29, %v2983_v29 }
 0x2a5   : > { %6508 = vmatprep.mubr.msk.bf16.mxu1 %vm205_vm1, %v3062_v16  ;;  %v3129_v9 = vor.u32 %v3128_v6, %v3124_v35  ;;  %v3133_v40 = vrot.slane %v3131_v49, 1  ;;  %v8829_v5 = vpack.c.bf16 %v2986_v63, %v2986_v63  ;;  %v8834_v4 = vpack.c.bf16 %v2988_v30, %v2987_v8  ;;  %v2997_v35 = vld [vmem:[#allocation3 + $0x128] sm:$0xff]  ;;  %v2995_v8 = vld [vmem:[#allocation3 + $0x118] sm:$0x3] }
 0x2a6   : > { %6509 = vmatmul.mubr.msk.bf16.vlgmr.msra.gmra.mxu1 %vm205_vm1, %v8754_v28  ;;  %v8832_v16 = vsel %vm407_vm3, %v3117_v34, %v3121_v61  ;;  %v3152_v60 = vrot.slane %v3150_v51, 1  ;;  %v8841_v23 = vpack.c.bf16 %v2991_v41, %v2990_v57  ;;  %v3136_v26 = vshrl.u32 %v8806_v47, 16  ;;  %v2999_v41 = vld [vmem:[#allocation3 + $0x138] sm:$0xff] }
 0x2a7   : > { %6575 = vmatpush3.bf16.msra.mxu1 %v3784_v54  ;;  %6512 = vmatprep.mubr.msk.bf16.mxu1 %vm205_vm1, %v8774_v22  ;;  %v3140_v54 = vrot.slane %v3138_v53, 1  ;;  %v8839_v32 = vsel %vm407_vm3, %v3129_v9, %v3133_v40  ;;  %v3143_v15 = vshll.u32 %v8827_v42, 16  ;;  %v3148_v25 = vshrl.u32 %v8813_v37, 16  ;;  %v2998_v40 = vld [vmem:[#allocation3 + $0x130] sm:$0x3] }
 0x2a8   : > { %6547 = vmatmul.mubr.msk.bf16.gmra.mxu0 %vm205_vm1, %v8734_v46  ;;  %6825 = vmatprep.subr.msk.bf16.mxu1 %vm650_vm0, %v8769_v18  ;;  %v3155_v45 = vshll.u32 %v8829_v5, 16  ;;  %v3162_v17 = vshll.u32 %v8834_v4, 16  ;;  %v3174_v39 = vshll.u32 %v8841_v23, 16  ;;  %v8855_v50 = vpack.c.bf16 %v2989_v11, %v2989_v11  ;;  %v3000_v11 = vld [vmem:[#allocation3 + $0x140] sm:$0xff] }
 0x2a9   : > { %6550 = vmatprep.mubr.msk.bf16.mxu0 %vm205_vm1, %v8742_v3  ;;  %v3141_v62 = vor.u32 %v3140_v54, %v3136_v26  ;;  %v3153_v44 = vor.u32 %v3152_v60, %v3148_v25  ;;  %v3145_v20 = vrot.slane %v3143_v15, 1  ;;  %v8857_v14 = vpack.c.bf16 %v2992_v38, %v2992_v38  ;;  %v3002_v15 = vld [vmem:[#allocation3 + $0x150] sm:$0xff] }
 0x2aa   : > { %v3157_v48 = vrot.slane %v3155_v45, 1  ;;  %v3164_v43 = vrot.slane %v3162_v17, 1  ;;  %v8862_v24 = vpack.c.bf16 %v2994_v1, %v2993_v55  ;;  %v3176_v29 = vrot.slane %v3174_v39, 1 }
 0x2ab   : > { %v8860_v6 = vsel %vm407_vm3, %v3141_v62, %v3145_v20  ;;  %v8869_v34 = vpack.c.bf16 %v2997_v35, %v2996_v56  ;;  %v3160_v53 = vshrl.u32 %v8834_v4, 16  ;;  %v3167_v63 = vshll.u32 %v8855_v50, 16  ;;  %v3001_v35 = vld [vmem:[#allocation3 + $0x148] sm:$0x3] }
 0x2ac   : > { %v8867_v49 = vsel %vm407_vm3, %v3153_v44, %v3157_v48  ;;  %v3172_v9 = vshrl.u32 %v8841_v23, 16  ;;  %v3179_v51 = vshll.u32 %v8857_v14, 16  ;;  %v3186_v57 = vshll.u32 %v8862_v24, 16  ;;  %v3003_v44 = vld [vmem:[#allocation3 + $0x158] sm:$0xff] }
 0x2ad   : > { %v3165_v61 = vor.u32 %v3164_v43, %v3160_v53  ;;  %v3198_v54 = vshll.u32 %v8869_v34, 16  ;;  %v3169_v60 = vrot.slane %v3167_v63, 1  ;;  %v8883_v26 = vpack.c.bf16 %v2995_v8, %v2995_v8  ;;  %v3004_v63 = vld [vmem:[#allocation3 + $0x160] sm:$0x3]  ;;  %v3005_v8 = vld [vmem:[#allocation3 + $0x168] sm:$0xff] }
 0x2ae   : > { %6513 = vmatmul.mubr.msk.bf16.gmra.mxu1 %vm205_vm1, %v8804_v31  ;;  %v3177_v30 = vor.u32 %v3176_v29, %v3172_v9  ;;  %v3181_v25 = vrot.slane %v3179_v51, 1  ;;  %v8885_v45 = vpack.c.bf16 %v2998_v40, %v2998_v40  ;;  %v3188_v17 = vrot.slane %v3186_v57, 1 }
 0x2af   : > { %6516 = vmatprep.mubr.msk.bf16.mxu1 %vm205_vm1, %v8811_v19  ;;  %v8888_v62 = vsel %vm407_vm3, %v3165_v61, %v3169_v60  ;;  %v8890_v38 = vpack.c.bf16 %v3000_v11, %v2999_v41  ;;  %v3200_v55 = vrot.slane %v3198_v54, 1  ;;  %v8897_v20 = vpack.c.bf16 %v3003_v44, %v3002_v15  ;;  %v3006_v54 = vld [vmem:[#allocation3 + $0x170] sm:$0xff] }
 0x2b0   : > { %6551 = vmatmul.mubr.msk.bf16.gmra.mxu0 %vm205_vm1, %v8764_v52  ;;  %v8895_v39 = vsel %vm407_vm3, %v3177_v30, %v3181_v25  ;;  %v3184_v56 = vshrl.u32 %v8862_v24, 16  ;;  %v3191_v48 = vshll.u32 %v8883_v26, 16  ;;  %v3196_v1 = vshrl.u32 %v8869_v34, 16 }
 0x2b1   : > { %6554 = vmatprep.mubr.msk.bf16.mxu0 %vm205_vm1, %v8776_v12  ;;  %v3203_v43 = vshll.u32 %v8885_v45, 16  ;;  %v3210_v53 = vshll.u32 %v8890_v38, 16  ;;  %v3222_v51 = vshll.u32 %v8897_v20, 16  ;;  %v8911_v57 = vpack.c.bf16 %v3001_v35, %v3001_v35 }
 0x2b2   : > { %v3189_v29 = vor.u32 %v3188_v17, %v3184_v56  ;;  %v3201_v9 = vor.u32 %v3200_v55, %v3196_v1  ;;  %v3193_v61 = vrot.slane %v3191_v48, 1  ;;  %v8913_v30 = vpack.c.bf16 %v3004_v63, %v3004_v63  ;;  %v3007_v48 = vld [vmem:[#allocation3 + $0x178] sm:$0x3] }
 0x2b3   : > { %v3205_v40 = vrot.slane %v3203_v43, 1  ;;  %v3212_v60 = vrot.slane %v3210_v53, 1  ;;  %v8918_v15 = vpack.c.bf16 %v3006_v54, %v3005_v8  ;;  %v3224_v11 = vrot.slane %v3222_v51, 1 }
 0x2b4   : > { %v8916_v41 = vsel %vm407_vm3, %v3189_v29, %v3193_v61  ;;  %v3208_v17 = vshrl.u32 %v8890_v38, 16  ;;  %v3215_v44 = vshll.u32 %v8911_v57, 16  ;;  %v3220_v55 = vshrl.u32 %v8897_v20, 16 }
 0x2b5   : > { %v8923_v25 = vsel %vm407_vm3, %v3201_v9, %v3205_v40  ;;  %v3227_v56 = vshll.u32 %v8913_v30, 16  ;;  %v3234_v43 = vshll.u32 %v8918_v15, 16  ;;  %v8936_v53 = vpack.c.bf16 %v3007_v48, %v3007_v48 }
 0x2b6   : > { %6517 = vmatmul.mubr.msk.bf16.gmra.mxu1 %vm205_vm1, %v8832_v16  ;;  %v3213_v1 = vor.u32 %v3212_v60, %v3208_v17  ;;  %v3225_v35 = vor.u32 %v3224_v11, %v3220_v55  ;;  %v3217_v29 = vrot.slane %v3215_v44, 1  ;;  %v3232_v61 = vshrl.u32 %v8918_v15, 16 }
 0x2b7   : > { %6520 = vmatprep.mubr.msk.bf16.mxu1 %vm205_vm1, %v8839_v32  ;;  %v3229_v63 = vrot.slane %v3227_v56, 1  ;;  %v3236_v51 = vrot.slane %v3234_v43, 1  ;;  %v3239_v40 = vshll.u32 %v8936_v53, 16  ;;  %v3685_v60 = vrot.slane %v8728_v21, 1  ;;  %v8968_v21 = vld [vmem:[%s10209_s2 + $0xe] sm:$0x3] }
 0x2b8   : > { %6555 = vmatmul.mubr.msk.bf16.gmra.mxu0 %vm205_vm1, %v8806_v47  ;;  %v8939_v9 = vsel %vm407_vm3, %v3213_v1, %v3217_v29  ;;  %v3686_v11 = vrot.slane %v8725_v33, 1  ;;  %v4403_v56 = vsel %vm650_vm0, %v8781_v7, 0  ;;  %v3688_v33 = vrot.slane %v8718_v13, 1 }
 0x2b9   : > { %6558 = vmatprep.mubr.msk.bf16.mxu0 %vm205_vm1, %v8813_v37  ;;  %v8944_v8 = vsel %vm407_vm3, %v3225_v35, %v3229_v63  ;;  %v3237_v54 = vor.u32 %v3236_v51, %v3232_v61  ;;  %v3241_v17 = vrot.slane %v3239_v40, 1  ;;  %v3689_v48 = vrot.slane %v8723_v27, 1 }
 0x2ba   : > { %v3687_v55 = vsel %vm1043_vm4, %v3685_v60, %v3686_v11  ;;  %v3691_v7 = vrot.slane %v8720_v2, 1  ;;  %v3692_v1 = vrot.slane %v8730_v58, 1  ;;  %v4197_v43 = vsel %vm650_vm0, %v8769_v18, 0 }
 0x2bb   : > { %v8957_v44 = vsel %vm407_vm3, %v3237_v54, %v3241_v17  ;;  %v8983_v35 = vsel %vm1043_vm4, %v3688_v33, %v3689_v48  ;;  %v3694_v58 = vrot.slane %v8734_v46, 1  ;;  %v3695_v18 = vrot.slane %v8756_v10, 1 }
 0x2bc   : > { %v8993_v27 = vsel %vm1043_vm4, %v3691_v7, %v3692_v1  ;;  %v3697_v29 = vrot.slane %v8742_v3, 1  ;;  %v3698_v63 = vrot.slane %v8761_v36, 1  ;;  %v3700_v10 = vrot.slane %v8764_v52, 1 }
 0x2bd   : > { %v9008_v51 = vsel %vm1043_vm4, %v3694_v58, %v3695_v18  ;;  %v3701_v36 = vrot.slane %v8799_v59, 1  ;;  %v3703_v40 = vrot.slane %v8776_v12, 1  ;;  %v3704_v54 = vrot.slane %v8801_v0, 1 }
 0x2be   : > { %6521 = vmatmul.mubr.msk.bf16.gmra.mxu1 %vm205_vm1, %v8860_v6  ;;  %v9013_v61 = vsel %vm1043_vm4, %v3697_v29, %v3698_v63  ;;  %v3706_v59 = vrot.slane %v8806_v47, 1  ;;  %v3707_v0 = vrot.slane %v8827_v42, 1  ;;  %v3709_v17 = vrot.slane %v8813_v37, 1 }
 0x2bf   : > { %6524 = vmatprep.mubr.msk.bf16.mxu1 %vm205_vm1, %v8867_v49  ;;  %v9026_v60 = vsel %vm1043_vm4, %v3700_v10, %v3701_v36  ;;  %v9031_v11 = vsel %vm1043_vm4, %v3703_v40, %v3704_v54  ;;  %v3712_v42 = vrot.slane %v8834_v4, 1  ;;  %v3715_v48 = vrot.slane %v8841_v23, 1  ;;  %v3008_v40 = vld [vmem:[#allocation3 + $0x180] sm:$0xff] }
 0x2c0   : > { %6559 = vmatmul.mubr.msk.bf16.gmra.mxu0 %vm205_vm1, %v8834_v4  ;;  %v3716_v7 = vrot.slane %v8857_v14, 1  ;;  %v3719_v14 = vrot.slane %v8883_v26, 1  ;;  %v3721_v58 = vrot.slane %v8869_v34, 1  ;;  %v3722_v18 = vrot.slane %v8885_v45, 1 }
 0x2c1   : > { %6562 = vmatprep.mubr.msk.bf16.mxu0 %vm205_vm1, %v8841_v23  ;;  %v3724_v26 = vrot.slane %v8890_v38, 1  ;;  %v3725_v45 = vrot.slane %v8911_v57, 1  ;;  %v3727_v10 = vrot.slane %v8897_v20, 1  ;;  %v3728_v36 = vrot.slane %v8913_v30, 1 }
 0x2c2   : > { %v9085_v63 = vsel %vm1043_vm4, %v3721_v58, %v3722_v18  ;;  %v3730_v57 = vrot.slane %v8918_v15, 1  ;;  %v3731_v30 = vrot.slane %v8936_v53, 1 }
 0x2c3   : > { %v9098_v54 = vsel %vm1043_vm4, %v3724_v26, %v3725_v45 }
 0x2c6   : > { %6525 = vmatmul.mubr.msk.bf16.gmra.mxu1 %vm205_vm1, %v8888_v62 }
 0x2c7   : > { %6528 = vmatprep.mubr.msk.bf16.mxu1 %vm205_vm1, %v8895_v39 }
 0x2c8   : > { %6563 = vmatmul.mubr.msk.bf16.gmra.mxu0 %vm205_vm1, %v8862_v24 }
 0x2c9   : > { %6566 = vmatprep.mubr.msk.bf16.mxu0 %vm205_vm1, %v8869_v34 }
 0x2ce   : > { %6529 = vmatmul.mubr.msk.bf16.gmra.mxu1 %vm205_vm1, %v8916_v41 }
 0x2cf   : > { %6532 = vmatprep.mubr.msk.bf16.mxu1 %vm205_vm1, %v8923_v25 }
 0x2d0   : > { %6567 = vmatmul.mubr.msk.bf16.gmra.mxu0 %vm205_vm1, %v8890_v38 }
 0x2d1   : > { %6570 = vmatprep.mubr.msk.bf16.mxu0 %vm205_vm1, %v8897_v20 }
 0x2d6   : > { %6533 = vmatmul.mubr.msk.bf16.gmra.mxu1 %vm205_vm1, %v8939_v9 }
 0x2d7   : > { %6536 = vmatprep.mubr.msk.bf16.mxu1 %vm205_vm1, %v8944_v8 }
 0x2d8   : > { %6571 = vmatmul.mubr.msk.bf16.gmra.mxu0 %vm205_vm1, %v8918_v15 }
 0x2d9   : > { %6610 = vmatprep.mubr.msk.bf16.mxu0 %vm205_vm1, %v8718_v13  ;;  %v8988_v13 = vld [vmem:[%s10209_s2 + $0xc] sm:$0x3] }
 0x2da   : > { %v4604_v53 = vsel %vm650_vm0, %v8988_v13, 0 }
 0x2de   : > { %6537 = vmatmul.mubr.msk.bf16.gmra.mxu1 %vm205_vm1, %v8957_v44 }
 0x2df   : > { %6576 = vmatprep.mubr.msk.bf16.mxu1 %vm205_vm1, %v3687_v55  ;;  %v3710_v55 = vrot.slane %v8829_v5, 1  ;;  %v3713_v5 = vrot.slane %v8855_v50, 1  ;;  %v3718_v50 = vrot.slane %v8862_v24, 1 }
 0x2e0   : > { %6611 = vmatmul.mubr.msk.bf16.vlgmr.msra.gmra.mxu0 %vm205_vm1, %v8720_v2 }
 0x2e1   : > { %6614 = vmatprep.mubr.msk.bf16.mxu0 %vm205_vm1, %v8734_v46  ;;  %6677 = vmatpush3.bf16.msra.mxu0 %v4403_v56  ;;  %v9044_v56 = vsel %vm1043_vm4, %v3706_v59, %v3707_v0  ;;  %v9049_v33 = vsel %vm1043_vm4, %v3709_v17, %v3710_v55  ;;  %v9062_v1 = vsel %vm1043_vm4, %v3712_v42, %v3713_v5  ;;  %v3009_v59 = vld [vmem:[#allocation3 + $0x188] sm:$0xff]  ;;  %v4816_v42 = vsel %vm650_vm0, %v8968_v21, 0 }
 0x2e2   : > { %6828 = vmatprep.subr.msk.bf16.mxu0 %vm650_vm0, %v8968_v21  ;;  %v9080_v29 = vsel %vm1043_vm4, %v3718_v50, %v3719_v14  ;;  %v9103_v0 = vsel %vm1043_vm4, %v3727_v10, %v3728_v36  ;;  %v9105_v17 = vpack.c.bf16 %v3009_v59, %v3008_v40  ;;  %v9116_v55 = vsel %vm1043_vm4, %v3730_v57, %v3731_v30 }
 0x2e4   : > { %v4394_v5 = vrot.slane %v9105_v17, 1  ;;  %v4180_v14 = vshrl.u32 %v9105_v17, 16 }
 0x2e6   : > { %6577 = vmatmul.mubr.msk.bf16.vlgmr.msra.gmra.mxu1 %vm205_vm1, %v8983_v35 }
 0x2e7   : > { %6643 = vmatpush3.bf16.msra.mxu1 %v4197_v43  ;;  %6580 = vmatprep.mubr.msk.bf16.mxu1 %vm205_vm1, %v8993_v27  ;;  %v9067_v43 = vsel %vm1043_vm4, %v3715_v48, %v3716_v7 }
 0x2e8   : > { %6615 = vmatmul.mubr.msk.bf16.gmra.mxu0 %vm205_vm1, %v8742_v3  ;;  %6827 = vmatprep.subr.msk.bf16.mxu1 %vm650_vm0, %v8988_v13  ;;  %v4182_v13 = vshll.u32 %v9105_v17, 16 }
 0x2e9   : > { %6618 = vmatprep.mubr.msk.bf16.mxu0 %vm205_vm1, %v8764_v52 }
 0x2ea   : > { %v4184_v7 = vrot.slane %v4182_v13, 1 }
 0x2ec   : > { %v4185_v18 = vor.u32 %v4184_v7, %v4180_v14 }
 0x2ee   : > { %6581 = vmatmul.mubr.msk.bf16.gmra.mxu1 %vm205_vm1, %v9008_v51 }
 0x2ef   : > { %6584 = vmatprep.mubr.msk.bf16.mxu1 %vm205_vm1, %v9013_v61 }
 0x2f0   : > { %6619 = vmatmul.mubr.msk.bf16.gmra.mxu0 %vm205_vm1, %v8776_v12 }
 0x2f1   : > { %6622 = vmatprep.mubr.msk.bf16.mxu0 %vm205_vm1, %v8806_v47 }
 0x2f6   : > { %6585 = vmatmul.mubr.msk.bf16.gmra.mxu1 %vm205_vm1, %v9026_v60 }
 0x2f7   : > { %6588 = vmatprep.mubr.msk.bf16.mxu1 %vm205_vm1, %v9031_v11 }
 0x2f8   : > { %6623 = vmatmul.mubr.msk.bf16.gmra.mxu0 %vm205_vm1, %v8813_v37 }
 0x2f9   : > { %6626 = vmatprep.mubr.msk.bf16.mxu0 %vm205_vm1, %v8834_v4 }
 0x2fe   : > { %6589 = vmatmul.mubr.msk.bf16.gmra.mxu1 %vm205_vm1, %v9044_v56 }
 0x2ff   : > { %6592 = vmatprep.mubr.msk.bf16.mxu1 %vm205_vm1, %v9049_v33 }
 0x300   : > { %6627 = vmatmul.mubr.msk.bf16.gmra.mxu0 %vm205_vm1, %v8841_v23 }
 0x301   : > { %6630 = vmatprep.mubr.msk.bf16.mxu0 %vm205_vm1, %v8862_v24 }
 0x306   : > { %6593 = vmatmul.mubr.msk.bf16.gmra.mxu1 %vm205_vm1, %v9062_v1 }
 0x307   : > { %6596 = vmatprep.mubr.msk.bf16.mxu1 %vm205_vm1, %v9067_v43 }
 0x308   : > { %6631 = vmatmul.mubr.msk.bf16.gmra.mxu0 %vm205_vm1, %v8869_v34 }
 0x309   : > { %6634 = vmatprep.mubr.msk.bf16.mxu0 %vm205_vm1, %v8890_v38 }
 0x30e   : > { %6597 = vmatmul.mubr.msk.bf16.gmra.mxu1 %vm205_vm1, %v9080_v29 }
 0x30f   : > { %6600 = vmatprep.mubr.msk.bf16.mxu1 %vm205_vm1, %v9085_v63 }
 0x310   : > { %6635 = vmatmul.mubr.msk.bf16.gmra.mxu0 %vm205_vm1, %v8897_v20 }
 0x311   : > { %6638 = vmatprep.mubr.msk.bf16.mxu0 %vm205_vm1, %v8918_v15 }
 0x316   : > { %6601 = vmatmul.mubr.msk.bf16.gmra.mxu1 %vm205_vm1, %v9098_v54 }
 0x317   : > { %6604 = vmatprep.mubr.msk.bf16.mxu1 %vm205_vm1, %v9103_v0 }
 0x318   : > { %6639 = vmatmul.mubr.msk.bf16.gmra.mxu0 %vm205_vm1, %v9105_v17 }
 0x319   : > { %6678 = vmatprep.mubr.msk.bf16.mxu0 %vm205_vm1, %v8983_v35  ;;  %v5873_v35 = vld [vmem:[%s10209_s2 + $0x10] sm:$0x3] }
 0x31a   : > { %v5022_v40 = vsel %vm650_vm0, %v5873_v35, 0 }
 0x31e   : > { %6605 = vmatmul.mubr.msk.bf16.gmra.mxu1 %vm205_vm1, %v9116_v55 }
 0x31f   : > { %6644 = vmatprep.mubr.msk.bf16.mxu1 %vm205_vm1, %v8754_v28  ;;  %v3010_v28 = vld [vmem:[#allocation3 + $0x190] sm:$0x3] }
 0x320   : > { %6679 = vmatmul.mubr.msk.bf16.vlgmr.msra.gmra.mxu0 %vm205_vm1, %v8993_v27  ;;  %v3047_v21 = vpack.c.bf16 %v3010_v28, %v3010_v28 }
 0x321   : > { %6682 = vmatprep.mubr.msk.bf16.mxu0 %vm205_vm1, %v9008_v51  ;;  %6745 = vmatpush3.bf16.msra.mxu0 %v4816_v42 }
 0x322   : > { %v4395_v48 = vrot.slane %v3047_v21, 1  ;;  %v4187_v58 = vshll.u32 %v3047_v21, 16 }
 0x324   : > { %v9189_v50 = vsel %vm1043_vm4, %v4394_v5, %v4395_v48  ;;  %v4189_v26 = vrot.slane %v4187_v58, 1 }
 0x326   : > { %6645 = vmatmul.mubr.msk.bf16.vlgmr.msra.gmra.mxu1 %vm205_vm1, %v8774_v22  ;;  %v9197_v45 = vsel %vm407_vm3, %v4185_v18, %v4189_v26 }
 0x327   : > { %6711 = vmatpush3.bf16.msra.mxu1 %v4604_v53  ;;  %6648 = vmatprep.mubr.msk.bf16.mxu1 %vm205_vm1, %v8804_v31 }
 0x328   : > { %6683 = vmatmul.mubr.msk.bf16.gmra.mxu0 %vm205_vm1, %v9013_v61  ;;  %6829 = vmatprep.subr.msk.bf16.mxu1 %vm650_vm0, %v5873_v35 }
 0x329   : > { %6686 = vmatprep.mubr.msk.bf16.mxu0 %vm205_vm1, %v9026_v60 }
 0x32e   : > { %6649 = vmatmul.mubr.msk.bf16.gmra.mxu1 %vm205_vm1, %v8811_v19 }
 0x32f   : > { %6652 = vmatprep.mubr.msk.bf16.mxu1 %vm205_vm1, %v8832_v16 }
 0x330   : > { %6687 = vmatmul.mubr.msk.bf16.gmra.mxu0 %vm205_vm1, %v9031_v11 }
 0x331   : > { %6690 = vmatprep.mubr.msk.bf16.mxu0 %vm205_vm1, %v9044_v56 }
 0x336   : > { %6653 = vmatmul.mubr.msk.bf16.gmra.mxu1 %vm205_vm1, %v8839_v32 }
 0x337   : > { %6656 = vmatprep.mubr.msk.bf16.mxu1 %vm205_vm1, %v8860_v6 }
 0x338   : > { %6691 = vmatmul.mubr.msk.bf16.gmra.mxu0 %vm205_vm1, %v9049_v33 }
 0x339   : > { %6694 = vmatprep.mubr.msk.bf16.mxu0 %vm205_vm1, %v9062_v1 }
 0x33e   : > { %6657 = vmatmul.mubr.msk.bf16.gmra.mxu1 %vm205_vm1, %v8867_v49 }
 0x33f   : > { %6660 = vmatprep.mubr.msk.bf16.mxu1 %vm205_vm1, %v8888_v62 }
 0x340   : > { %6695 = vmatmul.mubr.msk.bf16.gmra.mxu0 %vm205_vm1, %v9067_v43 }
 0x341   : > { %6698 = vmatprep.mubr.msk.bf16.mxu0 %vm205_vm1, %v9080_v29 }
 0x346   : > { %6661 = vmatmul.mubr.msk.bf16.gmra.mxu1 %vm205_vm1, %v8895_v39 }
 0x347   : > { %6664 = vmatprep.mubr.msk.bf16.mxu1 %vm205_vm1, %v8916_v41 }
 0x348   : > { %6699 = vmatmul.mubr.msk.bf16.gmra.mxu0 %vm205_vm1, %v9085_v63 }
 0x349   : > { %6702 = vmatprep.mubr.msk.bf16.mxu0 %vm205_vm1, %v9098_v54 }
 0x34e   : > { %6665 = vmatmul.mubr.msk.bf16.gmra.mxu1 %vm205_vm1, %v8923_v25 }
 0x34f   : > { %6668 = vmatprep.mubr.msk.bf16.mxu1 %vm205_vm1, %v8939_v9 }
 0x350   : > { %6703 = vmatmul.mubr.msk.bf16.gmra.mxu0 %vm205_vm1, %v9103_v0 }
 0x351   : > { %6706 = vmatprep.mubr.msk.bf16.mxu0 %vm205_vm1, %v9116_v55 }
 0x356   : > { %6669 = vmatmul.mubr.msk.bf16.gmra.mxu1 %vm205_vm1, %v8944_v8 }
 0x357   : > { %6672 = vmatprep.mubr.msk.bf16.mxu1 %vm205_vm1, %v8957_v44 }
 0x358   : > { %6707 = vmatmul.mubr.msk.bf16.gmra.mxu0 %vm205_vm1, %v9189_v50 }
 0x359   : > { %6746 = vmatprep.mubr.msk.bf16.mxu0 %vm205_vm1, %v8774_v22 }
 0x35e   : > { %6673 = vmatmul.mubr.msk.bf16.gmra.mxu1 %vm205_vm1, %v9197_v45 }
 0x35f   : > { %v6544_v10 = vpop.f32.mrf.mxu0  ;;  %6712 = vmatprep.mubr.msk.bf16.mxu1 %vm205_vm1, %v8720_v2 }
 0x360   : > { %6747 = vmatmul.mubr.msk.bf16.vlgmr.msra.gmra.mxu0 %vm205_vm1, %v8804_v31 }
 0x361   : > { %6750 = vmatprep.mubr.msk.bf16.mxu0 %vm205_vm1, %v8811_v19  ;;  %v3526_v36 = vpop.f32.mrf.mxu0 }
 0x363   : > { %v6545_v22 = vpop.f32.mrf.mxu0 }
 0x365   : > { %v3529_v59 = vpop.f32.mrf.mxu0 }
 0x366   : > { %v6510_v57 = vpop.f32.mrf.mxu1  ;;  %6713 = vmatmul.mubr.msk.bf16.vlgmr.msra.gmra.mxu1 %vm205_vm1, %v8734_v46 }
 0x367   : > { %v9210_v30 = vadd.f32 %v6544_v10, %v6510_v57  ;;  %6779 = vmatpush3.bf16.msra.mxu1 %v5022_v40  ;;  %6716 = vmatprep.mubr.msk.bf16.mxu1 %vm205_vm1, %v8742_v3 }
 0x368   : > { %v6548_v2 = vpop.f32.mrf.mxu0  ;;  %6751 = vmatmul.mubr.msk.bf16.gmra.mxu0 %vm205_vm1, %v8832_v16  ;;  %v3330_v31 = vpop.f32.mrf.mxu1 }
 0x369   : > { %v9216_v19 = vadd.f32 %v3526_v36, %v3330_v31  ;;  %6754 = vmatprep.mubr.msk.bf16.mxu0 %vm205_vm1, %v8839_v32 }
 0x36a   : > { %v3542_v42 = vpop.f32.mrf.mxu0  ;;  %v6511_v53 = vpop.f32.mrf.mxu1 }
 0x36b   : > { %v9220_v35 = vadd.f32 %v6545_v22, %v6511_v53 }
 0x36c   : > { %v6549_v46 = vpop.f32.mrf.mxu0  ;;  %v3333_v28 = vpop.f32.mrf.mxu1 }
 0x36d   : > { %v9222_v21 = vadd.f32 %v3529_v59, %v3333_v28 }
 0x36e   : > { %v3545_v13 = vpop.f32.mrf.mxu0  ;;  %v6514_v3 = vpop.f32.mrf.mxu1  ;;  %6717 = vmatmul.mubr.msk.bf16.gmra.mxu1 %vm205_vm1, %v8764_v52 }
 0x36f   : > { %v9226_v16 = vadd.f32 %v6548_v2, %v6514_v3  ;;  %6720 = vmatprep.mubr.msk.bf16.mxu1 %vm205_vm1, %v8776_v12 }
 0x370   : > { %v6552_v5 = vpop.f32.mrf.mxu0  ;;  %6755 = vmatmul.mubr.msk.bf16.gmra.mxu0 %vm205_vm1, %v8860_v6  ;;  %v3346_v32 = vpop.f32.mrf.mxu1 }
 0x371   : > { %v9232_v48 = vadd.f32 %v3542_v42, %v3346_v32  ;;  %6758 = vmatprep.mubr.msk.bf16.mxu0 %vm205_vm1, %v8867_v49  ;;  %v3011_v32 = vld [vmem:[#allocation3 + $0x198] sm:$0xff] }
 0x372   : > { %v3558_v7 = vpop.f32.mrf.mxu0  ;;  %v6515_v14 = vpop.f32.mrf.mxu1 }
 0x373   : > { %v9236_v58 = vadd.f32 %v6549_v46, %v6515_v14 }
 0x374   : > { %v6553_v52 = vpop.f32.mrf.mxu0  ;;  %v3349_v18 = vpop.f32.mrf.mxu1 }
 0x375   : > { %v9238_v26 = vadd.f32 %v3545_v13, %v3349_v18 }
 0x376   : > { %v3561_v10 = vpop.f32.mrf.mxu0  ;;  %v6518_v12 = vpop.f32.mrf.mxu1  ;;  %6721 = vmatmul.mubr.msk.bf16.gmra.mxu1 %vm205_vm1, %v8806_v47 }
 0x377   : > { %v9242_v6 = vadd.f32 %v6552_v5, %v6518_v12  ;;  %6724 = vmatprep.mubr.msk.bf16.mxu1 %vm205_vm1, %v8813_v37 }
 0x378   : > { %v6556_v36 = vpop.f32.mrf.mxu0  ;;  %6759 = vmatmul.mubr.msk.bf16.gmra.mxu0 %vm205_vm1, %v8888_v62  ;;  %v3362_v49 = vpop.f32.mrf.mxu1 }
 0x379   : > { %v9248_v22 = vadd.f32 %v3558_v7, %v3362_v49  ;;  %6762 = vmatprep.mubr.msk.bf16.mxu0 %vm205_vm1, %v8895_v39  ;;  %v3013_v49 = vld [vmem:[#allocation3 + $0x1a8] sm:$0x3] }
 0x37a   : > { %v3574_v40 = vpop.f32.mrf.mxu0  ;;  %v6519_v59 = vpop.f32.mrf.mxu1 }
 0x37b   : > { %v9252_v57 = vadd.f32 %v6553_v52, %v6519_v59 }
 0x37c   : > { %v6557_v47 = vpop.f32.mrf.mxu0  ;;  %v3365_v2 = vpop.f32.mrf.mxu1 }
 0x37d   : > { %v9254_v31 = vadd.f32 %v3561_v10, %v3365_v2 }
 0x37e   : > { %v3577_v42 = vpop.f32.mrf.mxu0  ;;  %v6522_v37 = vpop.f32.mrf.mxu1  ;;  %6725 = vmatmul.mubr.msk.bf16.gmra.mxu1 %vm205_vm1, %v8834_v4 }
 0x37f   : > { %v9258_v62 = vadd.f32 %v6556_v36, %v6522_v37  ;;  %6728 = vmatprep.mubr.msk.bf16.mxu1 %vm205_vm1, %v8841_v23 }
 0x380   : > { %v6560_v53 = vpop.f32.mrf.mxu0  ;;  %6763 = vmatmul.mubr.msk.bf16.gmra.mxu0 %vm205_vm1, %v8916_v41  ;;  %v3378_v39 = vpop.f32.mrf.mxu1  ;;  %v3012_v41 = vld [vmem:[#allocation3 + $0x1a0] sm:$0xff] }
 0x381   : > { %v9264_v46 = vadd.f32 %v3574_v40, %v3378_v39  ;;  %6766 = vmatprep.mubr.msk.bf16.mxu0 %vm205_vm1, %v8923_v25  ;;  %v9278_v25 = vpack.c.bf16 %v3012_v41, %v3011_v32 }
 0x382   : > { %v3590_v28 = vpop.f32.mrf.mxu0  ;;  %v6523_v13 = vpop.f32.mrf.mxu1 }
 0x383   : > { %v9268_v3 = vadd.f32 %v6557_v47, %v6523_v13  ;;  %v4801_v59 = vshll.u32 %v9278_v25, 16 }
 0x384   : > { %v6561_v4 = vpop.f32.mrf.mxu0  ;;  %v3381_v5 = vpop.f32.mrf.mxu1 }
 0x385   : > { %v9270_v7 = vadd.f32 %v3577_v42, %v3381_v5  ;;  %v9291_v42 = vpack.c.bf16 %v3013_v49, %v3013_v49 }
 0x386   : > { %v3593_v23 = vpop.f32.mrf.mxu0  ;;  %v6526_v14 = vpop.f32.mrf.mxu1  ;;  %6729 = vmatmul.mubr.msk.bf16.gmra.mxu1 %vm205_vm1, %v8862_v24 }
 0x387   : > { %v9274_v52 = vadd.f32 %v6560_v53, %v6526_v14  ;;  %6732 = vmatprep.mubr.msk.bf16.mxu1 %vm205_vm1, %v8869_v34 }
 0x388   : > { %v6564_v18 = vpop.f32.mrf.mxu0  ;;  %6767 = vmatmul.mubr.msk.bf16.gmra.mxu0 %vm205_vm1, %v8939_v9  ;;  %v3394_v10 = vpop.f32.mrf.mxu1 }
 0x389   : > { %v9282_v12 = vadd.f32 %v3590_v28, %v3394_v10  ;;  %6770 = vmatprep.mubr.msk.bf16.mxu0 %vm205_vm1, %v8944_v8  ;;  %v4803_v8 = vrot.slane %v4801_v59, 1 }
 0x38a   : > { %v3606_v36 = vpop.f32.mrf.mxu0  ;;  %v6527_v24 = vpop.f32.mrf.mxu1 }
 0x38b   : > { %v9286_v40 = vadd.f32 %v6561_v4, %v6527_v24  ;;  %v4799_v4 = vshrl.u32 %v9278_v25, 16 }
 0x38c   : > { %v6565_v34 = vpop.f32.mrf.mxu0  ;;  %v3397_v47 = vpop.f32.mrf.mxu1 }
 0x38d   : > { %v9289_v2 = vadd.f32 %v3593_v23, %v3397_v47 }
 0x38e   : > { %v3609_v9 = vpop.f32.mrf.mxu0  ;;  %v6530_v37 = vpop.f32.mrf.mxu1  ;;  %6733 = vmatmul.mubr.msk.bf16.gmra.mxu1 %vm205_vm1, %v8890_v38  ;;  %v4806_v38 = vshll.u32 %v9291_v42, 16 }
 0x38f   : > { %v9295_v53 = vadd.f32 %v6564_v18, %v6530_v37  ;;  %6736 = vmatprep.mubr.msk.bf16.mxu1 %vm205_vm1, %v8897_v20  ;;  %v4804_v20 = vor.u32 %v4803_v8, %v4799_v4 }
 0x390   : > { %v6568_v39 = vpop.f32.mrf.mxu0  ;;  %6771 = vmatmul.mubr.msk.bf16.gmra.mxu0 %vm205_vm1, %v8957_v44  ;;  %v3410_v28 = vpop.f32.mrf.mxu1  ;;  %v4808_v44 = vrot.slane %v4806_v38, 1 }
 0x391   : > { %v9301_v13 = vadd.f32 %v3606_v36, %v3410_v28  ;;  %6774 = vmatprep.mubr.msk.bf16.mxu0 %vm205_vm1, %v9197_v45 }
 0x392   : > { %v3622_v5 = vpop.f32.mrf.mxu0  ;;  %v6531_v32 = vpop.f32.mrf.mxu1  ;;  %v4809_v24 = vsel %vm407_vm3, %v4804_v20, %v4808_v44 }
 0x393   : > { %v9307_v23 = vadd.f32 %v6565_v34, %v6531_v32 }
 0x394   : > { %v6569_v14 = vpop.f32.mrf.mxu0  ;;  %v3413_v41 = vpop.f32.mrf.mxu1 }
 0x395   : > { %v9309_v18 = vadd.f32 %v3609_v9, %v3413_v41 }
 0x396   : > { %v3625_v10 = vpop.f32.mrf.mxu0  ;;  %v6534_v36 = vpop.f32.mrf.mxu1  ;;  %6737 = vmatmul.mubr.msk.bf16.gmra.mxu1 %vm205_vm1, %v8918_v15 }
 0x397   : > { %v9313_v45 = vadd.f32 %v6568_v39, %v6534_v36  ;;  %6740 = vmatprep.mubr.msk.bf16.mxu1 %vm205_vm1, %v9105_v17 }
 0x398   : > { %v6572_v49 = vpop.f32.mrf.mxu0  ;;  %6775 = vmatmul.mubr.msk.bf16.gmra.mxu0 %vm205_vm1, %v4809_v24  ;;  %v3426_v59 = vpop.f32.mrf.mxu1 }
 0x399   : > { %v9319_v34 = vadd.f32 %v3622_v5, %v3426_v59 }
 0x39a   : > { %v3638_v47 = vpop.f32.mrf.mxu0  ;;  %v6535_v9 = vpop.f32.mrf.mxu1 }
 0x39b   : > { %v9321_v37 = vadd.f32 %v6569_v14, %v6535_v9 }
 0x39c   : > { %v6573_v8 = vpop.f32.mrf.mxu0  ;;  %v3429_v28 = vpop.f32.mrf.mxu1 }
 0x39d   : > { %v9323_v15 = vadd.f32 %v3625_v10, %v3429_v28 }
 0x39e   : > { %v3641_v39 = vpop.f32.mrf.mxu0  ;;  %v6538_v4 = vpop.f32.mrf.mxu1  ;;  %6741 = vmatmul.mubr.msk.bf16.gmra.mxu1 %vm205_vm1, %v9278_v25 }
 0x39f   : > { %v9327_v17 = vadd.f32 %v6572_v49, %v6538_v4  ;;  %6780 = vmatprep.mubr.msk.bf16.mxu1 %vm205_vm1, %v8993_v27 }
 0x3a0   : > { %v6612_v38 = vpop.f32.mrf.mxu0  ;;  %v3442_v5 = vpop.f32.mrf.mxu1 }
 0x3a1   : > { %v9331_v32 = vadd.f32 %v3638_v47, %v3442_v5 }
 0x3a2   : > { %v4021_v20 = vpop.f32.mrf.mxu0  ;;  %v6539_v14 = vpop.f32.mrf.mxu1 }
 0x3a3   : > { %v9333_v41 = vadd.f32 %v6573_v8, %v6539_v14 }
 0x3a4   : > { %v6613_v44 = vpop.f32.mrf.mxu0  ;;  %v3445_v10 = vpop.f32.mrf.mxu1 }
 0x3a5   : > { %v9335_v36 = vadd.f32 %v3641_v39, %v3445_v10 }
 0x3a6   : > { %v4024_v24 = vpop.f32.mrf.mxu0  ;;  %v6578_v59 = vpop.f32.mrf.mxu1  ;;  %6781 = vmatmul.mubr.msk.bf16.vlgmr.msra.gmra.mxu1 %vm205_vm1, %v9008_v51 }
 0x3a7   : > { %v3949_v49 = vadd.f32 %v6578_v59, %v9210_v30  ;;  %6784 = vmatprep.mubr.msk.bf16.mxu1 %vm205_vm1, %v9013_v61 }
 0x3a8   : > { %v6616_v27 = vpop.f32.mrf.mxu0  ;;  %v3820_v47 = vpop.f32.mrf.mxu1 }
 0x3a9   : > { %v3947_v9 = vadd.f32 %v3820_v47, %v9216_v19  ;;  %v9343_v8 = vadd.f32 %v6612_v38, %v3949_v49 }
 0x3aa   : > { %v4037_v28 = vpop.f32.mrf.mxu0  ;;  %v6579_v4 = vpop.f32.mrf.mxu1 }
 0x3ab   : > { %v3950_v39 = vadd.f32 %v6579_v4, %v9220_v35  ;;  %v9346_v5 = vadd.f32 %v4021_v20, %v3947_v9 }
 0x3ac   : > { %v6617_v14 = vpop.f32.mrf.mxu0  ;;  %v3823_v10 = vpop.f32.mrf.mxu1 }
 0x3ad   : > { %v3948_v51 = vadd.f32 %v3823_v10, %v9222_v21  ;;  %v9349_v30 = vadd.f32 %v6613_v44, %v3950_v39 }
 0x3ae   : > { %v4040_v59 = vpop.f32.mrf.mxu0  ;;  %v6582_v61 = vpop.f32.mrf.mxu1  ;;  %6785 = vmatmul.mubr.msk.bf16.gmra.mxu1 %vm205_vm1, %v9026_v60 }
 0x3af   : > { %v3953_v19 = vadd.f32 %v6582_v61, %v9226_v16  ;;  %6788 = vmatprep.mubr.msk.bf16.mxu1 %vm205_vm1, %v9031_v11  ;;  %v9356_v38 = vadd.f32 %v4024_v24, %v3948_v51 }
 0x3b0   : > { %v6620_v35 = vpop.f32.mrf.mxu0  ;;  %v3836_v20 = vpop.f32.mrf.mxu1 }
 0x3b1   : > { %v3951_v49 = vadd.f32 %v3836_v20, %v9232_v48  ;;  %v9359_v47 = vadd.f32 %v6616_v27, %v3953_v19 }
 0x3b2   : > { %v4053_v21 = vpop.f32.mrf.mxu0  ;;  %v6583_v44 = vpop.f32.mrf.mxu1 }
 0x3b3   : > { %v3954_v9 = vadd.f32 %v6583_v44, %v9236_v58  ;;  %v9362_v4 = vadd.f32 %v4037_v28, %v3951_v49 }
 0x3b4   : > { %v6621_v60 = vpop.f32.mrf.mxu0  ;;  %v3839_v39 = vpop.f32.mrf.mxu1 }
 0x3b5   : > { %v3952_v16 = vadd.f32 %v3839_v39, %v9238_v26  ;;  %v9365_v10 = vadd.f32 %v6617_v14, %v3954_v9 }
 0x3b6   : > { %v4056_v11 = vpop.f32.mrf.mxu0  ;;  %v6586_v24 = vpop.f32.mrf.mxu1  ;;  %6789 = vmatmul.mubr.msk.bf16.gmra.mxu1 %vm205_vm1, %v9044_v56 }
 0x3b7   : > { %v3957_v48 = vadd.f32 %v6586_v24, %v9242_v6  ;;  %6792 = vmatprep.mubr.msk.bf16.mxu1 %vm205_vm1, %v9049_v33  ;;  %v9372_v27 = vadd.f32 %v4040_v59, %v3952_v16 }
 0x3b8   : > { %v6624_v58 = vpop.f32.mrf.mxu0  ;;  %v3852_v28 = vpop.f32.mrf.mxu1 }
 0x3b9   : > { %v3955_v51 = vadd.f32 %v3852_v28, %v9248_v22  ;;  %v9375_v61 = vadd.f32 %v6620_v35, %v3957_v48 }
 0x3ba   : > { %v4069_v26 = vpop.f32.mrf.mxu0  ;;  %v6587_v14 = vpop.f32.mrf.mxu1 }
 0x3bb   : > { %v3958_v19 = vadd.f32 %v6587_v14, %v9252_v57  ;;  %v9378_v20 = vadd.f32 %v4053_v21, %v3955_v51 }
 0x3bc   : > { %v6625_v56 = vpop.f32.mrf.mxu0  ;;  %v3855_v49 = vpop.f32.mrf.mxu1 }
 0x3bd   : > { %v3956_v6 = vadd.f32 %v3855_v49, %v9254_v31  ;;  %v9381_v44 = vadd.f32 %v6621_v60, %v3958_v19 }
 0x3be   : > { %v4072_v33 = vpop.f32.mrf.mxu0  ;;  %v6590_v59 = vpop.f32.mrf.mxu1  ;;  %6793 = vmatmul.mubr.msk.bf16.gmra.mxu1 %vm205_vm1, %v9062_v1 }
 0x3bf   : > { %v3961_v22 = vadd.f32 %v6590_v59, %v9258_v62  ;;  %6796 = vmatprep.mubr.msk.bf16.mxu1 %vm205_vm1, %v9067_v43  ;;  %v9388_v35 = vadd.f32 %v4056_v11, %v3956_v6 }
 0x3c0   : > { %v6628_v57 = vpop.f32.mrf.mxu0  ;;  %v3868_v21 = vpop.f32.mrf.mxu1 }
 0x3c1   : > { %v3959_v9 = vadd.f32 %v3868_v21, %v9264_v46  ;;  %v9391_v39 = vadd.f32 %v6624_v58, %v3961_v22 }
 0x3c2   : > { %v4085_v31 = vpop.f32.mrf.mxu0  ;;  %v6591_v60 = vpop.f32.mrf.mxu1 }
 0x3c3   : > { %v3962_v16 = vadd.f32 %v6591_v60, %v9268_v3  ;;  %v9394_v24 = vadd.f32 %v4069_v26, %v3959_v9 }
 0x3c4   : > { %v6629_v1 = vpop.f32.mrf.mxu0  ;;  %v3871_v48 = vpop.f32.mrf.mxu1 }
 0x3c5   : > { %v3960_v62 = vadd.f32 %v3871_v48, %v9270_v7  ;;  %v9397_v28 = vadd.f32 %v6625_v56, %v3962_v16 }
 0x3c6   : > { %v4088_v43 = vpop.f32.mrf.mxu0  ;;  %v6594_v11 = vpop.f32.mrf.mxu1  ;;  %6797 = vmatmul.mubr.msk.bf16.gmra.mxu1 %vm205_vm1, %v9080_v29 }
 0x3c7   : > { %v3965_v46 = vadd.f32 %v6594_v11, %v9274_v52  ;;  %6800 = vmatprep.mubr.msk.bf16.mxu1 %vm205_vm1, %v9085_v63  ;;  %v9404_v58 = vadd.f32 %v4072_v33, %v3960_v62 }
 0x3c8   : > { %v6632_v3 = vpop.f32.mrf.mxu0  ;;  %v3884_v51 = vpop.f32.mrf.mxu1 }
 0x3c9   : > { %v3963_v26 = vadd.f32 %v3884_v51, %v9282_v12  ;;  %v9407_v14 = vadd.f32 %v6628_v57, %v3965_v46 }
 0x3ca   : > { %v4101_v7 = vpop.f32.mrf.mxu0  ;;  %v6595_v19 = vpop.f32.mrf.mxu1 }
 0x3cb   : > { %v3966_v56 = vadd.f32 %v6595_v19, %v9286_v40  ;;  %v9410_v49 = vadd.f32 %v4085_v31, %v3963_v26 }
 0x3cc   : > { %v6633_v29 = vpop.f32.mrf.mxu0  ;;  %v3887_v6 = vpop.f32.mrf.mxu1 }
 0x3cd   : > { %v3964_v52 = vadd.f32 %v3887_v6, %v9289_v2  ;;  %v9413_v59 = vadd.f32 %v6629_v1, %v3966_v56 }
 0x3ce   : > { %v4104_v63 = vpop.f32.mrf.mxu0  ;;  %v6598_v33 = vpop.f32.mrf.mxu1  ;;  %6801 = vmatmul.mubr.msk.bf16.gmra.mxu1 %vm205_vm1, %v9098_v54 }
 0x3cf   : > { %v3969_v12 = vadd.f32 %v6598_v33, %v9295_v53  ;;  %6804 = vmatprep.mubr.msk.bf16.mxu1 %vm205_vm1, %v9103_v0  ;;  %v9420_v22 = vadd.f32 %v4088_v43, %v3964_v52 }
 0x3d0   : > { %v6636_v40 = vpop.f32.mrf.mxu0  ;;  %v3900_v57 = vpop.f32.mrf.mxu1 }
 0x3d1   : > { %v3967_v21 = vadd.f32 %v3900_v57, %v9301_v13  ;;  %v9423_v9 = vadd.f32 %v6632_v3, %v3969_v12  ;;  %v5014_v3 = vrot.slane %v9291_v42, 1 }
 0x3d2   : > { %v4117_v2 = vpop.f32.mrf.mxu0  ;;  %v6599_v31 = vpop.f32.mrf.mxu1 }
 0x3d3   : > { %v3970_v60 = vadd.f32 %v6599_v31, %v9307_v23  ;;  %v9426_v16 = vadd.f32 %v4101_v7, %v3967_v21 }
 0x3d4   : > { %v6637_v54 = vpop.f32.mrf.mxu0  ;;  %v3903_v1 = vpop.f32.mrf.mxu1 }
 0x3d5   : > { %v3968_v53 = vadd.f32 %v3903_v1, %v9309_v18  ;;  %v9429_v48 = vadd.f32 %v6633_v29, %v3970_v60  ;;  %v5013_v18 = vrot.slane %v9278_v25, 1 }
 0x3d6   : > { %v4120_v0 = vpop.f32.mrf.mxu0  ;;  %v6602_v62 = vpop.f32.mrf.mxu1  ;;  %6805 = vmatmul.mubr.msk.bf16.gmra.mxu1 %vm205_vm1, %v9116_v55 }
 0x3d7   : > { %v3973_v13 = vadd.f32 %v6602_v62, %v9313_v45  ;;  %6808 = vmatprep.mubr.msk.bf16.mxu1 %vm205_vm1, %v9189_v50  ;;  %v9436_v43 = vadd.f32 %v4104_v63, %v3968_v53  ;;  %v5015_v29 = vsel %vm1043_vm4, %v5013_v18, %v5014_v3 }
 0x3d8   : > { %v6640_v23 = vpop.f32.mrf.mxu0  ;;  %v3916_v11 = vpop.f32.mrf.mxu1 }
 0x3d9   : > { %v3971_v46 = vadd.f32 %v3916_v11, %v9319_v34  ;;  %v9441_v51 = vadd.f32 %v6636_v40, %v3973_v13 }
 0x3da   : > { %v4133_v26 = vpop.f32.mrf.mxu0  ;;  %v6603_v7 = vpop.f32.mrf.mxu1 }
 0x3db   : > { %v3974_v55 = vadd.f32 %v6603_v7, %v9321_v37  ;;  %v9444_v45 = vadd.f32 %v4117_v2, %v3971_v46 }
 0x3dc   : > { %v6641_v19 = vpop.f32.mrf.mxu0  ;;  %v3919_v50 = vpop.f32.mrf.mxu1 }
 0x3dd   : > { %v3972_v56 = vadd.f32 %v3919_v50, %v9323_v15  ;;  %v9448_v6 = vadd.f32 %v6637_v54, %v3974_v55 }
 0x3de   : > { %v4136_v34 = vpop.f32.mrf.mxu0  ;;  %v6606_v25 = vpop.f32.mrf.mxu1  ;;  %6809 = vmatmul.mubr.msk.bf16.gmra.mxu1 %vm205_vm1, %v5015_v29 }
 0x3df   : > { %v3977_v42 = vadd.f32 %v6606_v25, %v9327_v17  ;;  %v9452_v52 = vadd.f32 %v4120_v0, %v3972_v56 }
 0x3e0   : > { %v6680_v63 = vpop.f32.mrf.mxu0  ;;  %v3932_v37 = vpop.f32.mrf.mxu1 }
 0x3e1   : > { %v3975_v33 = vadd.f32 %v3932_v37, %v9331_v32  ;;  %v9455_v12 = vadd.f32 %v6640_v23, %v3977_v42 }
 0x3e2   : > { %v4439_v40 = vpop.f32.mrf.mxu0  ;;  %v6607_v15 = vpop.f32.mrf.mxu1 }
 0x3e3   : > { %v3978_v57 = vadd.f32 %v6607_v15, %v9333_v41  ;;  %v9458_v21 = vadd.f32 %v4133_v26, %v3975_v33 }
 0x3e4   : > { %v6681_v2 = vpop.f32.mrf.mxu0  ;;  %v3935_v31 = vpop.f32.mrf.mxu1 }
 0x3e5   : > { %v3976_v60 = vadd.f32 %v3935_v31, %v9335_v36  ;;  %v9461_v54 = vadd.f32 %v6641_v19, %v3978_v57 }
 0x3e6   : > { %v9463_v17 = vpop.f32.mrf.mxu0  ;;  %v6646_v1 = vpop.f32.mrf.mxu1 }
 0x3e7   : > { %v4362_v53 = vadd.f32 %v6646_v1, %v9343_v8  ;;  %v9466_v32 = vadd.f32 %v4136_v34, %v3976_v60 }
 0x3e8   : > { %v6684_v0 = vpop.f32.mrf.mxu0  ;;  %v4233_v62 = vpop.f32.mrf.mxu1 }
 0x3e9   : > { %v4360_v13 = vadd.f32 %v4233_v62, %v9346_v5  ;;  %v9469_v41 = vadd.f32 %v6680_v63, %v4362_v53 }
 0x3ea   : > { %v9471_v23 = vpop.f32.mrf.mxu0  ;;  %v6647_v11 = vpop.f32.mrf.mxu1 }
 0x3eb   : > { %v4363_v36 = vadd.f32 %v6647_v11, %v9349_v30  ;;  %v9474_v46 = vadd.f32 %v4439_v40, %v4360_v13 }
 0x3ec   : > { %v6685_v18 = vpop.f32.mrf.mxu0  ;;  %v4236_v3 = vpop.f32.mrf.mxu1 }
 0x3ed   : > { %v9477_v26 = vadd.f32 %v4236_v3, %v9356_v38  ;;  %v9479_v8 = vadd.f32 %v6681_v2, %v4363_v36 }
 0x3ee   : > { %v9481_v7 = vpop.f32.mrf.mxu0  ;;  %v6650_v55 = vpop.f32.mrf.mxu1 }
 0x3ef   : > { %v4366_v5 = vadd.f32 %v6650_v55, %v9359_v47 }
 0x3f0   : > { %v6688_v19 = vpop.f32.mrf.mxu0  ;;  %v4249_v50 = vpop.f32.mrf.mxu1 }
 0x3f1   : > { %v9485_v56 = vadd.f32 %v4249_v50, %v9362_v4  ;;  %v9487_v30 = vadd.f32 %v6684_v0, %v4366_v5 }
 0x3f2   : > { %v9489_v29 = vpop.f32.mrf.mxu0  ;;  %v6651_v34 = vpop.f32.mrf.mxu1 }
 0x3f3   : > { %v4367_v38 = vadd.f32 %v6651_v34, %v9365_v10 }
 0x3f4   : > { %v6689_v25 = vpop.f32.mrf.mxu0  ;;  %v4252_v42 = vpop.f32.mrf.mxu1 }
 0x3f5   : > { %v9493_v63 = vadd.f32 %v4252_v42, %v9372_v27  ;;  %v9495_v37 = vadd.f32 %v6685_v18, %v4367_v38 }
 0x3f6   : > { %v9497_v47 = vpop.f32.mrf.mxu0  ;;  %v6654_v33 = vpop.f32.mrf.mxu1 }
 0x3f7   : > { %v4370_v4 = vadd.f32 %v6654_v33, %v9375_v61 }
 0x3f8   : > { %v6692_v40 = vpop.f32.mrf.mxu0  ;;  %v4265_v15 = vpop.f32.mrf.mxu1 }
 0x3f9   : > { %v9501_v57 = vadd.f32 %v4265_v15, %v9378_v20  ;;  %v9503_v2 = vadd.f32 %v6688_v19, %v4370_v4 }
 0x3fa   : > { %v9505_v10 = vpop.f32.mrf.mxu0  ;;  %v6655_v31 = vpop.f32.mrf.mxu1 }
 0x3fb   : > { %v4371_v27 = vadd.f32 %v6655_v31, %v9381_v44 }
 0x3fc   : > { %v6693_v60 = vpop.f32.mrf.mxu0  ;;  %v4268_v1 = vpop.f32.mrf.mxu1 }
 0x3fd   : > { %v9509_v53 = vadd.f32 %v4268_v1, %v9388_v35  ;;  %v9511_v0 = vadd.f32 %v6689_v25, %v4371_v27 }
 0x3fe   : > { %v9513_v61 = vpop.f32.mrf.mxu0  ;;  %v6658_v62 = vpop.f32.mrf.mxu1 }
 0x3ff   : > { %v4374_v20 = vadd.f32 %v6658_v62, %v9391_v39 }
 0x400   : > { %v6696_v13 = vpop.f32.mrf.mxu0  ;;  %v4281_v11 = vpop.f32.mrf.mxu1 }
 0x401   : > { %v9517_v36 = vadd.f32 %v4281_v11, %v9394_v24  ;;  %v9519_v18 = vadd.f32 %v6692_v40, %v4374_v20 }
 0x402   : > { %v9521_v44 = vpop.f32.mrf.mxu0  ;;  %v6659_v3 = vpop.f32.mrf.mxu1 }
 0x403   : > { %v4375_v35 = vadd.f32 %v6659_v3, %v9397_v28 }
 0x404   : > { %v6697_v55 = vpop.f32.mrf.mxu0  ;;  %v4284_v5 = vpop.f32.mrf.mxu1 }
 0x405   : > { %v9525_v19 = vadd.f32 %v4284_v5, %v9404_v58  ;;  %v9527_v50 = vadd.f32 %v6693_v60, %v4375_v35 }
 0x406   : > { %v9529_v39 = vpop.f32.mrf.mxu0  ;;  %v6662_v34 = vpop.f32.mrf.mxu1 }
 0x407   : > { %v4378_v24 = vadd.f32 %v6662_v34, %v9407_v14 }
 0x408   : > { %v6700_v38 = vpop.f32.mrf.mxu0  ;;  %v4297_v25 = vpop.f32.mrf.mxu1 }
 0x409   : > { %v9533_v42 = vadd.f32 %v4297_v25, %v9410_v49  ;;  %v9535_v33 = vadd.f32 %v6696_v13, %v4378_v24 }
 0x40a   : > { %v9537_v28 = vpop.f32.mrf.mxu0  ;;  %v6663_v4 = vpop.f32.mrf.mxu1 }
 0x40b   : > { %10373 = vst [vmem:[#allocation37_spill] sm:$0xff] %v9537_v28  ;;  %v4379_v58 = vadd.f32 %v6663_v4, %v9413_v59 }
 0x40c   : > { %v6701_v40 = vpop.f32.mrf.mxu0  ;;  %v4300_v15 = vpop.f32.mrf.mxu1 }
 0x40d   : > { %v9541_v31 = vadd.f32 %v4300_v15, %v9420_v22  ;;  %v9543_v27 = vadd.f32 %v6697_v55, %v4379_v58 }
 0x40e   : > { %v9545_v14 = vpop.f32.mrf.mxu0  ;;  %v6666_v60 = vpop.f32.mrf.mxu1 }
 0x40f   : > { %10374 = vst [vmem:[#allocation36_spill] sm:$0xff] %v9545_v14  ;;  %v4382_v49 = vadd.f32 %v6666_v60, %v9423_v9 }
 0x410   : > { %v6704_v1 = vpop.f32.mrf.mxu0  ;;  %v4313_v62 = vpop.f32.mrf.mxu1 }
 0x411   : > { %v9549_v20 = vadd.f32 %v4313_v62, %v9426_v16  ;;  %v9551_v13 = vadd.f32 %v6700_v38, %v4382_v49 }
 0x412   : > { %v9553_v59 = vpop.f32.mrf.mxu0  ;;  %v6667_v11 = vpop.f32.mrf.mxu1 }
 0x413   : > { %10375 = vst [vmem:[#allocation39_spill] sm:$0xff] %v9553_v59  ;;  %v4383_v22 = vadd.f32 %v6667_v11, %v9429_v48 }
 0x414   : > { %v6705_v3 = vpop.f32.mrf.mxu0  ;;  %v4316_v35 = vpop.f32.mrf.mxu1 }
 0x415   : > { %v9557_v55 = vadd.f32 %v4316_v35, %v9436_v43  ;;  %v9559_v5 = vadd.f32 %v6701_v40, %v4383_v22 }
 0x416   : > { %v9561_v9 = vpop.f32.mrf.mxu0  ;;  %v6670_v34 = vpop.f32.mrf.mxu1 }
 0x417   : > { %10376 = vst [vmem:[#allocation38_spill] sm:$0xff] %v9557_v55  ;;  %10377 = vst [vmem:[#allocation40_spill] sm:$0xff] %v9561_v9  ;;  %v4386_v16 = vadd.f32 %v6670_v34, %v9441_v51 }
 0x418   : > { %v6708_v24 = vpop.f32.mrf.mxu0  ;;  %v4329_v38 = vpop.f32.mrf.mxu1 }
 0x419   : > { %v9565_v25 = vadd.f32 %v4329_v38, %v9444_v45  ;;  %v9567_v4 = vadd.f32 %v6704_v1, %v4386_v16 }
 0x41a   : > { %v9569_v48 = vpop.f32.mrf.mxu0  ;;  %v6671_v58 = vpop.f32.mrf.mxu1 }
 0x41b   : > { %10378 = vst [vmem:[#allocation43_spill] sm:$0xff] %v9565_v25  ;;  %10379 = vst [vmem:[#allocation41_spill] sm:$0xff] %v9569_v48  ;;  %v4387_v43 = vadd.f32 %v6671_v58, %v9448_v6 }
 0x41c   : > { %v4332_v15 = vpop.f32.mrf.mxu1  ;;  %v6709_v40 = vpop.f32.mrf.mxu0 }
 0x41d   : > { %v9573_v60 = vadd.f32 %v4332_v15, %v9452_v52  ;;  %v9575_v49 = vadd.f32 %v6705_v3, %v4387_v43 }
 0x41e   : > { %v6674_v51 = vpop.f32.mrf.mxu1  ;;  %v9578_v45 = vpop.f32.mrf.mxu0 }
 0x41f   : > { %10380 = vst [vmem:[#allocation42_spill] sm:$0xff] %v9573_v60  ;;  %v4390_v62 = vadd.f32 %v6674_v51, %v9455_v12  ;;  %10381 = vst [vmem:[#allocation46_spill] sm:$0xff] %v9578_v45 }
 0x420   : > { %v4345_v11 = vpop.f32.mrf.mxu1  ;;  %v9586_v16 = vpop.f32.mrf.mxu0 }
 0x421   : > { %v9581_v1 = vadd.f32 %v4345_v11, %v9458_v21  ;;  %v9583_v22 = vadd.f32 %v6708_v24, %v4390_v62 }
 0x422   : > { %v6675_v35 = vpop.f32.mrf.mxu1  ;;  %v9596_v21 = vpop.f32.mrf.mxu0 }
 0x423   : > { %10382 = vst [vmem:[#allocation44_spill] sm:$0xff] %v9581_v1  ;;  %v4391_v6 = vadd.f32 %v6675_v35, %v9461_v54 }
 0x424   : > { %v4348_v34 = vpop.f32.mrf.mxu1  ;;  %v9604_v51 = vpop.f32.mrf.mxu0 }
 0x425   : > { %v9589_v52 = vadd.f32 %v4348_v34, %v9466_v32  ;;  %v9591_v3 = vadd.f32 %v6709_v40, %v4391_v6 }
 0x426   : > { %v6714_v12 = vpop.f32.mrf.mxu1 }
 0x427   : > { %10383 = vst [vmem:[#allocation45_spill] sm:$0xff] %v9589_v52  ;;  %v9594_v38 = vadd.f32 %v6714_v12, %v9469_v41  ;;  %v9611_v41 = vpop.f32.mrf.mxu0 }
 0x428   : > { %v4640_v58 = vpop.f32.mrf.mxu1 }
 0x429   : > { %v9599_v24 = vadd.f32 %v4640_v58, %v9474_v46  ;;  %v9618_v6 = vpop.f32.mrf.mxu0 }
 0x42a   : > { %v6715_v43 = vpop.f32.mrf.mxu1 }
 0x42b   : > { %v9602_v54 = vadd.f32 %v6715_v43, %v9479_v8 }
 0x42c   : > { %v4643_v15 = vpop.f32.mrf.mxu1 }
 0x42e   : > { %v6718_v32 = vpop.f32.mrf.mxu1 }
 0x42f   : > { %v9607_v40 = vadd.f32 %v6718_v32, %v9487_v30  ;;  %v9625_v30 = vpop.f32.mrf.mxu0 }
 0x430   : > { %v9609_v62 = vpop.f32.mrf.mxu1 }
 0x432   : > { %v6719_v11 = vpop.f32.mrf.mxu1 }
 0x433   : > { %v9614_v35 = vadd.f32 %v6719_v11, %v9495_v37  ;;  %v9632_v37 = vpop.f32.mrf.mxu0 }
 0x434   : > { %v9616_v46 = vpop.f32.mrf.mxu1 }
 0x436   : > { %v6722_v8 = vpop.f32.mrf.mxu1 }
 0x437   : > { %v9621_v34 = vadd.f32 %v6722_v8, %v9503_v2  ;;  %v9639_v2 = vpop.f32.mrf.mxu0 }
 0x438   : > { %v9623_v12 = vpop.f32.mrf.mxu1 }
 0x43a   : > { %v6723_v58 = vpop.f32.mrf.mxu1 }
 0x43b   : > { %v9628_v43 = vadd.f32 %v6723_v58, %v9511_v0  ;;  %v9646_v0 = vpop.f32.mrf.mxu0 }
 0x43c   : > { %v9630_v32 = vpop.f32.mrf.mxu1 }
 0x43e   : > { %v6726_v11 = vpop.f32.mrf.mxu1 }
 0x43f   : > { %v9635_v45 = vadd.f32 %v6726_v11, %v9519_v18  ;;  %v9653_v18 = vpop.f32.mrf.mxu0 }
 0x440   : > { %v9637_v52 = vpop.f32.mrf.mxu1 }
 0x442   : > { %v6727_v8 = vpop.f32.mrf.mxu1 }
 0x443   : > { %v9642_v48 = vadd.f32 %v6727_v8, %v9527_v50  ;;  %v9660_v50 = vpop.f32.mrf.mxu0 }
 0x444   : > { %v9644_v1 = vpop.f32.mrf.mxu1 }
 0x446   : > { %v6730_v58 = vpop.f32.mrf.mxu1 }
 0x447   : > { %v9649_v9 = vadd.f32 %v6730_v58, %v9535_v33  ;;  %v9667_v33 = vpop.f32.mrf.mxu0 }
 0x448   : > { %v9651_v60 = vpop.f32.mrf.mxu1 }
 0x449   : > { %10384 = vst [vmem:[#allocation62_spill] sm:$0xff] %v9649_v9 }
 0x44a   : > { %v6731_v11 = vpop.f32.mrf.mxu1 }
 0x44b   : > { %v9656_v59 = vadd.f32 %v6731_v11, %v9543_v27  ;;  %v9674_v27 = vpop.f32.mrf.mxu0 }
 0x44c   : > { %v9658_v25 = vpop.f32.mrf.mxu1 }
 0x44d   : > { %10385 = vst [vmem:[#allocation64_spill] sm:$0xff] %v9656_v59  ;;  %10386 = vst [vmem:[#allocation49_spill] sm:$0xff] %v9658_v25 }
 0x44e   : > { %v6734_v8 = vpop.f32.mrf.mxu1 }
 0x44f   : > { %v9663_v14 = vadd.f32 %v6734_v8, %v9551_v13  ;;  %v9681_v13 = vpop.f32.mrf.mxu0 }
 0x450   : > { %v9665_v55 = vpop.f32.mrf.mxu1 }
 0x451   : > { %10387 = vst [vmem:[#allocation47_spill] sm:$0xff] %v9663_v14  ;;  %10388 = vst [vmem:[#allocation48_spill] sm:$0xff] %v9665_v55 }
 0x452   : > { %v6735_v58 = vpop.f32.mrf.mxu1 }
 0x453   : > { %v9670_v9 = vadd.f32 %v6735_v58, %v9559_v5  ;;  %v9688_v5 = vpop.f32.mrf.mxu0 }
 0x454   : > { %v9672_v28 = vpop.f32.mrf.mxu1 }
 0x455   : > { %10389 = vst [vmem:[#allocation66_spill] sm:$0xff] %v9670_v9  ;;  %10390 = vst [vmem:[#allocation63_spill] sm:$0xff] %v9672_v28 }
 0x456   : > { %v6738_v11 = vpop.f32.mrf.mxu1 }
 0x457   : > { %v9677_v59 = vadd.f32 %v6738_v11, %v9567_v4  ;;  %v9695_v4 = vpop.f32.mrf.mxu0 }
 0x458   : > { %v9679_v25 = vpop.f32.mrf.mxu1 }
 0x459   : > { %10391 = vst [vmem:[#allocation65_spill] sm:$0xff] %v9677_v59  ;;  %10392 = vst [vmem:[#allocation68_spill] sm:$0xff] %v9679_v25 }
 0x45a   : > { %v6739_v8 = vpop.f32.mrf.mxu1 }
 0x45b   : > { %v9684_v14 = vadd.f32 %v6739_v8, %v9575_v49  ;;  %v4567_v49 = vadd.f32 %v9463_v17, %v9477_v26  ;;  %v9704_v8 = vpop.f32.mrf.mxu0 }
 0x45c   : > { %v9686_v55 = vpop.f32.mrf.mxu1 }
 0x45d   : > { %10393 = vst [vmem:[#allocation52_spill] sm:$0xff] %v9684_v14  ;;  %10394 = vst [vmem:[#allocation50_spill] sm:$0xff] %v9686_v55  ;;  %v4768_v55 = vadd.f32 %v4643_v15, %v4567_v49  ;;  %v4982_v15 = vadd.f32 %v9604_v51, %v9602_v54  ;;  %v4574_v54 = vadd.f32 %v9489_v29, %v9501_v57 }
 0x45e   : > { %v6742_v58 = vpop.f32.mrf.mxu1  ;;  %v4985_v29 = vadd.f32 %v9618_v6, %v9607_v40 }
 0x45f   : > { %v9691_v9 = vadd.f32 %v6742_v58, %v9583_v22  ;;  %v4979_v22 = vadd.f32 %v9596_v21, %v9599_v24  ;;  %v4570_v58 = vadd.f32 %v9471_v23, %v9485_v56  ;;  %v4980_v21 = vadd.f32 %v9611_v41, %v4768_v55 }
 0x460   : > { %v9693_v28 = vpop.f32.mrf.mxu1  ;;  %v4571_v23 = vadd.f32 %v9481_v7, %v9493_v63 }
 0x461   : > { %10395 = vst [vmem:[#allocation54_spill] sm:$0xff] %v9691_v9  ;;  %10396 = vst [vmem:[#allocation70_spill] sm:$0xff] %v9693_v28  ;;  %v9710_v28 = vpop.f32.mrf.mxu0  ;;  %v4771_v17 = vadd.f32 %v9609_v62, %v4570_v58 }
 0x462   : > { %v6743_v11 = vpop.f32.mrf.mxu1 }
 0x463   : > { %v9698_v59 = vadd.f32 %v6743_v11, %v9591_v3  ;;  %v4981_v3 = vadd.f32 %v9586_v16, %v9594_v38  ;;  %v9724_v24 = vpop.f32.mrf.mxu0  ;;  %v4983_v55 = vadd.f32 %v9625_v30, %v4771_v17  ;;  %v4986_v30 = vadd.f32 %v9632_v37, %v9614_v35 }
 0x464   : > { %v9700_v25 = vpop.f32.mrf.mxu1 }
 0x465   : > { %10397 = vst [vmem:[#allocation67_spill] sm:$0xff] %v9698_v59 }
 0x466   : > { %v6782_v14 = vpop.f32.mrf.mxu1 }
 0x467   : > { %v9717_v59 = vadd.f32 %v6782_v14, %v4981_v3  ;;  %v4772_v14 = vadd.f32 %v9616_v46, %v4571_v23 }
 0x468   : > { %v5058_v9 = vpop.f32.mrf.mxu1 }
 0x469   : > { %v9714_v11 = vadd.f32 %v5058_v9, %v4979_v22  ;;  %v5289_v7 = vmul.f32 %v9717_v59, %v9717_v59  ;;  %v5220_v46 = vsel %vm205_vm1, %v9717_v59, 0.0  ;;  %v9750_v22 = vpop.f32.mrf.mxu0  ;;  %v4984_v6 = vadd.f32 %v9639_v2, %v4772_v14 }
 0x46a   : > { %v6783_v26 = vpop.f32.mrf.mxu1 }
 0x46b   : > { %v5287_v9 = vmul.f32 %v9714_v11, %v9714_v11  ;;  %v9728_v16 = vadd.f32 %v6783_v26, %v4982_v15  ;;  %v5217_v63 = vsel %vm205_vm1, %v9714_v11, 0.0  ;;  %v4775_v15 = vadd.f32 %v9623_v12, %v4574_v54  ;;  %v9771_v2 = vpop.f32.mrf.mxu0 }
 0x46c   : > { %v5061_v56 = vpop.f32.mrf.mxu1  ;;  %v5322_v35 = vsel %vm205_vm1, %v5289_v7, 0.0  ;;  %v4578_v12 = vadd.f32 %v9505_v10, %v9517_v36 }
 0x46d   : > { %v9730_v38 = vadd.f32 %v5061_v56, %v4980_v21  ;;  %v5319_v58 = vsel %vm205_vm1, %v5287_v9, 0.0  ;;  %v5290_v3 = vmul.f32 %v9728_v16, %v9728_v16  ;;  %v5222_v37 = vsel %vm205_vm1, %v9728_v16, 0.0 }
 0x46e   : > { %v6786_v51 = vpop.f32.mrf.mxu1  ;;  %v4987_v10 = vadd.f32 %v9653_v18, %v4775_v15  ;;  %v4990_v18 = vadd.f32 %v9660_v50, %v9628_v43  ;;  %v9793_v15 = vpop.f32.mrf.mxu0 }
 0x46f   : > { %v5218_v62 = vsel %vm205_vm1, %v9730_v38, 0.0  ;;  %v5288_v41 = vmul.f32 %v9730_v38, %v9730_v38  ;;  %v9763_v56 = vadd.f32 %v6786_v51, %v4985_v29  ;;  %v5324_v14 = vsel %vm205_vm1, %v5290_v3, 0.0 }
 0x470   : > { %v5219_v49 = vadd.f32 %v5218_v62, %v5217_v63  ;;  %v5074_v57 = vpop.f32.mrf.mxu1 }
 0x471   : > { %v5320_v17 = vsel %vm205_vm1, %v5288_v41, 0.0  ;;  %v9756_v26 = vadd.f32 %v5074_v57, %v4983_v55  ;;  %v4575_v55 = vadd.f32 %v9497_v47, %v9509_v53  ;;  %v5293_v36 = vmul.f32 %v9763_v56, %v9763_v56 }
 0x472   : > { %v5221_v21 = vadd.f32 %v5220_v46, %v5219_v49  ;;  %v5321_v23 = vadd.f32 %v5320_v17, %v5319_v58  ;;  %v6787_v40 = vpop.f32.mrf.mxu1 }
 0x473   : > { %v5291_v9 = vmul.f32 %v9756_v26, %v9756_v26  ;;  %v5224_v51 = vsel %vm205_vm1, %v9756_v26, 0.0  ;;  %v9776_v7 = vadd.f32 %v6787_v40, %v4986_v30  ;;  %v4776_v46 = vadd.f32 %v9630_v32, %v4575_v55 }
 0x474   : > { %v5323_v54 = vadd.f32 %v5322_v35, %v5321_v23  ;;  %v5223_v63 = vadd.f32 %v5222_v37, %v5221_v21  ;;  %v5077_v62 = vpop.f32.mrf.mxu1  ;;  %v4989_v32 = vadd.f32 %v9646_v0, %v9621_v34  ;;  %v5228_v21 = vsel %vm205_vm1, %v9763_v56, 0.0 }
 0x475   : > { %v9778_v41 = vadd.f32 %v5077_v62, %v4984_v6  ;;  %v5326_v29 = vsel %vm205_vm1, %v5291_v9, 0.0  ;;  %v5294_v23 = vmul.f32 %v9776_v7, %v9776_v7  ;;  %v4779_v35 = vadd.f32 %v9637_v52, %v4578_v12 }
 0x476   : > { %v5225_v47 = vadd.f32 %v5224_v51, %v5223_v63  ;;  %v5325_v53 = vadd.f32 %v5324_v14, %v5323_v54  ;;  %v6790_v49 = vpop.f32.mrf.mxu1  ;;  %v4988_v9 = vadd.f32 %v9667_v33, %v4776_v46  ;;  %v5330_v43 = vsel %vm205_vm1, %v5293_v36, 0.0  ;;  %v9815_v33 = vpop.f32.mrf.mxu0 }
 0x477   : > { %v5226_v57 = vsel %vm205_vm1, %v9778_v41, 0.0  ;;  %v5292_v30 = vmul.f32 %v9778_v41, %v9778_v41  ;;  %v5230_v50 = vsel %vm205_vm1, %v9776_v7, 0.0  ;;  %v9807_v55 = vadd.f32 %v6790_v49, %v4989_v32 }
 0x478   : > { %v5327_v58 = vadd.f32 %v5326_v29, %v5325_v53  ;;  %v5227_v3 = vadd.f32 %v5226_v57, %v5225_v47  ;;  %v5090_v17 = vpop.f32.mrf.mxu1  ;;  %v4579_v63 = vadd.f32 %v9513_v61, %v9525_v19  ;;  %v4582_v52 = vadd.f32 %v9521_v44, %v9533_v42  ;;  %v9837_v32 = vpop.f32.mrf.mxu0 }
 0x479   : > { %v5328_v40 = vsel %vm205_vm1, %v5292_v30, 0.0  ;;  %v9800_v6 = vadd.f32 %v5090_v17, %v4987_v10  ;;  %v5332_v51 = vsel %vm205_vm1, %v5294_v23, 0.0  ;;  %v4991_v44 = vadd.f32 %v9681_v13, %v4779_v35 }
 0x47a   : > { %v5229_v37 = vadd.f32 %v5228_v21, %v5227_v3  ;;  %v5329_v34 = vadd.f32 %v5328_v40, %v5327_v58  ;;  %v6791_v0 = vpop.f32.mrf.mxu1  ;;  %v4780_v49 = vadd.f32 %v9644_v1, %v4579_v63  ;;  %v5297_v42 = vmul.f32 %v9807_v55, %v9807_v55 }
 0x47b   : > { %v5295_v54 = vmul.f32 %v9800_v6, %v9800_v6  ;;  %v5232_v46 = vsel %vm205_vm1, %v9800_v6, 0.0  ;;  %v9820_v47 = vadd.f32 %v6791_v0, %v4990_v18  ;;  %v4993_v1 = vadd.f32 %v9674_v27, %v9635_v45 }
 0x47c   : > { %v5331_v12 = vadd.f32 %v5330_v43, %v5329_v34  ;;  %v5231_v62 = vadd.f32 %v5230_v50, %v5229_v37  ;;  %v5093_v14 = vpop.f32.mrf.mxu1  ;;  %v4994_v13 = vadd.f32 %v9688_v5, %v9642_v48  ;;  %v5236_v17 = vsel %vm205_vm1, %v9807_v55, 0.0 }
 0x47d   : > { %v9822_v53 = vadd.f32 %v5093_v14, %v4988_v9  ;;  %v5334_v36 = vsel %vm205_vm1, %v5295_v54, 0.0  ;;  %v5298_v18 = vmul.f32 %v9820_v47, %v9820_v47  ;;  %v4783_v40 = vadd.f32 %v9651_v60, %v4582_v52  ;;  %v10398_v60 = vld [vmem:[#allocation37_spill] sm:$0xff] }
 0x47e   : > { %v5233_v61 = vadd.f32 %v5232_v46, %v5231_v62  ;;  %v5333_v19 = vadd.f32 %v5332_v51, %v5331_v12  ;;  %v6794_v10 = vpop.f32.mrf.mxu1  ;;  %v4992_v37 = vadd.f32 %v9695_v4, %v4780_v49  ;;  %v5338_v48 = vsel %vm205_vm1, %v5297_v42, 0.0  ;;  %v9859_v4 = vpop.f32.mrf.mxu0  ;;  %v10399_v51 = vld [vmem:[#allocation49_spill] sm:$0xff] }
 0x47f   : > { %v5234_v29 = vsel %vm205_vm1, %v9822_v53, 0.0  ;;  %v5296_v57 = vmul.f32 %v9822_v53, %v9822_v53  ;;  %v5238_v5 = vsel %vm205_vm1, %v9820_v47, 0.0  ;;  %v9851_v34 = vadd.f32 %v6794_v10, %v4993_v1 }
 0x480   : > { %v5335_v30 = vadd.f32 %v5334_v36, %v5333_v19  ;;  %v5235_v58 = vadd.f32 %v5234_v29, %v5233_v61  ;;  %v5106_v3 = vpop.f32.mrf.mxu1  ;;  %v4583_v9 = vadd.f32 %v9529_v39, %v9541_v31  ;;  %v4586_v43 = vadd.f32 %v10398_v60, %v9549_v20  ;;  %v10400_v29 = vld [vmem:[#allocation62_spill] sm:$0xff]  ;;  %v9881_v1 = vpop.f32.mrf.mxu0 }
 0x481   : > { %v5336_v21 = vsel %vm205_vm1, %v5296_v57, 0.0  ;;  %v9844_v23 = vadd.f32 %v5106_v3, %v4991_v44  ;;  %v5340_v52 = vsel %vm205_vm1, %v5298_v18, 0.0  ;;  %v4995_v20 = vadd.f32 %v9710_v28, %v4783_v40 }
 0x482   : > { %v5237_v35 = vadd.f32 %v5236_v17, %v5235_v58  ;;  %v5337_v45 = vadd.f32 %v5336_v21, %v5335_v30  ;;  %v6795_v27 = vpop.f32.mrf.mxu1  ;;  %v4784_v46 = vadd.f32 %v10399_v51, %v4583_v9  ;;  %v5301_v61 = vmul.f32 %v9851_v34, %v9851_v34  ;;  %v10401_v58 = vld [vmem:[#allocation64_spill] sm:$0xff] }
 0x483   : > { %v5299_v0 = vmul.f32 %v9844_v23, %v9844_v23  ;;  %v5240_v12 = vsel %vm205_vm1, %v9844_v23, 0.0  ;;  %v9864_v62 = vadd.f32 %v6795_v27, %v4994_v13  ;;  %v4997_v57 = vadd.f32 %v9704_v8, %v10400_v29  ;;  %v10402_v21 = vld [vmem:[#allocation48_spill] sm:$0xff] }
 0x484   : > { %v5339_v50 = vadd.f32 %v5338_v48, %v5337_v45  ;;  %v5239_v54 = vadd.f32 %v5238_v5, %v5237_v35  ;;  %v5109_v63 = vpop.f32.mrf.mxu1  ;;  %v4998_v28 = vadd.f32 %v9724_v24, %v10401_v58  ;;  %v5244_v3 = vsel %vm205_vm1, %v9851_v34, 0.0  ;;  %v10404_v9 = vld [vmem:[#allocation36_spill] sm:$0xff] }
 0x485   : > { %v9866_v14 = vadd.f32 %v5109_v63, %v4992_v37  ;;  %v5342_v19 = vsel %vm205_vm1, %v5299_v0, 0.0  ;;  %v5302_v13 = vmul.f32 %v9864_v62, %v9864_v62  ;;  %v4787_v40 = vadd.f32 %v10402_v21, %v4586_v43  ;;  %v10403_v0 = vld [vmem:[#allocation38_spill] sm:$0xff]  ;;  %v10406_v43 = vld [vmem:[#allocation39_spill] sm:$0xff] }
 0x486   : > { %v5241_v39 = vadd.f32 %v5240_v12, %v5239_v54  ;;  %v5341_v31 = vadd.f32 %v5340_v52, %v5339_v50  ;;  %v6798_v49 = vpop.f32.mrf.mxu1  ;;  %v4996_v27 = vadd.f32 %v9750_v22, %v4784_v46  ;;  %v5346_v24 = vsel %vm205_vm1, %v5301_v61, 0.0  ;;  %v10405_v50 = vld [vmem:[#allocation43_spill] sm:$0xff]  ;;  %v6773_v22 = vpop.f32.mrf.mxu0 }
 0x487   : > { %v5242_v10 = vsel %vm205_vm1, %v9866_v14, 0.0  ;;  %v5300_v44 = vmul.f32 %v9866_v14, %v9866_v14  ;;  %v5246_v37 = vsel %vm205_vm1, %v9864_v62, 0.0  ;;  %v9895_v48 = vadd.f32 %v6798_v49, %v4997_v57  ;;  %v10407_v49 = vld [vmem:[#allocation63_spill] sm:$0xff] }
 0x488   : > { %v5343_v42 = vadd.f32 %v5342_v19, %v5341_v31  ;;  %v5243_v36 = vadd.f32 %v5242_v10, %v5241_v39  ;;  %v5122_v30 = vpop.f32.mrf.mxu1  ;;  %v4587_v60 = vadd.f32 %v10404_v9, %v10403_v0  ;;  %v4590_v54 = vadd.f32 %v10406_v43, %v10405_v50  ;;  %v4951_v21 = vpop.f32.mrf.mxu0  ;;  %v10411_v43 = vld [vmem:[#allocation42_spill] sm:$0xff] }
 0x489   : > { %v5344_v17 = vsel %vm205_vm1, %v5300_v44, 0.0  ;;  %v9888_v18 = vadd.f32 %v5122_v30, %v4995_v20  ;;  %v5348_v51 = vsel %vm205_vm1, %v5302_v13, 0.0  ;;  %v4999_v44 = vadd.f32 %v9793_v15, %v4787_v40 }
 0x48a   : > { %v5245_v35 = vadd.f32 %v5244_v3, %v5243_v36  ;;  %v5345_v8 = vadd.f32 %v5344_v17, %v5343_v42  ;;  %v6799_v45 = vpop.f32.mrf.mxu1  ;;  %v4788_v20 = vadd.f32 %v10407_v49, %v4587_v60  ;;  %v5305_v42 = vmul.f32 %v9895_v48, %v9895_v48  ;;  %v10409_v17 = vld [vmem:[#allocation66_spill] sm:$0xff] }
 0x48b   : > { %v5303_v5 = vmul.f32 %v9888_v18, %v9888_v18  ;;  %v5248_v46 = vsel %vm205_vm1, %v9888_v18, 0.0  ;;  %v9906_v39 = vadd.f32 %v6799_v45, %v4998_v28  ;;  %v10408_v28 = vld [vmem:[#allocation47_spill] sm:$0xff]  ;;  %v5002_v15 = vadd.f32 %v9815_v33, %v10409_v17 }
 0x48c   : > { %v5347_v63 = vadd.f32 %v5346_v24, %v5345_v8  ;;  %v5247_v52 = vadd.f32 %v5246_v37, %v5245_v35  ;;  %v5125_v12 = vpop.f32.mrf.mxu1  ;;  %v5001_v3 = vadd.f32 %v9771_v2, %v10408_v28  ;;  %v5252_v40 = vsel %vm205_vm1, %v9895_v48, 0.0 }
 0x48d   : > { %v9908_v31 = vadd.f32 %v5125_v12, %v4996_v27  ;;  %v5350_v36 = vsel %vm205_vm1, %v5303_v5, 0.0  ;;  %v5306_v35 = vmul.f32 %v9906_v39, %v9906_v39  ;;  %v10410_v27 = vld [vmem:[#allocation68_spill] sm:$0xff]  ;;  %v5000_v0 = vadd.f32 %v9837_v32, %v4788_v20  ;;  %v6776_v32 = vpop.f32.mrf.mxu0 }
 0x48e   : > { %v5249_v61 = vadd.f32 %v5248_v46, %v5247_v52  ;;  %v5349_v19 = vadd.f32 %v5348_v51, %v5347_v63  ;;  %v6802_v10 = vpop.f32.mrf.mxu1  ;;  %v4791_v24 = vadd.f32 %v10410_v27, %v4590_v54  ;;  %v5354_v33 = vsel %vm205_vm1, %v5305_v42, 0.0  ;;  %v10412_v63 = vld [vmem:[#allocation40_spill] sm:$0xff]  ;;  %v10414_v54 = vld [vmem:[#allocation41_spill] sm:$0xff]  ;;  %v10415_v42 = vld [vmem:[#allocation50_spill] sm:$0xff] }
 0x48f   : > { %v5250_v29 = vsel %vm205_vm1, %v9908_v31, 0.0  ;;  %v5304_v57 = vmul.f32 %v9908_v31, %v9908_v31  ;;  %v5254_v9 = vsel %vm205_vm1, %v9906_v39, 0.0  ;;  %v9935_v60 = vadd.f32 %v6802_v10, %v5001_v3  ;;  %v10413_v12 = vld [vmem:[#allocation44_spill] sm:$0xff] }
 0x490   : > { %v5351_v30 = vadd.f32 %v5350_v36, %v5349_v19  ;;  %v5251_v58 = vadd.f32 %v5250_v29, %v5249_v61  ;;  %v5138_v13 = vpop.f32.mrf.mxu1  ;;  %v4591_v52 = vadd.f32 %v10412_v63, %v10411_v43  ;;  %v4594_v51 = vadd.f32 %v10414_v54, %v10413_v12 }
 0x491   : > { %v5352_v8 = vsel %vm205_vm1, %v5304_v57, 0.0  ;;  %v9928_v45 = vadd.f32 %v5138_v13, %v4999_v44  ;;  %v5356_v20 = vsel %vm205_vm1, %v5306_v35, 0.0  ;;  %v5309_v28 = vmul.f32 %v9935_v60, %v9935_v60  ;;  %v10416_v35 = vld [vmem:[#allocation65_spill] sm:$0xff] }
 0x492   : > { %v5253_v37 = vadd.f32 %v5252_v40, %v5251_v58  ;;  %v5353_v5 = vadd.f32 %v5352_v8, %v5351_v30  ;;  %v6803_v2 = vpop.f32.mrf.mxu1  ;;  %v4792_v36 = vadd.f32 %v10415_v42, %v4591_v52  ;;  %v5003_v58 = vadd.f32 %v9881_v1, %v4791_v24  ;;  %v4964_v1 = vpop.f32.mrf.mxu0 }
 0x493   : > { %v5307_v50 = vmul.f32 %v9928_v45, %v9928_v45  ;;  %v5256_v19 = vsel %vm205_vm1, %v9928_v45, 0.0  ;;  %v9946_v10 = vadd.f32 %v6803_v2, %v5002_v15  ;;  %v5005_v8 = vadd.f32 %v9859_v4, %v10416_v35 }
 0x494   : > { %v5355_v46 = vadd.f32 %v5354_v33, %v5353_v5  ;;  %v5255_v49 = vadd.f32 %v5254_v9, %v5253_v37  ;;  %v5141_v61 = vpop.f32.mrf.mxu1  ;;  %v10417_v37 = vld [vmem:[#allocation52_spill] sm:$0xff]  ;;  %v5260_v24 = vsel %vm205_vm1, %v9935_v60, 0.0  ;;  %v10418_v9 = vld [vmem:[#allocation70_spill] sm:$0xff]  ;;  %v5004_v4 = vadd.f32 %v4951_v21, %v4792_v36 }
 0x495   : > { %v9948_v44 = vadd.f32 %v5141_v61, %v5000_v0  ;;  %v5358_v3 = vsel %vm205_vm1, %v5307_v50, 0.0  ;;  %v5006_v5 = vadd.f32 %v6773_v22, %v10417_v37  ;;  %v5310_v2 = vmul.f32 %v9946_v10, %v9946_v10  ;;  %v10420_v61 = vld [vmem:[#allocation46_spill] sm:$0xff] }
 0x496   : > { %v5257_v29 = vadd.f32 %v5256_v19, %v5255_v49  ;;  %v5357_v57 = vadd.f32 %v5356_v20, %v5355_v46  ;;  %v6806_v30 = vpop.f32.mrf.mxu1  ;;  %v4795_v50 = vadd.f32 %v10418_v9, %v4594_v51  ;;  %v5362_v12 = vsel %vm205_vm1, %v5309_v28, 0.0  ;;  %v10419_v49 = vld [vmem:[#allocation45_spill] sm:$0xff] }
 0x497   : > { %v5258_v13 = vsel %vm205_vm1, %v9948_v44, 0.0  ;;  %v5308_v17 = vmul.f32 %v9948_v44, %v9948_v44  ;;  %v5262_v22 = vsel %vm205_vm1, %v9946_v10, 0.0  ;;  %v9973_v54 = vadd.f32 %v6806_v30, %v5005_v8 }
 0x498   : > { %v5359_v15 = vadd.f32 %v5358_v3, %v5357_v57  ;;  %v5259_v40 = vadd.f32 %v5258_v13, %v5257_v29  ;;  %v5154_v27 = vpop.f32.mrf.mxu1  ;;  %v4595_v20 = vadd.f32 %v10420_v61, %v10419_v49  ;;  %v6777_v29 = vpop.f32.mrf.mxu0  ;;  %v5364_v57 = vsel %vm205_vm1, %v5310_v2, 0.0 }
 0x499   : > { %v5360_v0 = vsel %vm205_vm1, %v5308_v17, 0.0  ;;  %v9967_v33 = vadd.f32 %v5154_v27, %v5003_v58  ;;  %v5007_v17 = vadd.f32 %v4964_v1, %v4795_v50  ;;  %v5268_v1 = vsel %vm205_vm1, %v9973_v54, 0.0 }
 0x49a   : > { %v5261_v43 = vadd.f32 %v5260_v24, %v5259_v40  ;;  %v5361_v63 = vadd.f32 %v5360_v0, %v5359_v15  ;;  %v6807_v52 = vpop.f32.mrf.mxu1  ;;  %v4796_v30 = vadd.f32 %v9700_v25, %v4595_v20  ;;  %v5313_v15 = vmul.f32 %v9973_v54, %v9973_v54  ;;  %v4967_v2 = vpop.f32.mrf.mxu0 }
 0x49b   : > { %v5311_v46 = vmul.f32 %v9967_v33, %v9967_v33  ;;  %v5264_v21 = vsel %vm205_vm1, %v9967_v33, 0.0  ;;  %v9982_v36 = vadd.f32 %v6807_v52, %v5006_v5  ;;  %v10421_v5 = vld [vmem:[#allocation54_spill] sm:$0xff]  ;;  %v10422_v52 = vld [vmem:[#allocation67_spill] sm:$0xff] }
 0x49c   : > { %v5363_v19 = vadd.f32 %v5362_v12, %v5361_v63  ;;  %v5263_v42 = vadd.f32 %v5262_v22, %v5261_v43  ;;  %v5157_v51 = vpop.f32.mrf.mxu1  ;;  %v5009_v24 = vadd.f32 %v6776_v32, %v10421_v5  ;;  %v5008_v22 = vadd.f32 %v4967_v2, %v4796_v30 }
 0x49d   : > { %v9984_v58 = vadd.f32 %v5157_v51, %v5004_v4  ;;  %v5366_v40 = vsel %vm205_vm1, %v5311_v46, 0.0  ;;  %v5314_v0 = vmul.f32 %v9982_v36, %v9982_v36  ;;  %v5010_v4 = vadd.f32 %v6777_v29, %v10422_v52 }
 0x49e   : > { %v5265_v28 = vadd.f32 %v5264_v21, %v5263_v42  ;;  %v5365_v3 = vadd.f32 %v5364_v57, %v5363_v19  ;;  %v6810_v13 = vpop.f32.mrf.mxu1  ;;  %v5370_v32 = vsel %vm205_vm1, %v5313_v15, 0.0  ;;  %v5270_v46 = vsel %vm205_vm1, %v9982_v36, 0.0 }
 0x49f   : > { %v5266_v35 = vsel %vm205_vm1, %v9984_v58, 0.0  ;;  %v5312_v8 = vmul.f32 %v9984_v58, %v9984_v58  ;;  %v10006_v49 = vadd.f32 %v6810_v13, %v5009_v24  ;;  %v5372_v51 = vsel %vm205_vm1, %v5314_v0, 0.0 }
 0x4a0   : > { %v5367_v27 = vadd.f32 %v5366_v40, %v5365_v3  ;;  %v5267_v37 = vadd.f32 %v5266_v35, %v5265_v28  ;;  %v5170_v25 = vpop.f32.mrf.mxu1 }
 0x4a1   : > { %v5368_v9 = vsel %vm205_vm1, %v5312_v8, 0.0  ;;  %v10000_v50 = vadd.f32 %v5170_v25, %v5007_v17  ;;  %v5317_v3 = vmul.f32 %v10006_v49, %v10006_v49  ;;  %v5276_v8 = vsel %vm205_vm1, %v10006_v49, 0.0 }
 0x4a2   : > { %v5269_v43 = vadd.f32 %v5268_v1, %v5267_v37  ;;  %v5369_v63 = vadd.f32 %v5368_v9, %v5367_v27  ;;  %v6811_v12 = vpop.f32.mrf.mxu1 }
 0x4a3   : > { %v5315_v61 = vmul.f32 %v10000_v50, %v10000_v50  ;;  %v5272_v29 = vsel %vm205_vm1, %v10000_v50, 0.0  ;;  %v10013_v57 = vadd.f32 %v6811_v12, %v5010_v4  ;;  %v5378_v25 = vsel %vm205_vm1, %v5317_v3, 0.0 }
 0x4a4   : > { %v5371_v20 = vadd.f32 %v5370_v32, %v5369_v63  ;;  %v5271_v19 = vadd.f32 %v5270_v46, %v5269_v43  ;;  %v5173_v42 = vpop.f32.mrf.mxu1 }
 0x4a5   : > { %v10015_v21 = vadd.f32 %v5173_v42, %v5008_v22  ;;  %v5374_v13 = vsel %vm205_vm1, %v5315_v61, 0.0  ;;  %v5318_v27 = vmul.f32 %v10013_v57, %v10013_v57  ;;  %v5278_v2 = vsel %vm205_vm1, %v10013_v57, 0.0 }
 0x4a6   : > { %v5273_v30 = vadd.f32 %v5272_v29, %v5271_v19  ;;  %v5373_v28 = vadd.f32 %v5372_v51, %v5371_v20 }
 0x4a7   : > { %v5274_v17 = vsel %vm205_vm1, %v10015_v21, 0.0  ;;  %v5316_v15 = vmul.f32 %v10015_v21, %v10015_v21  ;;  %v5380_v9 = vsel %vm205_vm1, %v5318_v27, 0.0 }
 0x4a8   : > { %v5375_v40 = vadd.f32 %v5374_v13, %v5373_v28  ;;  %v5275_v35 = vadd.f32 %v5274_v17, %v5273_v30 }
 0x4a9   : > { %v5376_v37 = vsel %vm205_vm1, %v5316_v15, 0.0 }
 0x4aa   : > { %v5277_v5 = vadd.f32 %v5276_v8, %v5275_v35  ;;  %v5377_v24 = vadd.f32 %v5376_v37, %v5375_v40 }
 0x4ac   : > { %v5279_v1 = vadd.f32 %v5278_v2, %v5277_v5  ;;  %v5379_v0 = vadd.f32 %v5378_v25, %v5377_v24 }
 0x4ae   : > { %v5280_v43 = vrot.slane %v5279_v1, 4  ;;  %v5381_v63 = vadd.f32 %v5380_v9, %v5379_v0 }
 0x4b0   : > { %v5281_v52 = vadd.f32 %v5280_v43, %v5279_v1  ;;  %v5382_v4 = vrot.slane %v5381_v63, 4 }
 0x4b2   : > { %v5282_v12 = vrot.slane %v5281_v52, 2  ;;  %v5383_v22 = vadd.f32 %v5382_v4, %v5381_v63 }
 0x4b4   : > { %v5283_v32 = vadd.f32 %v5282_v12, %v5281_v52  ;;  %v5384_v46 = vrot.slane %v5383_v22, 2 }
 0x4b6   : > { %v5284_v61 = vrot.slane %v5283_v32, 1  ;;  %v5385_v20 = vadd.f32 %v5384_v46, %v5383_v22 }
 0x4b8   : > { %v5285_v19 = vadd.f32 %v5284_v61, %v5283_v32  ;;  %v5386_v42 = vrot.slane %v5385_v20, 1 }
 0x4ba   : > { %v10033_v51 = vmul.f32 0.00390625, %v5285_v19  ;;  %v5387_v29 = vadd.f32 %v5386_v42, %v5385_v20 }
 0x4bc   : > { %v5388_v30 = vmul.f32 0.00390625, %v5387_v29  ;;  %v5389_v28 = vmul.f32 %v10033_v51, %v10033_v51  ;;  %v5401_v13 = vsub.f32 %v9822_v53, %v10033_v51  ;;  %v5404_v17 = vsub.f32 %v9844_v23, %v10033_v51 }
 0x4bd   : > { %v5405_v40 = vsub.f32 %v9866_v14, %v10033_v51  ;;  %v5406_v35 = vsub.f32 %v9851_v34, %v10033_v51  ;;  %v5407_v8 = vsub.f32 %v9864_v62, %v10033_v51  ;;  %v5408_v27 = vsub.f32 %v9888_v18, %v10033_v51 }
 0x4be   : > { %v5390_v3 = vsub.f32 %v5388_v30, %v5389_v28  ;;  %v5409_v37 = vsub.f32 %v9908_v31, %v10033_v51  ;;  %v5410_v53 = vsub.f32 %v9895_v48, %v10033_v51  ;;  %v5411_v23 = vsub.f32 %v9906_v39, %v10033_v51 }
 0x4bf   : > { %v5412_v14 = vsub.f32 %v9928_v45, %v10033_v51  ;;  %v5413_v34 = vsub.f32 %v9948_v44, %v10033_v51  ;;  %v5414_v62 = vsub.f32 %v9935_v60, %v10033_v51  ;;  %v5415_v18 = vsub.f32 %v9946_v10, %v10033_v51 }
 0x4c0   : > { %v5391_v15 = vmax.f32 %v5390_v3, 0.0  ;;  %v5416_v31 = vsub.f32 %v9967_v33, %v10033_v51  ;;  %v5417_v48 = vsub.f32 %v9984_v58, %v10033_v51  ;;  %v5418_v39 = vsub.f32 %v9973_v54, %v10033_v51 }
 0x4c1   : > { %v5419_v45 = vsub.f32 %v9982_v36, %v10033_v51  ;;  %v5420_v44 = vsub.f32 %v10000_v50, %v10033_v51  ;;  %v5421_v60 = vsub.f32 %v10015_v21, %v10033_v51  ;;  %v5422_v10 = vsub.f32 %v10006_v49, %v10033_v51 }
 0x4c2   : > { %v5423_v33 = vsub.f32 %v10013_v57, %v10033_v51  ;;  %v5424_v5 = vadd.f32 1e-05, %v5391_v15  ;;  %v5392_v54 = vsub.f32 %v9714_v11, %v10033_v51  ;;  %v5393_v36 = vsub.f32 %v9730_v38, %v10033_v51 }
 0x4c3   : > { %v5394_v58 = vsub.f32 %v9717_v59, %v10033_v51  ;;  %v5395_v50 = vsub.f32 %v9728_v16, %v10033_v51  ;;  %v5396_v49 = vsub.f32 %v9756_v26, %v10033_v51  ;;  %v5397_v57 = vsub.f32 %v9778_v41, %v10033_v51 }
 0x4c4   : > { %6840 = vrsqrt.f32 %v5424_v5  ;;  %v5398_v21 = vsub.f32 %v9763_v56, %v10033_v51  ;;  %v5399_v11 = vsub.f32 %v9776_v7, %v10033_v51  ;;  %v5400_v38 = vsub.f32 %v9800_v6, %v10033_v51 }
 0x4c5   : > { %v5402_v59 = vsub.f32 %v9807_v55, %v10033_v51  ;;  %v5403_v16 = vsub.f32 %v9820_v47, %v10033_v51 }
 0x4d1   : > { %v6841_v24 = vpop.eup %6840 }
 0x4d2   : > { %v5426_v26 = vmul.f32 %v6841_v24, %v5392_v54  ;;  %v5427_v25 = vmul.f32 %v6841_v24, %v5393_v36  ;;  %v5428_v2 = vmul.f32 %v6841_v24, %v5394_v58  ;;  %v5429_v41 = vmul.f32 %v6841_v24, %v5395_v50  ;;  %v10433_v54 = vld [vmem:[#allocation14_spill] sm:$0xff]  ;;  %v10434_v58 = vld [vmem:[#allocation15_spill] sm:$0xff] }
 0x4d3   : > { %v5430_v1 = vmul.f32 %v6841_v24, %v5396_v49  ;;  %v5431_v0 = vmul.f32 %v6841_v24, %v5397_v57  ;;  %v5432_v56 = vmul.f32 %v6841_v24, %v5398_v21  ;;  %v5433_v9 = vmul.f32 %v6841_v24, %v5399_v11  ;;  %v10435_v49 = vld [vmem:[#allocation16_spill] sm:$0xff]  ;;  %v10436_v21 = vld [vmem:[#allocation17_spill] sm:$0xff]  ;;  %v10437_v11 = vld [vmem:[#allocation18_spill] sm:$0xff] }
 0x4d4   : > { %v5434_v43 = vmul.f32 %v6841_v24, %v5400_v38  ;;  %v5435_v63 = vmul.f32 %v6841_v24, %v5401_v13  ;;  %v5436_v7 = vmul.f32 %v6841_v24, %v5402_v59  ;;  %v5437_v52 = vmul.f32 %v6841_v24, %v5403_v16  ;;  %v10438_v59 = vld [vmem:[#allocation19_spill] sm:$0xff] }
 0x4d5   : > { %v5438_v4 = vmul.f32 %v6841_v24, %v5404_v17  ;;  %v5439_v6 = vmul.f32 %v6841_v24, %v5405_v40  ;;  %v5440_v12 = vmul.f32 %v6841_v24, %v5406_v35  ;;  %v5441_v55 = vmul.f32 %v6841_v24, %v5407_v8  ;;  %v10423_v40 = vld [vmem:[#allocation6_spill] sm:$0xff]  ;;  %v10424_v8 = vld [vmem:[#allocation7_spill] sm:$0xff] }
 0x4d6   : > { %v5442_v22 = vmul.f32 %v6841_v24, %v5408_v27  ;;  %v5443_v32 = vmul.f32 %v6841_v24, %v5409_v37  ;;  %v5444_v47 = vmul.f32 %v6841_v24, %v5410_v53  ;;  %v5445_v46 = vmul.f32 %v6841_v24, %v5411_v23  ;;  %v10425_v37 = vld [vmem:[#allocation4_spill] sm:$0xff]  ;;  %v10426_v23 = vld [vmem:[#allocation5_spill] sm:$0xff] }
 0x4d7   : > { %v5446_v61 = vmul.f32 %v6841_v24, %v5412_v14  ;;  %v5447_v20 = vmul.f32 %v6841_v24, %v5413_v34  ;;  %v5448_v19 = vmul.f32 %v6841_v24, %v5414_v62  ;;  %v5449_v42 = vmul.f32 %v6841_v24, %v5415_v18  ;;  %v10427_v34 = vld [vmem:[#allocation8_spill] sm:$0xff]  ;;  %v10428_v18 = vld [vmem:[#allocation9_spill] sm:$0xff] }
 0x4d8   : > { %v5450_v51 = vmul.f32 %v6841_v24, %v5416_v31  ;;  %v5451_v29 = vmul.f32 %v6841_v24, %v5417_v48  ;;  %v5452_v30 = vmul.f32 %v6841_v24, %v5418_v39  ;;  %v5453_v28 = vmul.f32 %v6841_v24, %v5419_v45  ;;  %v10429_v48 = vld [vmem:[#allocation10_spill] sm:$0xff]  ;;  %v10430_v45 = vld [vmem:[#allocation11_spill] sm:$0xff] }
 0x4d9   : > { %v5454_v3 = vmul.f32 %v6841_v24, %v5420_v44  ;;  %v5455_v13 = vmul.f32 %v6841_v24, %v5421_v60  ;;  %v5456_v17 = vmul.f32 %v6841_v24, %v5422_v10  ;;  %v5457_v15 = vmul.f32 %v6841_v24, %v5423_v33  ;;  %v10431_v60 = vld [vmem:[#allocation12_spill] sm:$0xff]  ;;  %v10432_v33 = vld [vmem:[#allocation13_spill] sm:$0xff] }
 0x4da   : > { %v5458_v35 = vadd.f32 %v5426_v26, %v10423_v40  ;;  %v5459_v27 = vadd.f32 %v5427_v25, %v10424_v8  ;;  %v5460_v53 = vadd.f32 %v5428_v2, %v10425_v37  ;;  %v5461_v14 = vadd.f32 %v5429_v41, %v10426_v23  ;;  %v10439_v26 = vld [vmem:[#allocation20_spill] sm:$0xff]  ;;  %v10440_v2 = vld [vmem:[#allocation21_spill] sm:$0xff] }
 0x4db   : > { %v5462_v62 = vadd.f32 %v5430_v1, %v10427_v34  ;;  %v5463_v31 = vadd.f32 %v5431_v0, %v10428_v18  ;;  %v5464_v39 = vadd.f32 %v5432_v56, %v10429_v48  ;;  %v5465_v44 = vadd.f32 %v5433_v9, %v10430_v45  ;;  %v10441_v1 = vld [vmem:[#allocation22_spill] sm:$0xff]  ;;  %v10442_v56 = vld [vmem:[#allocation23_spill] sm:$0xff]  ;;  %v10452_v40 = vld [vmem:[#allocation33_spill] sm:$0xff] }
 0x4dc   : > { %v5466_v10 = vadd.f32 %v5434_v43, %v10431_v60  ;;  %v5467_v5 = vadd.f32 %v5435_v63, %v10432_v33  ;;  %v5468_v36 = vadd.f32 %v5436_v7, %v10433_v54  ;;  %v5469_v50 = vadd.f32 %v5437_v52, %v10434_v58  ;;  %5490 = vst.msk [vmem:[%s10106_s5] sm:$0xff] %vm205_vm1, %v5458_v35  ;;  %v10443_v43 = vld [vmem:[#allocation24_spill] sm:$0xff]  ;;  %v10444_v7 = vld [vmem:[#allocation25_spill] sm:$0xff]  ;;  %v10453_v35 = vld [vmem:[#allocation34_spill] sm:$0xff] }
 0x4dd   : > { %5491 = vst.msk [vmem:[%s10106_s5 + $0x8] sm:$0xff] %vm205_vm1, %v5459_v27  ;;  %5492 = vst.msk [vmem:[%s10106_s5 + $0x10] sm:$0xff] %vm205_vm1, %v5460_v53  ;;  %v5470_v57 = vadd.f32 %v5438_v4, %v10435_v49  ;;  %v5471_v24 = vadd.f32 %v5439_v6, %v10436_v21  ;;  %v5472_v38 = vadd.f32 %v5440_v12, %v10437_v11  ;;  %v10445_v4 = vld [vmem:[#allocation26_spill] sm:$0xff]  ;;  %v10446_v12 = vld [vmem:[#allocation27_spill] sm:$0xff] }
 0x4de   : > { %5493 = vst.msk [vmem:[%s10106_s5 + $0x18] sm:$0xff] %vm205_vm1, %v5461_v14  ;;  %v5473_v16 = vadd.f32 %v5441_v55, %v10438_v59  ;;  %5494 = vst.msk [vmem:[%s10106_s5 + $0x20] sm:$0xff] %vm205_vm1, %v5462_v62  ;;  %v5474_v25 = vadd.f32 %v5442_v22, %v10439_v26  ;;  %v5475_v41 = vadd.f32 %v5443_v32, %v10440_v2  ;;  %v10447_v22 = vld [vmem:[#allocation28_spill] sm:$0xff] }
 0x4df   : > { %5495 = vst.msk [vmem:[%s10106_s5 + $0x28] sm:$0xff] %vm205_vm1, %v5463_v31  ;;  %5496 = vst.msk [vmem:[%s10106_s5 + $0x30] sm:$0xff] %vm205_vm1, %v5464_v39  ;;  %v5476_v0 = vadd.f32 %v5444_v47, %v10441_v1  ;;  %v5477_v9 = vadd.f32 %v5445_v46, %v10442_v56  ;;  %v5478_v63 = vadd.f32 %v5446_v61, %v10443_v43  ;;  %v10448_v47 = vld [vmem:[#allocation29_spill] sm:$0xff]  ;;  %v10449_v61 = vld [vmem:[#allocation30_spill] sm:$0xff] }
 0x4e0   : > { %5497 = vst.msk [vmem:[%s10106_s5 + $0x38] sm:$0xff] %vm205_vm1, %v5465_v44  ;;  %5498 = vst.msk [vmem:[%s10106_s5 + $0x40] sm:$0xff] %vm205_vm1, %v5466_v10  ;;  %v5479_v52 = vadd.f32 %v5447_v20, %v10444_v7  ;;  %v5480_v6 = vadd.f32 %v5448_v19, %v10445_v4  ;;  %v5481_v55 = vadd.f32 %v5449_v42, %v10446_v12  ;;  %v10450_v19 = vld [vmem:[#allocation31_spill] sm:$0xff] }
 0x4e1   : > { %5499 = vst.msk [vmem:[%s10106_s5 + $0x48] sm:$0xff] %vm205_vm1, %v5467_v5  ;;  %5500 = vst.msk [vmem:[%s10106_s5 + $0x50] sm:$0xff] %vm205_vm1, %v5468_v36  ;;  %v5482_v32 = vadd.f32 %v5450_v51, %v10447_v22  ;;  %v5483_v46 = vadd.f32 %v5451_v29, %v10448_v47  ;;  %v5484_v20 = vadd.f32 %v5452_v30, %v10449_v61  ;;  %v10451_v51 = vld [vmem:[#allocation32_spill] sm:$0xff] }
 0x4e2   : > { %5501 = vst.msk [vmem:[%s10106_s5 + $0x58] sm:$0xff] %vm205_vm1, %v5469_v50  ;;  %5502 = vst.msk [vmem:[%s10106_s5 + $0x60] sm:$0xff] %vm205_vm1, %v5470_v57  ;;  %v5485_v42 = vadd.f32 %v5453_v28, %v10450_v19  ;;  %v5486_v29 = vadd.f32 %v5454_v3, %v10451_v51  ;;  %v5487_v30 = vadd.f32 %v5455_v13, %v10452_v40  ;;  %v10454_v28 = vld [vmem:[#allocation35_spill] sm:$0xff] }
 0x4e3   : > { %5503 = vst.msk [vmem:[%s10106_s5 + $0x68] sm:$0xff] %vm205_vm1, %v5471_v24  ;;  %5504 = vst.msk [vmem:[%s10106_s5 + $0x70] sm:$0xff] %vm205_vm1, %v5472_v38  ;;  %v5488_v8 = vadd.f32 %v5456_v17, %v10453_v35  ;;  %v5489_v27 = vadd.f32 %v5457_v15, %v10454_v28 }
 0x4e4   : > { %5505 = vst.msk [vmem:[%s10106_s5 + $0x78] sm:$0xff] %vm205_vm1, %v5473_v16  ;;  %5506 = vst.msk [vmem:[%s10106_s5 + $0x80] sm:$0xff] %vm205_vm1, %v5474_v25 }
 0x4e5   : > { %5507 = vst.msk [vmem:[%s10106_s5 + $0x88] sm:$0xff] %vm205_vm1, %v5475_v41  ;;  %5508 = vst.msk [vmem:[%s10106_s5 + $0x90] sm:$0xff] %vm205_vm1, %v5476_v0 }
 0x4e6   : > { %5509 = vst.msk [vmem:[%s10106_s5 + $0x98] sm:$0xff] %vm205_vm1, %v5477_v9  ;;  %5510 = vst.msk [vmem:[%s10106_s5 + $0xa0] sm:$0xff] %vm205_vm1, %v5478_v63 }
 0x4e7   : > { %5511 = vst.msk [vmem:[%s10106_s5 + $0xa8] sm:$0xff] %vm205_vm1, %v5479_v52  ;;  %5512 = vst.msk [vmem:[%s10106_s5 + $0xb0] sm:$0xff] %vm205_vm1, %v5480_v6 }
 0x4e8   : > { %5513 = vst.msk [vmem:[%s10106_s5 + $0xb8] sm:$0xff] %vm205_vm1, %v5481_v55  ;;  %5514 = vst.msk [vmem:[%s10106_s5 + $0xc0] sm:$0xff] %vm205_vm1, %v5482_v32 }
 0x4e9   : > { %5515 = vst.msk [vmem:[%s10106_s5 + $0xc8] sm:$0xff] %vm205_vm1, %v5483_v46  ;;  %5516 = vst.msk [vmem:[%s10106_s5 + $0xd0] sm:$0xff] %vm205_vm1, %v5484_v20 }
 0x4ea   : > { %5517 = vst.msk [vmem:[%s10106_s5 + $0xd8] sm:$0xff] %vm205_vm1, %v5485_v42  ;;  %5518 = vst.msk [vmem:[%s10106_s5 + $0xe0] sm:$0xff] %vm205_vm1, %v5486_v29 }
 0x4eb   : > { %5519 = vst.msk [vmem:[%s10106_s5 + $0xe8] sm:$0xff] %vm205_vm1, %v5487_v30  ;;  %5520 = vst.msk [vmem:[%s10106_s5 + $0xf0] sm:$0xff] %vm205_vm1, %v5488_v8 }
 0x4ec   : > { %5521 = vst.msk [vmem:[%s10106_s5 + $0xf8] sm:$0xff] %vm205_vm1, %v5489_v27 }
 0x4ed PF: > { %s13_s12 = sadd.s32 1, %s6848_s12  }
 0x4ee   : > { %p10_p4 = scmp.ge.s32.totalorder %s13_s12, 4  }
 0x4f0   :  { %12 = sbr.rel (!%p10_p4) target bundleno = 1 (0x1), region = 82 }

</bundles_post_ra>
